<compile_context>
chip_gen: v7x
topology: tpu7x:2x2x1
jax: 0.10.0
libtpu: 0.0.40
codegen_flags: <defaults>
</compile_context>

<pallas_src>
import functools
import math

import jax
import jax.numpy as jnp
from jax import lax
from jax.experimental import pallas as pl
from jax.experimental.pallas import tpu as pltpu

DROP_OUT = 0.2      # TODO(synk): inter-layer dropout omitted (eval-mode forward semantics)
NUM_LAYERS = 4

_LANE = 128
_SUBLANE = 8
_VMEM_LIMIT = 32 * 1024 * 1024


def _round_up(x, m):
    return ((x + m - 1) // m) * m


# ----------------------------------------------------------------------------
# Pallas kernels
# ----------------------------------------------------------------------------
def _bilstm_layer_kernel(len_ref, x_ref, wih_ref, whh_ref, b_ref, out_ref,
                         h_scr, c_scr, gx_scr, *, hidden_pad, t_chunk, unroll):
    """Bidirectional LSTM layer; one (direction, time-chunk) grid step.

    Grid: (2, num_t_chunks).  dim 0 = direction (parallel), dim 1 = time chunk
    (arbitrary, sequential).  Backward direction walks chunks and in-chunk
    timesteps in reverse.

    len_ref : (B, 1)   int32  valid lengths (padded batch rows have length 0)
    x_ref   : (Tc, B, Din)    input chunk (time-major)
    wih_ref : (Din, 4H)       input->gates weights (this direction)
    whh_ref : (H, 4H)         hidden->gates weights (this direction)
    b_ref   : (1, 4H)         combined bias b_ih + b_hh (this direction)
    out_ref : (Tc, B, H)      this direction's H-slice of the (T, B, 2H) output
    h_scr/c_scr : (B, H)      recurrent state, persists across time chunks
    gx_scr  : (Tc*B, 4H)      precomputed input projection for the chunk
    """
    H = hidden_pad
    Tc = t_chunk
    B = x_ref.shape[1]
    Din = x_ref.shape[2]

    d = pl.program_id(0)                     # 0 = forward, 1 = backward
    tc = pl.program_id(1)                    # chunk counter (per direction)
    nt = pl.num_programs(1)

    @pl.when(tc == 0)
    def _():
        h_scr[...] = jnp.zeros_like(h_scr)
        c_scr[...] = jnp.zeros_like(c_scr)

    # ---- hoisted input projection: one large MXU matmul per chunk ----------
    x_all = x_ref[...].reshape(Tc * B, Din)
    gx_scr[...] = (jnp.dot(x_all, wih_ref[...],
                           preferred_element_type=jnp.float32) + b_ref[...])

    # loop-invariant loads hoisted out of the recurrence
    w_hh = whh_ref[...]                      # (H, 4H)
    lens = len_ref[...]                      # (B, 1) int32

    # global time block covered by this chunk (reversed ordering for backward)
    t_blk = (1 - d) * tc + d * (nt - 1 - tc)

    def step(lt, carry):
        # local time inside the chunk; backward direction walks it in reverse
        li = (1 - d) * lt + d * (Tc - 1 - lt)
        gt = t_blk * Tc + li                 # global (unreversed) time index

        h = h_scr[...]
        c = c_scr[...]

        row0 = pl.multiple_of(li * B, B)
        gates = gx_scr[pl.ds(row0, B), :] + jnp.dot(
            h, w_hh, preferred_element_type=jnp.float32)         # (B, 4H)

        i = jax.nn.sigmoid(gates[:, 0 * H:1 * H])
        f = jax.nn.sigmoid(gates[:, 1 * H:2 * H])
        g = jnp.tanh(gates[:, 2 * H:3 * H])
        o = jax.nn.sigmoid(gates[:, 3 * H:4 * H])

        c_new = f * c + i * g
        h_new = o * jnp.tanh(c_new)

        # packed-sequence semantics: hold state / zero output at padded steps
        m = (gt < lens).astype(jnp.float32)  # (B, 1), broadcasts over H
        c_scr[...] = c + m * (c_new - c)
        h_scr[...] = h + m * (h_new - h)
        out_ref[li] = m * h_new
        return carry

    lax.fori_loop(0, Tc, step, 0, unroll=unroll)


def _fc_kernel(x_ref, w_ref, b_ref, o_ref):
    """Dense head tile: (tn, K) @ (K, tc) + (1, tc)."""
    o_ref[...] = (jnp.dot(x_ref[...], w_ref[...],
                          preferred_element_type=jnp.float32) + b_ref[...])


# ----------------------------------------------------------------------------
# pallas_call wrappers
# ----------------------------------------------------------------------------
def _run_bilstm_layer(x_tbd, len_b1, w_ih, w_hh, b, hidden_pad, t_chunk):
    """x_tbd: (T_pad, B_pad, Din) -> (T_pad, B_pad, 2*hidden_pad)."""
    T, B, Din = x_tbd.shape
    H = hidden_pad
    Tc = t_chunk
    num_tc = T // Tc
    unroll = Tc if Tc <= 8 else 4

    def t_block(d, t):
        # forward: natural order; backward: reversed chunk order
        return (1 - d) * t + d * (num_tc - 1 - t)

    kernel = functools.partial(_bilstm_layer_kernel, hidden_pad=H,
                               t_chunk=Tc, unroll=unroll)
    return pl.pallas_call(
        kernel,
        out_shape=jax.ShapeDtypeStruct((T, B, 2 * H), jnp.float32),
        grid=(2, num_tc),
        in_specs=[
            pl.BlockSpec((B, 1), lambda d, t: (0, 0)),                    # lengths
            pl.BlockSpec((Tc, B, Din), lambda d, t: (t_block(d, t), 0, 0)),
            pl.BlockSpec((None, Din, 4 * H), lambda d, t: (d, 0, 0)),     # W_ih
            pl.BlockSpec((None, H, 4 * H), lambda d, t: (d, 0, 0)),       # W_hh
            pl.BlockSpec((None, 1, 4 * H), lambda d, t: (d, 0, 0)),       # bias
        ],
        out_specs=pl.BlockSpec((Tc, B, H), lambda d, t: (t_block(d, t), 0, d)),
        scratch_shapes=[
            pltpu.VMEM((B, H), jnp.float32),          # h
            pltpu.VMEM((B, H), jnp.float32),          # c
            pltpu.VMEM((Tc * B, 4 * H), jnp.float32),  # precomputed x-projection
        ],
        compiler_params=pltpu.CompilerParams(
            dimension_semantics=("parallel", "arbitrary"),
            vmem_limit_bytes=_VMEM_LIMIT),
    )(len_b1, x_tbd, w_ih, w_hh, b)


def _run_fc(x_flat, w, b, tile_n, tile_c):
    N, K = x_flat.shape
    C = w.shape[1]
    return pl.pallas_call(
        _fc_kernel,
        out_shape=jax.ShapeDtypeStruct((N, C), jnp.float32),
        grid=(N // tile_n, C // tile_c),
        in_specs=[
            pl.BlockSpec((tile_n, K), lambda i, j: (i, 0)),
            pl.BlockSpec((K, tile_c), lambda i, j: (0, j)),
            pl.BlockSpec((1, tile_c), lambda i, j: (0, j)),
        ],
        out_specs=pl.BlockSpec((tile_n, tile_c), lambda i, j: (i, j)),
        compiler_params=pltpu.CompilerParams(
            dimension_semantics=("parallel", "parallel"),
            vmem_limit_bytes=_VMEM_LIMIT),
    )(x_flat, w, b)


# ----------------------------------------------------------------------------
# Parameter preparation (PyTorch layout -> padded, transposed, dir-stacked)
# ----------------------------------------------------------------------------
def _pad_gate_rows(w, H, H_pad):
    """(4H, X) -> (4H_pad, X): each of the 4 gate blocks zero-padded to H_pad rows."""
    parts = []
    for g in range(4):
        blk = w[g * H:(g + 1) * H]
        parts.append(jnp.pad(blk, ((0, H_pad - H), (0, 0))))
    return jnp.concatenate(parts, axis=0)


def _pad_in_cols(w, splits):
    """(R, sum(orig)) -> (R, sum(padded)): zero-pad each input column block."""
    parts, off = [], 0
    for orig, padded in splits:
        blk = w[:, off:off + orig]
        parts.append(jnp.pad(blk, ((0, 0), (0, padded - orig))))
        off += orig
    return jnp.concatenate(parts, axis=1)


def prepare_params(params, input_size, hidden_size, num_classes,
                   hidden_pad, class_pad):
    H, Hp = hidden_size, hidden_pad
    prepped = {"lstm": []}
    for layer, p in enumerate(params["lstm"]):
        in_splits = ([(input_size, input_size)] if layer == 0
                     else [(H, Hp), (H, Hp)])
        wih, whh, bias = [], [], []
        for d in ("f", "b"):
            w_ih = _pad_in_cols(_pad_gate_rows(p[f"w_ih_{d}"], H, Hp), in_splits)
            w_hh = _pad_in_cols(_pad_gate_rows(p[f"w_hh_{d}"], H, Hp), [(H, Hp)])
            bb = _pad_gate_rows((p[f"b_ih_{d}"] + p[f"b_hh_{d}"])[:, None], H, Hp)
            wih.append(w_ih.T)            # (Din_pad, 4Hp)
            whh.append(w_hh.T)            # (Hp, 4Hp)
            bias.append(bb.T)             # (1, 4Hp)
        prepped["lstm"].append({
            "w_ih": jnp.stack(wih),       # (2, Din_pad, 4Hp)
            "w_hh": jnp.stack(whh),       # (2, Hp, 4Hp)
            "b": jnp.stack(bias),         # (2, 1, 4Hp)
        })
    fc_w = _pad_in_cols(params["fc_w"], [(H, Hp), (H, Hp)]).T        # (2Hp, C)
    fc_w = jnp.pad(fc_w, ((0, 0), (0, class_pad - num_classes)))     # (2Hp, Cp)
    fc_b = jnp.pad(params["fc_b"], (0, class_pad - num_classes))[None, :]
    prepped["fc_w"] = fc_w
    prepped["fc_b"] = fc_b
    return prepped


# ----------------------------------------------------------------------------
# Forward pass
# ----------------------------------------------------------------------------
def large_word_rnn_forward(x, lengths, params, hidden_size, num_classes):
    """x: (B, T, input_size) batch-first; lengths: (B,) int32.

    Assumes max(lengths) == T so the padded output length matches the input
    length (as pad_packed_sequence would produce for this batch).
    # TODO(synk): train-mode inter-layer dropout (p=0.2) not implemented.
    """
    B, T, Din0 = x.shape
    Hp = _round_up(hidden_size, _LANE)
    Cp = _round_up(num_classes, _LANE)
    Bp = _round_up(B, _SUBLANE)
    Tc = min(T, 64)
    Tp = _round_up(T, Tc)

    prepped = prepare_params(params, Din0, hidden_size, num_classes, Hp, Cp)

    x_tbd = jnp.transpose(x.astype(jnp.float32), (1, 0, 2))            # (T, B, Din0)
    x_tbd = jnp.pad(x_tbd, ((0, Tp - T), (0, Bp - B), (0, 0)))         # (Tp, Bp, Din0)
    len_b1 = jnp.pad(lengths.astype(jnp.int32), (0, Bp - B))[:, None]  # (Bp, 1)

    layer_in = x_tbd
    for layer in range(NUM_LAYERS):
        p = prepped["lstm"][layer]
        layer_in = _run_bilstm_layer(layer_in, len_b1,
                                     p["w_ih"], p["w_hh"], p["b"], Hp, Tc)

    # FC head over all (time, batch) positions; padded rows/cols sliced off.
    N = Tp * Bp
    tile_n = min(512, _round_up(N, _SUBLANE))
    Np = _round_up(N, tile_n)
    tile_c = 128
    flat = layer_in.reshape(N, 2 * Hp)
    flat = jnp.pad(flat, ((0, Np - N), (0, 0)))
    logits = _run_fc(flat, prepped["fc_w"], prepped["fc_b"], tile_n, tile_c)
    logits = logits[:N].reshape(Tp, Bp, Cp)
    logits = jnp.transpose(logits, (1, 0, 2))[:B, :T, :num_classes]
    return logits


# ----------------------------------------------------------------------------
# Deterministic parameter init (PyTorch nn.LSTM / nn.Linear layout)
# ----------------------------------------------------------------------------
def init_params(key, input_size, hidden_size, num_classes):
    H = hidden_size
    bound = 1.0 / math.sqrt(H)
    params = {"lstm": []}

    def uniform(k, shape, b):
        return jax.random.uniform(k, shape, jnp.float32, -b, b)

    for layer in range(NUM_LAYERS):
        d_in = input_size if layer == 0 else 2 * H
        keys = jax.random.split(key, 9)
        key = keys[0]
        params["lstm"].append({
            "w_ih_f": uniform(keys[1], (4 * H, d_in), bound),
            "w_hh_f": uniform(keys[2], (4 * H, H), bound),
            "b_ih_f": uniform(keys[3], (4 * H,), bound),
            "b_hh_f": uniform(keys[4], (4 * H,), bound),
            "w_ih_b": uniform(keys[5], (4 * H, d_in), bound),
            "w_hh_b": uniform(keys[6], (4 * H, H), bound),
            "b_ih_b": uniform(keys[7], (4 * H,), bound),
            "b_hh_b": uniform(keys[8], (4 * H,), bound),
        })

    k1, k2 = jax.random.split(key)
    fc_bound = 1.0 / math.sqrt(2 * H)
    params["fc_w"] = uniform(k1, (num_classes, 2 * H), fc_bound)   # (C, 2H)
    params["fc_b"] = uniform(k2, (num_classes,), fc_bound)         # (C,)
    return params


# ----------------------------------------------------------------------------
if __name__ == "__main__":
    INPUT_SIZE = 16
    HIDDEN_SIZE = 32
    NUM_CLASSES = 10
    B, T = 2, 8

    key = jax.random.PRNGKey(0)
    k_x, k_p = jax.random.split(key)

    x = jax.random.normal(k_x, (B, T, INPUT_SIZE), jnp.float32)
    lengths = jnp.array([T, T - 3], dtype=jnp.int32)   # max(lengths) == T

    params = init_params(k_p, INPUT_SIZE, HIDDEN_SIZE, NUM_CLASSES)

    fwd = jax.jit(functools.partial(large_word_rnn_forward,
                                    hidden_size=HIDDEN_SIZE,
                                    num_classes=NUM_CLASSES))
    out = fwd(x, lengths, params)
    out = jax.block_until_ready(out)

    assert out.shape == (B, T, NUM_CLASSES), out.shape
    assert out.dtype == jnp.float32
    print("KERNEL_OK")
</pallas_src>

<mosaic_0001>
module attributes {stable_mosaic.version = 11 : i64} {
  func.func @_bilstm_layer_kernel(%arg0: i32, %arg1: i32, %arg2: memref<8x1xi32, #tpu.memory_space<vmem>>, %arg3: memref<8x8x16xf32, #tpu.memory_space<vmem>>, %arg4: memref<1x16x512xf32, #tpu.memory_space<vmem>>, %arg5: memref<1x128x512xf32, #tpu.memory_space<vmem>>, %arg6: memref<1x1x512xf32, #tpu.memory_space<vmem>>, %arg7: memref<8x8x128xf32, #tpu.memory_space<vmem>>, %arg8: memref<8x128xf32, #tpu.memory_space<vmem>>, %arg9: memref<8x128xf32, #tpu.memory_space<vmem>>, %arg10: memref<64x512xf32, #tpu.memory_space<vmem>>) attributes {dimension_semantics = [#tpu.dimension_semantics<parallel>, #tpu.dimension_semantics<arbitrary>], iteration_bounds = array<i64: 2, 1>, scalar_prefetch = 0 : i64, scratch_operands = 3 : i64, tpu.core_type = #tpu.core_type<tc>, window_params = [{pipeline_mode = #tpu.pipeline_mode<synchronous>, transform_indices = @transform_0, window_bounds = array<i64: 8, 1>}, {transform_indices = @transform_1, window_bounds = array<i64: 8, 8, 16>}, {transform_indices = @transform_2, window_bounds = array<i64: 1, 16, 512>}, {transform_indices = @transform_3, window_bounds = array<i64: 1, 128, 512>}, {transform_indices = @transform_4, window_bounds = array<i64: 1, 1, 512>}, {transform_indices = @transform_5, window_bounds = array<i64: 8, 8, 128>}]} {
    %c0_i32 = arith.constant 0 : i32
    %0 = arith.cmpi eq, %arg1, %c0_i32 : i32
    %1 = arith.extui %0 : i1 to i32
    %c0_i32_0 = arith.constant 0 : i32
    %2 = arith.cmpi ne, %1, %c0_i32_0 : i32
    scf.if %2 {
      %cst_171 = arith.constant 0.000000e+00 : f32
      %501 = vector.broadcast %cst_171 : f32 to vector<8x128xf32>
      %c0_172 = arith.constant 0 : index
      %c0_173 = arith.constant 0 : index
      %502 = vector.load %arg8[%c0_172, %c0_173] : memref<8x128xf32, #tpu.memory_space<vmem>>, vector<8x128xf32>
      tpu.vector_store %arg8[%c0_172, %c0_173], %501 {strides = array<i32>} : memref<8x128xf32, #tpu.memory_space<vmem>>, vector<8x128xf32>,
      %cst_174 = arith.constant 0.000000e+00 : f32
      %503 = vector.broadcast %cst_174 : f32 to vector<8x128xf32>
      %c0_175 = arith.constant 0 : index
      %c0_176 = arith.constant 0 : index
      %504 = vector.load %arg9[%c0_175, %c0_176] : memref<8x128xf32, #tpu.memory_space<vmem>>, vector<8x128xf32>
      tpu.vector_store %arg9[%c0_175, %c0_176], %503 {strides = array<i32>} : memref<8x128xf32, #tpu.memory_space<vmem>>, vector<8x128xf32>,
    } else {
    }
    %c0 = arith.constant 0 : index
    %c0_1 = arith.constant 0 : index
    %c0_2 = arith.constant 0 : index
    %3 = vector.load %arg3[%c0, %c0_1, %c0_2] : memref<8x8x16xf32, #tpu.memory_space<vmem>>, vector<8x8x16xf32>
    %4 = vector.shape_cast %3 : vector<8x8x16xf32> to vector<64x16xf32>
    %c0_3 = arith.constant 0 : index
    %c0_4 = arith.constant 0 : index
    %c0_5 = arith.constant 0 : index
    %5 = vector.load %arg4[%c0_3, %c0_4, %c0_5] : memref<1x16x512xf32, #tpu.memory_space<vmem>>, vector<1x16x512xf32>
    %6 = vector.shape_cast %5 : vector<1x16x512xf32> to vector<16x512xf32>
    %cst = arith.constant dense<0.000000e+00> : vector<64x512xf32>
    %7 = tpu.matmul %4, %6, %cst {dimension_numbers = #tpu.dot_dimension_numbers<[1], [0], [0], [1], [0, 0, 1, 1], [], []>} : vector<64x16xf32>, vector<16x512xf32>, vector<64x512xf32> -> vector<64x512xf32>
    %c0_6 = arith.constant 0 : index
    %c0_7 = arith.constant 0 : index
    %c0_8 = arith.constant 0 : index
    %8 = vector.load %arg6[%c0_6, %c0_7, %c0_8] : memref<1x1x512xf32, #tpu.memory_space<vmem>>, vector<1x1x512xf32>
    %9 = vector.shape_cast %8 : vector<1x1x512xf32> to vector<1x512xf32>
    %10 = vector.broadcast %9 : vector<1x512xf32> to vector<64x512xf32>
    %11 = arith.addf %7, %10 : vector<64x512xf32>
    %c0_9 = arith.constant 0 : index
    %c0_10 = arith.constant 0 : index
    %12 = vector.load %arg10[%c0_9, %c0_10] : memref<64x512xf32, #tpu.memory_space<vmem>>, vector<64x512xf32>
    tpu.vector_store %arg10[%c0_9, %c0_10], %11 {strides = array<i32>} : memref<64x512xf32, #tpu.memory_space<vmem>>, vector<64x512xf32>,
    %c0_11 = arith.constant 0 : index
    %c0_12 = arith.constant 0 : index
    %c0_13 = arith.constant 0 : index
    %13 = vector.load %arg5[%c0_11, %c0_12, %c0_13] : memref<1x128x512xf32, #tpu.memory_space<vmem>>, vector<1x128x512xf32>
    %14 = vector.shape_cast %13 : vector<1x128x512xf32> to vector<128x512xf32>
    %c0_14 = arith.constant 0 : index
    %c0_15 = arith.constant 0 : index
    %15 = vector.load %arg2[%c0_14, %c0_15] : memref<8x1xi32, #tpu.memory_space<vmem>>, vector<8x1xi32>
    %c1_i32 = arith.constant 1 : i32
    %16 = arith.subi %c1_i32, %arg0 : i32
    %17 = arith.muli %16, %arg1 : i32
    %c0_i32_16 = arith.constant 0 : i32
    %18 = arith.subi %c0_i32_16, %arg1 : i32
    %19 = arith.muli %arg0, %18 : i32
    %20 = arith.addi %17, %19 : i32
    %c0_i32_17 = arith.constant 0 : i32
    %c1_i32_18 = arith.constant 1 : i32
    %21 = arith.subi %c1_i32_18, %arg0 : i32
    %22 = arith.muli %21, %c0_i32_17 : i32
    %c7_i32 = arith.constant 7 : i32
    %23 = arith.subi %c7_i32, %c0_i32_17 : i32
    %24 = arith.muli %arg0, %23 : i32
    %25 = arith.addi %22, %24 : i32
    %c8_i32 = arith.constant 8 : i32
    %26 = arith.muli %20, %c8_i32 : i32
    %27 = arith.addi %26, %25 : i32
    %c0_19 = arith.constant 0 : index
    %c0_20 = arith.constant 0 : index
    %28 = vector.load %arg8[%c0_19, %c0_20] : memref<8x128xf32, #tpu.memory_space<vmem>>, vector<8x128xf32>
    %c0_21 = arith.constant 0 : index
    %c0_22 = arith.constant 0 : index
    %29 = vector.load %arg9[%c0_21, %c0_22] : memref<8x128xf32, #tpu.memory_space<vmem>>, vector<8x128xf32>
    %c8_i32_23 = arith.constant 8 : i32
    %30 = arith.muli %25, %c8_i32_23 : i32
    %31 = tpu.assume_multiple %30, 8 : i32
    %32 = arith.index_cast %31 : i32 to index
    %c0_24 = arith.constant 0 : index
    %33 = vector.load %arg10[%32, %c0_24] : memref<64x512xf32, #tpu.memory_space<vmem>>, vector<8x512xf32>
    %cst_25 = arith.constant dense<0.000000e+00> : vector<8x512xf32>
    %34 = tpu.matmul %28, %14, %cst_25 {dimension_numbers = #tpu.dot_dimension_numbers<[1], [0], [0], [1], [0, 0, 1, 1], [], []>} : vector<8x128xf32>, vector<128x512xf32>, vector<8x512xf32> -> vector<8x512xf32>
    %35 = arith.addf %33, %34 : vector<8x512xf32>
    %36 = vector.extract_strided_slice %35 {offsets = [0, 0], sizes = [8, 128], strides = [1, 1]} : vector<8x512xf32> to vector<8x128xf32>
    %37 = arith.negf %36 : vector<8x128xf32>
    %38 = math.exp %37 : vector<8x128xf32>
    %cst_26 = arith.constant 1.000000e+00 : f32
    %39 = vector.broadcast %cst_26 : f32 to vector<8x128xf32>
    %40 = arith.addf %39, %38 : vector<8x128xf32>
    %41 = arith.divf %39, %40 : vector<8x128xf32>
    %42 = vector.extract_strided_slice %35 {offsets = [0, 128], sizes = [8, 128], strides = [1, 1]} : vector<8x512xf32> to vector<8x128xf32>
    %43 = arith.negf %42 : vector<8x128xf32>
    %44 = math.exp %43 : vector<8x128xf32>
    %cst_27 = arith.constant 1.000000e+00 : f32
    %45 = vector.broadcast %cst_27 : f32 to vector<8x128xf32>
    %46 = arith.addf %45, %44 : vector<8x128xf32>
    %47 = arith.divf %45, %46 : vector<8x128xf32>
    %48 = vector.extract_strided_slice %35 {offsets = [0, 256], sizes = [8, 128], strides = [1, 1]} : vector<8x512xf32> to vector<8x128xf32>
    %49 = math.tanh %48 : vector<8x128xf32>
    %50 = vector.extract_strided_slice %35 {offsets = [0, 384], sizes = [8, 128], strides = [1, 1]} : vector<8x512xf32> to vector<8x128xf32>
    %51 = arith.negf %50 : vector<8x128xf32>
    %52 = math.exp %51 : vector<8x128xf32>
    %cst_28 = arith.constant 1.000000e+00 : f32
    %53 = vector.broadcast %cst_28 : f32 to vector<8x128xf32>
    %54 = arith.addf %53, %52 : vector<8x128xf32>
    %55 = arith.divf %53, %54 : vector<8x128xf32>
    %56 = arith.mulf %47, %29 : vector<8x128xf32>
    %57 = arith.mulf %41, %49 : vector<8x128xf32>
    %58 = arith.addf %56, %57 : vector<8x128xf32>
    %59 = math.tanh %58 : vector<8x128xf32>
    %60 = arith.mulf %55, %59 : vector<8x128xf32>
    %61 = vector.broadcast %27 : i32 to vector<8x1xi32>
    %62 = arith.cmpi slt, %61, %15 : vector<8x1xi32>
    %63 = arith.extui %62 : vector<8x1xi1> to vector<8x1xi32>
    %64 = arith.sitofp %63 : vector<8x1xi32> to vector<8x1xf32>
    %65 = arith.subf %58, %29 : vector<8x128xf32>
    %66 = vector.broadcast %64 : vector<8x1xf32> to vector<8x128xf32>
    %67 = arith.mulf %66, %65 : vector<8x128xf32>
    %68 = arith.addf %29, %67 : vector<8x128xf32>
    %c0_29 = arith.constant 0 : index
    %c0_30 = arith.constant 0 : index
    %69 = vector.load %arg9[%c0_29, %c0_30] : memref<8x128xf32, #tpu.memory_space<vmem>>, vector<8x128xf32>
    tpu.vector_store %arg9[%c0_29, %c0_30], %68 {strides = array<i32>} : memref<8x128xf32, #tpu.memory_space<vmem>>, vector<8x128xf32>,
    %70 = arith.subf %60, %28 : vector<8x128xf32>
    %71 = vector.broadcast %64 : vector<8x1xf32> to vector<8x128xf32>
    %72 = arith.mulf %71, %70 : vector<8x128xf32>
    %73 = arith.addf %28, %72 : vector<8x128xf32>
    %c0_31 = arith.constant 0 : index
    %c0_32 = arith.constant 0 : index
    %74 = vector.load %arg8[%c0_31, %c0_32] : memref<8x128xf32, #tpu.memory_space<vmem>>, vector<8x128xf32>
    tpu.vector_store %arg8[%c0_31, %c0_32], %73 {strides = array<i32>} : memref<8x128xf32, #tpu.memory_space<vmem>>, vector<8x128xf32>,
    %75 = vector.broadcast %64 : vector<8x1xf32> to vector<8x128xf32>
    %76 = arith.mulf %75, %60 : vector<8x128xf32>
    %77 = arith.index_cast %25 : i32 to index
    %c0_33 = arith.constant 0 : index
    %c0_34 = arith.constant 0 : index
    %78 = vector.load %arg7[%77, %c0_33, %c0_34] : memref<8x8x128xf32, #tpu.memory_space<vmem>>, vector<1x8x128xf32>
    %79 = vector.shape_cast %78 : vector<1x8x128xf32> to vector<8x128xf32>
    %80 = vector.shape_cast %76 : vector<8x128xf32> to vector<1x8x128xf32>
    tpu.vector_store %arg7[%77, %c0_33, %c0_34], %80 {strides = array<i32>} : memref<8x8x128xf32, #tpu.memory_space<vmem>>, vector<1x8x128xf32>,
    %c1_i32_35 = arith.constant 1 : i32
    %c1_i32_36 = arith.constant 1 : i32
    %81 = arith.subi %c1_i32_36, %arg0 : i32
    %82 = arith.muli %81, %c1_i32_35 : i32
    %c7_i32_37 = arith.constant 7 : i32
    %83 = arith.subi %c7_i32_37, %c1_i32_35 : i32
    %84 = arith.muli %arg0, %83 : i32
    %85 = arith.addi %82, %84 : i32
    %c8_i32_38 = arith.constant 8 : i32
    %86 = arith.muli %20, %c8_i32_38 : i32
    %87 = arith.addi %86, %85 : i32
    %c0_39 = arith.constant 0 : index
    %c0_40 = arith.constant 0 : index
    %88 = vector.load %arg8[%c0_39, %c0_40] : memref<8x128xf32, #tpu.memory_space<vmem>>, vector<8x128xf32>
    %c0_41 = arith.constant 0 : index
    %c0_42 = arith.constant 0 : index
    %89 = vector.load %arg9[%c0_41, %c0_42] : memref<8x128xf32, #tpu.memory_space<vmem>>, vector<8x128xf32>
    %c8_i32_43 = arith.constant 8 : i32
    %90 = arith.muli %85, %c8_i32_43 : i32
    %91 = tpu.assume_multiple %90, 8 : i32
    %92 = arith.index_cast %91 : i32 to index
    %c0_44 = arith.constant 0 : index
    %93 = vector.load %arg10[%92, %c0_44] : memref<64x512xf32, #tpu.memory_space<vmem>>, vector<8x512xf32>
    %cst_45 = arith.constant dense<0.000000e+00> : vector<8x512xf32>
    %94 = tpu.matmul %88, %14, %cst_45 {dimension_numbers = #tpu.dot_dimension_numbers<[1], [0], [0], [1], [0, 0, 1, 1], [], []>} : vector<8x128xf32>, vector<128x512xf32>, vector<8x512xf32> -> vector<8x512xf32>
    %95 = arith.addf %93, %94 : vector<8x512xf32>
    %96 = vector.extract_strided_slice %95 {offsets = [0, 0], sizes = [8, 128], strides = [1, 1]} : vector<8x512xf32> to vector<8x128xf32>
    %97 = arith.negf %96 : vector<8x128xf32>
    %98 = math.exp %97 : vector<8x128xf32>
    %cst_46 = arith.constant 1.000000e+00 : f32
    %99 = vector.broadcast %cst_46 : f32 to vector<8x128xf32>
    %100 = arith.addf %99, %98 : vector<8x128xf32>
    %101 = arith.divf %99, %100 : vector<8x128xf32>
    %102 = vector.extract_strided_slice %95 {offsets = [0, 128], sizes = [8, 128], strides = [1, 1]} : vector<8x512xf32> to vector<8x128xf32>
    %103 = arith.negf %102 : vector<8x128xf32>
    %104 = math.exp %103 : vector<8x128xf32>
    %cst_47 = arith.constant 1.000000e+00 : f32
    %105 = vector.broadcast %cst_47 : f32 to vector<8x128xf32>
    %106 = arith.addf %105, %104 : vector<8x128xf32>
    %107 = arith.divf %105, %106 : vector<8x128xf32>
    %108 = vector.extract_strided_slice %95 {offsets = [0, 256], sizes = [8, 128], strides = [1, 1]} : vector<8x512xf32> to vector<8x128xf32>
    %109 = math.tanh %108 : vector<8x128xf32>
    %110 = vector.extract_strided_slice %95 {offsets = [0, 384], sizes = [8, 128], strides = [1, 1]} : vector<8x512xf32> to vector<8x128xf32>
    %111 = arith.negf %110 : vector<8x128xf32>
    %112 = math.exp %111 : vector<8x128xf32>
    %cst_48 = arith.constant 1.000000e+00 : f32
    %113 = vector.broadcast %cst_48 : f32 to vector<8x128xf32>
    %114 = arith.addf %113, %112 : vector<8x128xf32>
    %115 = arith.divf %113, %114 : vector<8x128xf32>
    %116 = arith.mulf %107, %89 : vector<8x128xf32>
    %117 = arith.mulf %101, %109 : vector<8x128xf32>
    %118 = arith.addf %116, %117 : vector<8x128xf32>
    %119 = math.tanh %118 : vector<8x128xf32>
    %120 = arith.mulf %115, %119 : vector<8x128xf32>
    %121 = vector.broadcast %87 : i32 to vector<8x1xi32>
    %122 = arith.cmpi slt, %121, %15 : vector<8x1xi32>
    %123 = arith.extui %122 : vector<8x1xi1> to vector<8x1xi32>
    %124 = arith.sitofp %123 : vector<8x1xi32> to vector<8x1xf32>
    %125 = arith.subf %118, %89 : vector<8x128xf32>
    %126 = vector.broadcast %124 : vector<8x1xf32> to vector<8x128xf32>
    %127 = arith.mulf %126, %125 : vector<8x128xf32>
    %128 = arith.addf %89, %127 : vector<8x128xf32>
    %c0_49 = arith.constant 0 : index
    %c0_50 = arith.constant 0 : index
    %129 = vector.load %arg9[%c0_49, %c0_50] : memref<8x128xf32, #tpu.memory_space<vmem>>, vector<8x128xf32>
    tpu.vector_store %arg9[%c0_49, %c0_50], %128 {strides = array<i32>} : memref<8x128xf32, #tpu.memory_space<vmem>>, vector<8x128xf32>,
    %130 = arith.subf %120, %88 : vector<8x128xf32>
    %131 = vector.broadcast %124 : vector<8x1xf32> to vector<8x128xf32>
    %132 = arith.mulf %131, %130 : vector<8x128xf32>
    %133 = arith.addf %88, %132 : vector<8x128xf32>
    %c0_51 = arith.constant 0 : index
    %c0_52 = arith.constant 0 : index
    %134 = vector.load %arg8[%c0_51, %c0_52] : memref<8x128xf32, #tpu.memory_space<vmem>>, vector<8x128xf32>
    tpu.vector_store %arg8[%c0_51, %c0_52], %133 {strides = array<i32>} : memref<8x128xf32, #tpu.memory_space<vmem>>, vector<8x128xf32>,
    %135 = vector.broadcast %124 : vector<8x1xf32> to vector<8x128xf32>
    %136 = arith.mulf %135, %120 : vector<8x128xf32>
    %137 = arith.index_cast %85 : i32 to index
    %c0_53 = arith.constant 0 : index
    %c0_54 = arith.constant 0 : index
    %138 = vector.load %arg7[%137, %c0_53, %c0_54] : memref<8x8x128xf32, #tpu.memory_space<vmem>>, vector<1x8x128xf32>
    %139 = vector.shape_cast %138 : vector<1x8x128xf32> to vector<8x128xf32>
    %140 = vector.shape_cast %136 : vector<8x128xf32> to vector<1x8x128xf32>
    tpu.vector_store %arg7[%137, %c0_53, %c0_54], %140 {strides = array<i32>} : memref<8x8x128xf32, #tpu.memory_space<vmem>>, vector<1x8x128xf32>,
    %c2_i32 = arith.constant 2 : i32
    %c1_i32_55 = arith.constant 1 : i32
    %141 = arith.subi %c1_i32_55, %arg0 : i32
    %142 = arith.muli %141, %c2_i32 : i32
    %c7_i32_56 = arith.constant 7 : i32
    %143 = arith.subi %c7_i32_56, %c2_i32 : i32
    %144 = arith.muli %arg0, %143 : i32
    %145 = arith.addi %142, %144 : i32
    %c8_i32_57 = arith.constant 8 : i32
    %146 = arith.muli %20, %c8_i32_57 : i32
    %147 = arith.addi %146, %145 : i32
    %c0_58 = arith.constant 0 : index
    %c0_59 = arith.constant 0 : index
    %148 = vector.load %arg8[%c0_58, %c0_59] : memref<8x128xf32, #tpu.memory_space<vmem>>, vector<8x128xf32>
    %c0_60 = arith.constant 0 : index
    %c0_61 = arith.constant 0 : index
    %149 = vector.load %arg9[%c0_60, %c0_61] : memref<8x128xf32, #tpu.memory_space<vmem>>, vector<8x128xf32>
    %c8_i32_62 = arith.constant 8 : i32
    %150 = arith.muli %145, %c8_i32_62 : i32
    %151 = tpu.assume_multiple %150, 8 : i32
    %152 = arith.index_cast %151 : i32 to index
    %c0_63 = arith.constant 0 : index
    %153 = vector.load %arg10[%152, %c0_63] : memref<64x512xf32, #tpu.memory_space<vmem>>, vector<8x512xf32>
    %cst_64 = arith.constant dense<0.000000e+00> : vector<8x512xf32>
    %154 = tpu.matmul %148, %14, %cst_64 {dimension_numbers = #tpu.dot_dimension_numbers<[1], [0], [0], [1], [0, 0, 1, 1], [], []>} : vector<8x128xf32>, vector<128x512xf32>, vector<8x512xf32> -> vector<8x512xf32>
    %155 = arith.addf %153, %154 : vector<8x512xf32>
    %156 = vector.extract_strided_slice %155 {offsets = [0, 0], sizes = [8, 128], strides = [1, 1]} : vector<8x512xf32> to vector<8x128xf32>
    %157 = arith.negf %156 : vector<8x128xf32>
    %158 = math.exp %157 : vector<8x128xf32>
    %cst_65 = arith.constant 1.000000e+00 : f32
    %159 = vector.broadcast %cst_65 : f32 to vector<8x128xf32>
    %160 = arith.addf %159, %158 : vector<8x128xf32>
    %161 = arith.divf %159, %160 : vector<8x128xf32>
    %162 = vector.extract_strided_slice %155 {offsets = [0, 128], sizes = [8, 128], strides = [1, 1]} : vector<8x512xf32> to vector<8x128xf32>
    %163 = arith.negf %162 : vector<8x128xf32>
    %164 = math.exp %163 : vector<8x128xf32>
    %cst_66 = arith.constant 1.000000e+00 : f32
    %165 = vector.broadcast %cst_66 : f32 to vector<8x128xf32>
    %166 = arith.addf %165, %164 : vector<8x128xf32>
    %167 = arith.divf %165, %166 : vector<8x128xf32>
    %168 = vector.extract_strided_slice %155 {offsets = [0, 256], sizes = [8, 128], strides = [1, 1]} : vector<8x512xf32> to vector<8x128xf32>
    %169 = math.tanh %168 : vector<8x128xf32>
    %170 = vector.extract_strided_slice %155 {offsets = [0, 384], sizes = [8, 128], strides = [1, 1]} : vector<8x512xf32> to vector<8x128xf32>
    %171 = arith.negf %170 : vector<8x128xf32>
    %172 = math.exp %171 : vector<8x128xf32>
    %cst_67 = arith.constant 1.000000e+00 : f32
    %173 = vector.broadcast %cst_67 : f32 to vector<8x128xf32>
    %174 = arith.addf %173, %172 : vector<8x128xf32>
    %175 = arith.divf %173, %174 : vector<8x128xf32>
    %176 = arith.mulf %167, %149 : vector<8x128xf32>
    %177 = arith.mulf %161, %169 : vector<8x128xf32>
    %178 = arith.addf %176, %177 : vector<8x128xf32>
    %179 = math.tanh %178 : vector<8x128xf32>
    %180 = arith.mulf %175, %179 : vector<8x128xf32>
    %181 = vector.broadcast %147 : i32 to vector<8x1xi32>
    %182 = arith.cmpi slt, %181, %15 : vector<8x1xi32>
    %183 = arith.extui %182 : vector<8x1xi1> to vector<8x1xi32>
    %184 = arith.sitofp %183 : vector<8x1xi32> to vector<8x1xf32>
    %185 = arith.subf %178, %149 : vector<8x128xf32>
    %186 = vector.broadcast %184 : vector<8x1xf32> to vector<8x128xf32>
    %187 = arith.mulf %186, %185 : vector<8x128xf32>
    %188 = arith.addf %149, %187 : vector<8x128xf32>
    %c0_68 = arith.constant 0 : index
    %c0_69 = arith.constant 0 : index
    %189 = vector.load %arg9[%c0_68, %c0_69] : memref<8x128xf32, #tpu.memory_space<vmem>>, vector<8x128xf32>
    tpu.vector_store %arg9[%c0_68, %c0_69], %188 {strides = array<i32>} : memref<8x128xf32, #tpu.memory_space<vmem>>, vector<8x128xf32>,
    %190 = arith.subf %180, %148 : vector<8x128xf32>
    %191 = vector.broadcast %184 : vector<8x1xf32> to vector<8x128xf32>
    %192 = arith.mulf %191, %190 : vector<8x128xf32>
    %193 = arith.addf %148, %192 : vector<8x128xf32>
    %c0_70 = arith.constant 0 : index
    %c0_71 = arith.constant 0 : index
    %194 = vector.load %arg8[%c0_70, %c0_71] : memref<8x128xf32, #tpu.memory_space<vmem>>, vector<8x128xf32>
    tpu.vector_store %arg8[%c0_70, %c0_71], %193 {strides = array<i32>} : memref<8x128xf32, #tpu.memory_space<vmem>>, vector<8x128xf32>,
    %195 = vector.broadcast %184 : vector<8x1xf32> to vector<8x128xf32>
    %196 = arith.mulf %195, %180 : vector<8x128xf32>
    %197 = arith.index_cast %145 : i32 to index
    %c0_72 = arith.constant 0 : index
    %c0_73 = arith.constant 0 : index
    %198 = vector.load %arg7[%197, %c0_72, %c0_73] : memref<8x8x128xf32, #tpu.memory_space<vmem>>, vector<1x8x128xf32>
    %199 = vector.shape_cast %198 : vector<1x8x128xf32> to vector<8x128xf32>
    %200 = vector.shape_cast %196 : vector<8x128xf32> to vector<1x8x128xf32>
    tpu.vector_store %arg7[%197, %c0_72, %c0_73], %200 {strides = array<i32>} : memref<8x8x128xf32, #tpu.memory_space<vmem>>, vector<1x8x128xf32>,
    %c3_i32 = arith.constant 3 : i32
    %c1_i32_74 = arith.constant 1 : i32
    %201 = arith.subi %c1_i32_74, %arg0 : i32
    %202 = arith.muli %201, %c3_i32 : i32
    %c7_i32_75 = arith.constant 7 : i32
    %203 = arith.subi %c7_i32_75, %c3_i32 : i32
    %204 = arith.muli %arg0, %203 : i32
    %205 = arith.addi %202, %204 : i32
    %c8_i32_76 = arith.constant 8 : i32
    %206 = arith.muli %20, %c8_i32_76 : i32
    %207 = arith.addi %206, %205 : i32
    %c0_77 = arith.constant 0 : index
    %c0_78 = arith.constant 0 : index
    %208 = vector.load %arg8[%c0_77, %c0_78] : memref<8x128xf32, #tpu.memory_space<vmem>>, vector<8x128xf32>
    %c0_79 = arith.constant 0 : index
    %c0_80 = arith.constant 0 : index
    %209 = vector.load %arg9[%c0_79, %c0_80] : memref<8x128xf32, #tpu.memory_space<vmem>>, vector<8x128xf32>
    %c8_i32_81 = arith.constant 8 : i32
    %210 = arith.muli %205, %c8_i32_81 : i32
    %211 = tpu.assume_multiple %210, 8 : i32
    %212 = arith.index_cast %211 : i32 to index
    %c0_82 = arith.constant 0 : index
    %213 = vector.load %arg10[%212, %c0_82] : memref<64x512xf32, #tpu.memory_space<vmem>>, vector<8x512xf32>
    %cst_83 = arith.constant dense<0.000000e+00> : vector<8x512xf32>
    %214 = tpu.matmul %208, %14, %cst_83 {dimension_numbers = #tpu.dot_dimension_numbers<[1], [0], [0], [1], [0, 0, 1, 1], [], []>} : vector<8x128xf32>, vector<128x512xf32>, vector<8x512xf32> -> vector<8x512xf32>
    %215 = arith.addf %213, %214 : vector<8x512xf32>
    %216 = vector.extract_strided_slice %215 {offsets = [0, 0], sizes = [8, 128], strides = [1, 1]} : vector<8x512xf32> to vector<8x128xf32>
    %217 = arith.negf %216 : vector<8x128xf32>
    %218 = math.exp %217 : vector<8x128xf32>
    %cst_84 = arith.constant 1.000000e+00 : f32
    %219 = vector.broadcast %cst_84 : f32 to vector<8x128xf32>
    %220 = arith.addf %219, %218 : vector<8x128xf32>
    %221 = arith.divf %219, %220 : vector<8x128xf32>
    %222 = vector.extract_strided_slice %215 {offsets = [0, 128], sizes = [8, 128], strides = [1, 1]} : vector<8x512xf32> to vector<8x128xf32>
    %223 = arith.negf %222 : vector<8x128xf32>
    %224 = math.exp %223 : vector<8x128xf32>
    %cst_85 = arith.constant 1.000000e+00 : f32
    %225 = vector.broadcast %cst_85 : f32 to vector<8x128xf32>
    %226 = arith.addf %225, %224 : vector<8x128xf32>
    %227 = arith.divf %225, %226 : vector<8x128xf32>
    %228 = vector.extract_strided_slice %215 {offsets = [0, 256], sizes = [8, 128], strides = [1, 1]} : vector<8x512xf32> to vector<8x128xf32>
    %229 = math.tanh %228 : vector<8x128xf32>
    %230 = vector.extract_strided_slice %215 {offsets = [0, 384], sizes = [8, 128], strides = [1, 1]} : vector<8x512xf32> to vector<8x128xf32>
    %231 = arith.negf %230 : vector<8x128xf32>
    %232 = math.exp %231 : vector<8x128xf32>
    %cst_86 = arith.constant 1.000000e+00 : f32
    %233 = vector.broadcast %cst_86 : f32 to vector<8x128xf32>
    %234 = arith.addf %233, %232 : vector<8x128xf32>
    %235 = arith.divf %233, %234 : vector<8x128xf32>
    %236 = arith.mulf %227, %209 : vector<8x128xf32>
    %237 = arith.mulf %221, %229 : vector<8x128xf32>
    %238 = arith.addf %236, %237 : vector<8x128xf32>
    %239 = math.tanh %238 : vector<8x128xf32>
    %240 = arith.mulf %235, %239 : vector<8x128xf32>
    %241 = vector.broadcast %207 : i32 to vector<8x1xi32>
    %242 = arith.cmpi slt, %241, %15 : vector<8x1xi32>
    %243 = arith.extui %242 : vector<8x1xi1> to vector<8x1xi32>
    %244 = arith.sitofp %243 : vector<8x1xi32> to vector<8x1xf32>
    %245 = arith.subf %238, %209 : vector<8x128xf32>
    %246 = vector.broadcast %244 : vector<8x1xf32> to vector<8x128xf32>
    %247 = arith.mulf %246, %245 : vector<8x128xf32>
    %248 = arith.addf %209, %247 : vector<8x128xf32>
    %c0_87 = arith.constant 0 : index
    %c0_88 = arith.constant 0 : index
    %249 = vector.load %arg9[%c0_87, %c0_88] : memref<8x128xf32, #tpu.memory_space<vmem>>, vector<8x128xf32>
    tpu.vector_store %arg9[%c0_87, %c0_88], %248 {strides = array<i32>} : memref<8x128xf32, #tpu.memory_space<vmem>>, vector<8x128xf32>,
    %250 = arith.subf %240, %208 : vector<8x128xf32>
    %251 = vector.broadcast %244 : vector<8x1xf32> to vector<8x128xf32>
    %252 = arith.mulf %251, %250 : vector<8x128xf32>
    %253 = arith.addf %208, %252 : vector<8x128xf32>
    %c0_89 = arith.constant 0 : index
    %c0_90 = arith.constant 0 : index
    %254 = vector.load %arg8[%c0_89, %c0_90] : memref<8x128xf32, #tpu.memory_space<vmem>>, vector<8x128xf32>
    tpu.vector_store %arg8[%c0_89, %c0_90], %253 {strides = array<i32>} : memref<8x128xf32, #tpu.memory_space<vmem>>, vector<8x128xf32>,
    %255 = vector.broadcast %244 : vector<8x1xf32> to vector<8x128xf32>
    %256 = arith.mulf %255, %240 : vector<8x128xf32>
    %257 = arith.index_cast %205 : i32 to index
    %c0_91 = arith.constant 0 : index
    %c0_92 = arith.constant 0 : index
    %258 = vector.load %arg7[%257, %c0_91, %c0_92] : memref<8x8x128xf32, #tpu.memory_space<vmem>>, vector<1x8x128xf32>
    %259 = vector.shape_cast %258 : vector<1x8x128xf32> to vector<8x128xf32>
    %260 = vector.shape_cast %256 : vector<8x128xf32> to vector<1x8x128xf32>
    tpu.vector_store %arg7[%257, %c0_91, %c0_92], %260 {strides = array<i32>} : memref<8x8x128xf32, #tpu.memory_space<vmem>>, vector<1x8x128xf32>,
    %c4_i32 = arith.constant 4 : i32
    %c1_i32_93 = arith.constant 1 : i32
    %261 = arith.subi %c1_i32_93, %arg0 : i32
    %262 = arith.muli %261, %c4_i32 : i32
    %c7_i32_94 = arith.constant 7 : i32
    %263 = arith.subi %c7_i32_94, %c4_i32 : i32
    %264 = arith.muli %arg0, %263 : i32
    %265 = arith.addi %262, %264 : i32
    %c8_i32_95 = arith.constant 8 : i32
    %266 = arith.muli %20, %c8_i32_95 : i32
    %267 = arith.addi %266, %265 : i32
    %c0_96 = arith.constant 0 : index
    %c0_97 = arith.constant 0 : index
    %268 = vector.load %arg8[%c0_96, %c0_97] : memref<8x128xf32, #tpu.memory_space<vmem>>, vector<8x128xf32>
    %c0_98 = arith.constant 0 : index
    %c0_99 = arith.constant 0 : index
    %269 = vector.load %arg9[%c0_98, %c0_99] : memref<8x128xf32, #tpu.memory_space<vmem>>, vector<8x128xf32>
    %c8_i32_100 = arith.constant 8 : i32
    %270 = arith.muli %265, %c8_i32_100 : i32
    %271 = tpu.assume_multiple %270, 8 : i32
    %272 = arith.index_cast %271 : i32 to index
    %c0_101 = arith.constant 0 : index
    %273 = vector.load %arg10[%272, %c0_101] : memref<64x512xf32, #tpu.memory_space<vmem>>, vector<8x512xf32>
    %cst_102 = arith.constant dense<0.000000e+00> : vector<8x512xf32>
    %274 = tpu.matmul %268, %14, %cst_102 {dimension_numbers = #tpu.dot_dimension_numbers<[1], [0], [0], [1], [0, 0, 1, 1], [], []>} : vector<8x128xf32>, vector<128x512xf32>, vector<8x512xf32> -> vector<8x512xf32>
    %275 = arith.addf %273, %274 : vector<8x512xf32>
    %276 = vector.extract_strided_slice %275 {offsets = [0, 0], sizes = [8, 128], strides = [1, 1]} : vector<8x512xf32> to vector<8x128xf32>
    %277 = arith.negf %276 : vector<8x128xf32>
    %278 = math.exp %277 : vector<8x128xf32>
    %cst_103 = arith.constant 1.000000e+00 : f32
    %279 = vector.broadcast %cst_103 : f32 to vector<8x128xf32>
    %280 = arith.addf %279, %278 : vector<8x128xf32>
    %281 = arith.divf %279, %280 : vector<8x128xf32>
    %282 = vector.extract_strided_slice %275 {offsets = [0, 128], sizes = [8, 128], strides = [1, 1]} : vector<8x512xf32> to vector<8x128xf32>
    %283 = arith.negf %282 : vector<8x128xf32>
    %284 = math.exp %283 : vector<8x128xf32>
    %cst_104 = arith.constant 1.000000e+00 : f32
    %285 = vector.broadcast %cst_104 : f32 to vector<8x128xf32>
    %286 = arith.addf %285, %284 : vector<8x128xf32>
    %287 = arith.divf %285, %286 : vector<8x128xf32>
    %288 = vector.extract_strided_slice %275 {offsets = [0, 256], sizes = [8, 128], strides = [1, 1]} : vector<8x512xf32> to vector<8x128xf32>
    %289 = math.tanh %288 : vector<8x128xf32>
    %290 = vector.extract_strided_slice %275 {offsets = [0, 384], sizes = [8, 128], strides = [1, 1]} : vector<8x512xf32> to vector<8x128xf32>
    %291 = arith.negf %290 : vector<8x128xf32>
    %292 = math.exp %291 : vector<8x128xf32>
    %cst_105 = arith.constant 1.000000e+00 : f32
    %293 = vector.broadcast %cst_105 : f32 to vector<8x128xf32>
    %294 = arith.addf %293, %292 : vector<8x128xf32>
    %295 = arith.divf %293, %294 : vector<8x128xf32>
    %296 = arith.mulf %287, %269 : vector<8x128xf32>
    %297 = arith.mulf %281, %289 : vector<8x128xf32>
    %298 = arith.addf %296, %297 : vector<8x128xf32>
    %299 = math.tanh %298 : vector<8x128xf32>
    %300 = arith.mulf %295, %299 : vector<8x128xf32>
    %301 = vector.broadcast %267 : i32 to vector<8x1xi32>
    %302 = arith.cmpi slt, %301, %15 : vector<8x1xi32>
    %303 = arith.extui %302 : vector<8x1xi1> to vector<8x1xi32>
    %304 = arith.sitofp %303 : vector<8x1xi32> to vector<8x1xf32>
    %305 = arith.subf %298, %269 : vector<8x128xf32>
    %306 = vector.broadcast %304 : vector<8x1xf32> to vector<8x128xf32>
    %307 = arith.mulf %306, %305 : vector<8x128xf32>
    %308 = arith.addf %269, %307 : vector<8x128xf32>
    %c0_106 = arith.constant 0 : index
    %c0_107 = arith.constant 0 : index
    %309 = vector.load %arg9[%c0_106, %c0_107] : memref<8x128xf32, #tpu.memory_space<vmem>>, vector<8x128xf32>
    tpu.vector_store %arg9[%c0_106, %c0_107], %308 {strides = array<i32>} : memref<8x128xf32, #tpu.memory_space<vmem>>, vector<8x128xf32>,
    %310 = arith.subf %300, %268 : vector<8x128xf32>
    %311 = vector.broadcast %304 : vector<8x1xf32> to vector<8x128xf32>
    %312 = arith.mulf %311, %310 : vector<8x128xf32>
    %313 = arith.addf %268, %312 : vector<8x128xf32>
    %c0_108 = arith.constant 0 : index
    %c0_109 = arith.constant 0 : index
    %314 = vector.load %arg8[%c0_108, %c0_109] : memref<8x128xf32, #tpu.memory_space<vmem>>, vector<8x128xf32>
    tpu.vector_store %arg8[%c0_108, %c0_109], %313 {strides = array<i32>} : memref<8x128xf32, #tpu.memory_space<vmem>>, vector<8x128xf32>,
    %315 = vector.broadcast %304 : vector<8x1xf32> to vector<8x128xf32>
    %316 = arith.mulf %315, %300 : vector<8x128xf32>
    %317 = arith.index_cast %265 : i32 to index
    %c0_110 = arith.constant 0 : index
    %c0_111 = arith.constant 0 : index
    %318 = vector.load %arg7[%317, %c0_110, %c0_111] : memref<8x8x128xf32, #tpu.memory_space<vmem>>, vector<1x8x128xf32>
    %319 = vector.shape_cast %318 : vector<1x8x128xf32> to vector<8x128xf32>
    %320 = vector.shape_cast %316 : vector<8x128xf32> to vector<1x8x128xf32>
    tpu.vector_store %arg7[%317, %c0_110, %c0_111], %320 {strides = array<i32>} : memref<8x8x128xf32, #tpu.memory_space<vmem>>, vector<1x8x128xf32>,
    %c5_i32 = arith.constant 5 : i32
    %c1_i32_112 = arith.constant 1 : i32
    %321 = arith.subi %c1_i32_112, %arg0 : i32
    %322 = arith.muli %321, %c5_i32 : i32
    %c7_i32_113 = arith.constant 7 : i32
    %323 = arith.subi %c7_i32_113, %c5_i32 : i32
    %324 = arith.muli %arg0, %323 : i32
    %325 = arith.addi %322, %324 : i32
    %c8_i32_114 = arith.constant 8 : i32
    %326 = arith.muli %20, %c8_i32_114 : i32
    %327 = arith.addi %326, %325 : i32
    %c0_115 = arith.constant 0 : index
    %c0_116 = arith.constant 0 : index
    %328 = vector.load %arg8[%c0_115, %c0_116] : memref<8x128xf32, #tpu.memory_space<vmem>>, vector<8x128xf32>
    %c0_117 = arith.constant 0 : index
    %c0_118 = arith.constant 0 : index
    %329 = vector.load %arg9[%c0_117, %c0_118] : memref<8x128xf32, #tpu.memory_space<vmem>>, vector<8x128xf32>
    %c8_i32_119 = arith.constant 8 : i32
    %330 = arith.muli %325, %c8_i32_119 : i32
    %331 = tpu.assume_multiple %330, 8 : i32
    %332 = arith.index_cast %331 : i32 to index
    %c0_120 = arith.constant 0 : index
    %333 = vector.load %arg10[%332, %c0_120] : memref<64x512xf32, #tpu.memory_space<vmem>>, vector<8x512xf32>
    %cst_121 = arith.constant dense<0.000000e+00> : vector<8x512xf32>
    %334 = tpu.matmul %328, %14, %cst_121 {dimension_numbers = #tpu.dot_dimension_numbers<[1], [0], [0], [1], [0, 0, 1, 1], [], []>} : vector<8x128xf32>, vector<128x512xf32>, vector<8x512xf32> -> vector<8x512xf32>
    %335 = arith.addf %333, %334 : vector<8x512xf32>
    %336 = vector.extract_strided_slice %335 {offsets = [0, 0], sizes = [8, 128], strides = [1, 1]} : vector<8x512xf32> to vector<8x128xf32>
    %337 = arith.negf %336 : vector<8x128xf32>
    %338 = math.exp %337 : vector<8x128xf32>
    %cst_122 = arith.constant 1.000000e+00 : f32
    %339 = vector.broadcast %cst_122 : f32 to vector<8x128xf32>
    %340 = arith.addf %339, %338 : vector<8x128xf32>
    %341 = arith.divf %339, %340 : vector<8x128xf32>
    %342 = vector.extract_strided_slice %335 {offsets = [0, 128], sizes = [8, 128], strides = [1, 1]} : vector<8x512xf32> to vector<8x128xf32>
    %343 = arith.negf %342 : vector<8x128xf32>
    %344 = math.exp %343 : vector<8x128xf32>
    %cst_123 = arith.constant 1.000000e+00 : f32
    %345 = vector.broadcast %cst_123 : f32 to vector<8x128xf32>
    %346 = arith.addf %345, %344 : vector<8x128xf32>
    %347 = arith.divf %345, %346 : vector<8x128xf32>
    %348 = vector.extract_strided_slice %335 {offsets = [0, 256], sizes = [8, 128], strides = [1, 1]} : vector<8x512xf32> to vector<8x128xf32>
    %349 = math.tanh %348 : vector<8x128xf32>
    %350 = vector.extract_strided_slice %335 {offsets = [0, 384], sizes = [8, 128], strides = [1, 1]} : vector<8x512xf32> to vector<8x128xf32>
    %351 = arith.negf %350 : vector<8x128xf32>
    %352 = math.exp %351 : vector<8x128xf32>
    %cst_124 = arith.constant 1.000000e+00 : f32
    %353 = vector.broadcast %cst_124 : f32 to vector<8x128xf32>
    %354 = arith.addf %353, %352 : vector<8x128xf32>
    %355 = arith.divf %353, %354 : vector<8x128xf32>
    %356 = arith.mulf %347, %329 : vector<8x128xf32>
    %357 = arith.mulf %341, %349 : vector<8x128xf32>
    %358 = arith.addf %356, %357 : vector<8x128xf32>
    %359 = math.tanh %358 : vector<8x128xf32>
    %360 = arith.mulf %355, %359 : vector<8x128xf32>
    %361 = vector.broadcast %327 : i32 to vector<8x1xi32>
    %362 = arith.cmpi slt, %361, %15 : vector<8x1xi32>
    %363 = arith.extui %362 : vector<8x1xi1> to vector<8x1xi32>
    %364 = arith.sitofp %363 : vector<8x1xi32> to vector<8x1xf32>
    %365 = arith.subf %358, %329 : vector<8x128xf32>
    %366 = vector.broadcast %364 : vector<8x1xf32> to vector<8x128xf32>
    %367 = arith.mulf %366, %365 : vector<8x128xf32>
    %368 = arith.addf %329, %367 : vector<8x128xf32>
    %c0_125 = arith.constant 0 : index
    %c0_126 = arith.constant 0 : index
    %369 = vector.load %arg9[%c0_125, %c0_126] : memref<8x128xf32, #tpu.memory_space<vmem>>, vector<8x128xf32>
    tpu.vector_store %arg9[%c0_125, %c0_126], %368 {strides = array<i32>} : memref<8x128xf32, #tpu.memory_space<vmem>>, vector<8x128xf32>,
    %370 = arith.subf %360, %328 : vector<8x128xf32>
    %371 = vector.broadcast %364 : vector<8x1xf32> to vector<8x128xf32>
    %372 = arith.mulf %371, %370 : vector<8x128xf32>
    %373 = arith.addf %328, %372 : vector<8x128xf32>
    %c0_127 = arith.constant 0 : index
    %c0_128 = arith.constant 0 : index
    %374 = vector.load %arg8[%c0_127, %c0_128] : memref<8x128xf32, #tpu.memory_space<vmem>>, vector<8x128xf32>
    tpu.vector_store %arg8[%c0_127, %c0_128], %373 {strides = array<i32>} : memref<8x128xf32, #tpu.memory_space<vmem>>, vector<8x128xf32>,
    %375 = vector.broadcast %364 : vector<8x1xf32> to vector<8x128xf32>
    %376 = arith.mulf %375, %360 : vector<8x128xf32>
    %377 = arith.index_cast %325 : i32 to index
    %c0_129 = arith.constant 0 : index
    %c0_130 = arith.constant 0 : index
    %378 = vector.load %arg7[%377, %c0_129, %c0_130] : memref<8x8x128xf32, #tpu.memory_space<vmem>>, vector<1x8x128xf32>
    %379 = vector.shape_cast %378 : vector<1x8x128xf32> to vector<8x128xf32>
    %380 = vector.shape_cast %376 : vector<8x128xf32> to vector<1x8x128xf32>
    tpu.vector_store %arg7[%377, %c0_129, %c0_130], %380 {strides = array<i32>} : memref<8x8x128xf32, #tpu.memory_space<vmem>>, vector<1x8x128xf32>,
    %c6_i32 = arith.constant 6 : i32
    %c1_i32_131 = arith.constant 1 : i32
    %381 = arith.subi %c1_i32_131, %arg0 : i32
    %382 = arith.muli %381, %c6_i32 : i32
    %c7_i32_132 = arith.constant 7 : i32
    %383 = arith.subi %c7_i32_132, %c6_i32 : i32
    %384 = arith.muli %arg0, %383 : i32
    %385 = arith.addi %382, %384 : i32
    %c8_i32_133 = arith.constant 8 : i32
    %386 = arith.muli %20, %c8_i32_133 : i32
    %387 = arith.addi %386, %385 : i32
    %c0_134 = arith.constant 0 : index
    %c0_135 = arith.constant 0 : index
    %388 = vector.load %arg8[%c0_134, %c0_135] : memref<8x128xf32, #tpu.memory_space<vmem>>, vector<8x128xf32>
    %c0_136 = arith.constant 0 : index
    %c0_137 = arith.constant 0 : index
    %389 = vector.load %arg9[%c0_136, %c0_137] : memref<8x128xf32, #tpu.memory_space<vmem>>, vector<8x128xf32>
    %c8_i32_138 = arith.constant 8 : i32
    %390 = arith.muli %385, %c8_i32_138 : i32
    %391 = tpu.assume_multiple %390, 8 : i32
    %392 = arith.index_cast %391 : i32 to index
    %c0_139 = arith.constant 0 : index
    %393 = vector.load %arg10[%392, %c0_139] : memref<64x512xf32, #tpu.memory_space<vmem>>, vector<8x512xf32>
    %cst_140 = arith.constant dense<0.000000e+00> : vector<8x512xf32>
    %394 = tpu.matmul %388, %14, %cst_140 {dimension_numbers = #tpu.dot_dimension_numbers<[1], [0], [0], [1], [0, 0, 1, 1], [], []>} : vector<8x128xf32>, vector<128x512xf32>, vector<8x512xf32> -> vector<8x512xf32>
    %395 = arith.addf %393, %394 : vector<8x512xf32>
    %396 = vector.extract_strided_slice %395 {offsets = [0, 0], sizes = [8, 128], strides = [1, 1]} : vector<8x512xf32> to vector<8x128xf32>
    %397 = arith.negf %396 : vector<8x128xf32>
    %398 = math.exp %397 : vector<8x128xf32>
    %cst_141 = arith.constant 1.000000e+00 : f32
    %399 = vector.broadcast %cst_141 : f32 to vector<8x128xf32>
    %400 = arith.addf %399, %398 : vector<8x128xf32>
    %401 = arith.divf %399, %400 : vector<8x128xf32>
    %402 = vector.extract_strided_slice %395 {offsets = [0, 128], sizes = [8, 128], strides = [1, 1]} : vector<8x512xf32> to vector<8x128xf32>
    %403 = arith.negf %402 : vector<8x128xf32>
    %404 = math.exp %403 : vector<8x128xf32>
    %cst_142 = arith.constant 1.000000e+00 : f32
    %405 = vector.broadcast %cst_142 : f32 to vector<8x128xf32>
    %406 = arith.addf %405, %404 : vector<8x128xf32>
    %407 = arith.divf %405, %406 : vector<8x128xf32>
    %408 = vector.extract_strided_slice %395 {offsets = [0, 256], sizes = [8, 128], strides = [1, 1]} : vector<8x512xf32> to vector<8x128xf32>
    %409 = math.tanh %408 : vector<8x128xf32>
    %410 = vector.extract_strided_slice %395 {offsets = [0, 384], sizes = [8, 128], strides = [1, 1]} : vector<8x512xf32> to vector<8x128xf32>
    %411 = arith.negf %410 : vector<8x128xf32>
    %412 = math.exp %411 : vector<8x128xf32>
    %cst_143 = arith.constant 1.000000e+00 : f32
    %413 = vector.broadcast %cst_143 : f32 to vector<8x128xf32>
    %414 = arith.addf %413, %412 : vector<8x128xf32>
    %415 = arith.divf %413, %414 : vector<8x128xf32>
    %416 = arith.mulf %407, %389 : vector<8x128xf32>
    %417 = arith.mulf %401, %409 : vector<8x128xf32>
    %418 = arith.addf %416, %417 : vector<8x128xf32>
    %419 = math.tanh %418 : vector<8x128xf32>
    %420 = arith.mulf %415, %419 : vector<8x128xf32>
    %421 = vector.broadcast %387 : i32 to vector<8x1xi32>
    %422 = arith.cmpi slt, %421, %15 : vector<8x1xi32>
    %423 = arith.extui %422 : vector<8x1xi1> to vector<8x1xi32>
    %424 = arith.sitofp %423 : vector<8x1xi32> to vector<8x1xf32>
    %425 = arith.subf %418, %389 : vector<8x128xf32>
    %426 = vector.broadcast %424 : vector<8x1xf32> to vector<8x128xf32>
    %427 = arith.mulf %426, %425 : vector<8x128xf32>
    %428 = arith.addf %389, %427 : vector<8x128xf32>
    %c0_144 = arith.constant 0 : index
    %c0_145 = arith.constant 0 : index
    %429 = vector.load %arg9[%c0_144, %c0_145] : memref<8x128xf32, #tpu.memory_space<vmem>>, vector<8x128xf32>
    tpu.vector_store %arg9[%c0_144, %c0_145], %428 {strides = array<i32>} : memref<8x128xf32, #tpu.memory_space<vmem>>, vector<8x128xf32>,
    %430 = arith.subf %420, %388 : vector<8x128xf32>
    %431 = vector.broadcast %424 : vector<8x1xf32> to vector<8x128xf32>
    %432 = arith.mulf %431, %430 : vector<8x128xf32>
    %433 = arith.addf %388, %432 : vector<8x128xf32>
    %c0_146 = arith.constant 0 : index
    %c0_147 = arith.constant 0 : index
    %434 = vector.load %arg8[%c0_146, %c0_147] : memref<8x128xf32, #tpu.memory_space<vmem>>, vector<8x128xf32>
    tpu.vector_store %arg8[%c0_146, %c0_147], %433 {strides = array<i32>} : memref<8x128xf32, #tpu.memory_space<vmem>>, vector<8x128xf32>,
    %435 = vector.broadcast %424 : vector<8x1xf32> to vector<8x128xf32>
    %436 = arith.mulf %435, %420 : vector<8x128xf32>
    %437 = arith.index_cast %385 : i32 to index
    %c0_148 = arith.constant 0 : index
    %c0_149 = arith.constant 0 : index
    %438 = vector.load %arg7[%437, %c0_148, %c0_149] : memref<8x8x128xf32, #tpu.memory_space<vmem>>, vector<1x8x128xf32>
    %439 = vector.shape_cast %438 : vector<1x8x128xf32> to vector<8x128xf32>
    %440 = vector.shape_cast %436 : vector<8x128xf32> to vector<1x8x128xf32>
    tpu.vector_store %arg7[%437, %c0_148, %c0_149], %440 {strides = array<i32>} : memref<8x8x128xf32, #tpu.memory_space<vmem>>, vector<1x8x128xf32>,
    %c7_i32_150 = arith.constant 7 : i32
    %c1_i32_151 = arith.constant 1 : i32
    %441 = arith.subi %c1_i32_151, %arg0 : i32
    %442 = arith.muli %441, %c7_i32_150 : i32
    %c7_i32_152 = arith.constant 7 : i32
    %443 = arith.subi %c7_i32_152, %c7_i32_150 : i32
    %444 = arith.muli %arg0, %443 : i32
    %445 = arith.addi %442, %444 : i32
    %c8_i32_153 = arith.constant 8 : i32
    %446 = arith.muli %20, %c8_i32_153 : i32
    %447 = arith.addi %446, %445 : i32
    %c0_154 = arith.constant 0 : index
    %c0_155 = arith.constant 0 : index
    %448 = vector.load %arg8[%c0_154, %c0_155] : memref<8x128xf32, #tpu.memory_space<vmem>>, vector<8x128xf32>
    %c0_156 = arith.constant 0 : index
    %c0_157 = arith.constant 0 : index
    %449 = vector.load %arg9[%c0_156, %c0_157] : memref<8x128xf32, #tpu.memory_space<vmem>>, vector<8x128xf32>
    %c8_i32_158 = arith.constant 8 : i32
    %450 = arith.muli %445, %c8_i32_158 : i32
    %451 = tpu.assume_multiple %450, 8 : i32
    %452 = arith.index_cast %451 : i32 to index
    %c0_159 = arith.constant 0 : index
    %453 = vector.load %arg10[%452, %c0_159] : memref<64x512xf32, #tpu.memory_space<vmem>>, vector<8x512xf32>
    %cst_160 = arith.constant dense<0.000000e+00> : vector<8x512xf32>
    %454 = tpu.matmul %448, %14, %cst_160 {dimension_numbers = #tpu.dot_dimension_numbers<[1], [0], [0], [1], [0, 0, 1, 1], [], []>} : vector<8x128xf32>, vector<128x512xf32>, vector<8x512xf32> -> vector<8x512xf32>
    %455 = arith.addf %453, %454 : vector<8x512xf32>
    %456 = vector.extract_strided_slice %455 {offsets = [0, 0], sizes = [8, 128], strides = [1, 1]} : vector<8x512xf32> to vector<8x128xf32>
    %457 = arith.negf %456 : vector<8x128xf32>
    %458 = math.exp %457 : vector<8x128xf32>
    %cst_161 = arith.constant 1.000000e+00 : f32
    %459 = vector.broadcast %cst_161 : f32 to vector<8x128xf32>
    %460 = arith.addf %459, %458 : vector<8x128xf32>
    %461 = arith.divf %459, %460 : vector<8x128xf32>
    %462 = vector.extract_strided_slice %455 {offsets = [0, 128], sizes = [8, 128], strides = [1, 1]} : vector<8x512xf32> to vector<8x128xf32>
    %463 = arith.negf %462 : vector<8x128xf32>
    %464 = math.exp %463 : vector<8x128xf32>
    %cst_162 = arith.constant 1.000000e+00 : f32
    %465 = vector.broadcast %cst_162 : f32 to vector<8x128xf32>
    %466 = arith.addf %465, %464 : vector<8x128xf32>
    %467 = arith.divf %465, %466 : vector<8x128xf32>
    %468 = vector.extract_strided_slice %455 {offsets = [0, 256], sizes = [8, 128], strides = [1, 1]} : vector<8x512xf32> to vector<8x128xf32>
    %469 = math.tanh %468 : vector<8x128xf32>
    %470 = vector.extract_strided_slice %455 {offsets = [0, 384], sizes = [8, 128], strides = [1, 1]} : vector<8x512xf32> to vector<8x128xf32>
    %471 = arith.negf %470 : vector<8x128xf32>
    %472 = math.exp %471 : vector<8x128xf32>
    %cst_163 = arith.constant 1.000000e+00 : f32
    %473 = vector.broadcast %cst_163 : f32 to vector<8x128xf32>
    %474 = arith.addf %473, %472 : vector<8x128xf32>
    %475 = arith.divf %473, %474 : vector<8x128xf32>
    %476 = arith.mulf %467, %449 : vector<8x128xf32>
    %477 = arith.mulf %461, %469 : vector<8x128xf32>
    %478 = arith.addf %476, %477 : vector<8x128xf32>
    %479 = math.tanh %478 : vector<8x128xf32>
    %480 = arith.mulf %475, %479 : vector<8x128xf32>
    %481 = vector.broadcast %447 : i32 to vector<8x1xi32>
    %482 = arith.cmpi slt, %481, %15 : vector<8x1xi32>
    %483 = arith.extui %482 : vector<8x1xi1> to vector<8x1xi32>
    %484 = arith.sitofp %483 : vector<8x1xi32> to vector<8x1xf32>
    %485 = arith.subf %478, %449 : vector<8x128xf32>
    %486 = vector.broadcast %484 : vector<8x1xf32> to vector<8x128xf32>
    %487 = arith.mulf %486, %485 : vector<8x128xf32>
    %488 = arith.addf %449, %487 : vector<8x128xf32>
    %c0_164 = arith.constant 0 : index
    %c0_165 = arith.constant 0 : index
    %489 = vector.load %arg9[%c0_164, %c0_165] : memref<8x128xf32, #tpu.memory_space<vmem>>, vector<8x128xf32>
    tpu.vector_store %arg9[%c0_164, %c0_165], %488 {strides = array<i32>} : memref<8x128xf32, #tpu.memory_space<vmem>>, vector<8x128xf32>,
    %490 = arith.subf %480, %448 : vector<8x128xf32>
    %491 = vector.broadcast %484 : vector<8x1xf32> to vector<8x128xf32>
    %492 = arith.mulf %491, %490 : vector<8x128xf32>
    %493 = arith.addf %448, %492 : vector<8x128xf32>
    %c0_166 = arith.constant 0 : index
    %c0_167 = arith.constant 0 : index
    %494 = vector.load %arg8[%c0_166, %c0_167] : memref<8x128xf32, #tpu.memory_space<vmem>>, vector<8x128xf32>
    tpu.vector_store %arg8[%c0_166, %c0_167], %493 {strides = array<i32>} : memref<8x128xf32, #tpu.memory_space<vmem>>, vector<8x128xf32>,
    %495 = vector.broadcast %484 : vector<8x1xf32> to vector<8x128xf32>
    %496 = arith.mulf %495, %480 : vector<8x128xf32>
    %497 = arith.index_cast %445 : i32 to index
    %c0_168 = arith.constant 0 : index
    %c0_169 = arith.constant 0 : index
    %498 = vector.load %arg7[%497, %c0_168, %c0_169] : memref<8x8x128xf32, #tpu.memory_space<vmem>>, vector<1x8x128xf32>
    %499 = vector.shape_cast %498 : vector<1x8x128xf32> to vector<8x128xf32>
    %500 = vector.shape_cast %496 : vector<8x128xf32> to vector<1x8x128xf32>
    tpu.vector_store %arg7[%497, %c0_168, %c0_169], %500 {strides = array<i32>} : memref<8x8x128xf32, #tpu.memory_space<vmem>>, vector<1x8x128xf32>,
    %c8_i32_170 = arith.constant 8 : i32
    return
  }
  func.func @transform_0(%arg0: i32, %arg1: i32) -> (i32, i32) {
    %c0_i32 = arith.constant 0 : i32
    %c0_i32_0 = arith.constant 0 : i32
    %c0_i32_1 = arith.constant 0 : i32
    return %c0_i32, %c0_i32_0 : i32, i32
  }
  func.func @transform_1(%arg0: i32, %arg1: i32) -> (i32, i32, i32) {
    %c1_i32 = arith.constant 1 : i32
    %0 = arith.subi %c1_i32, %arg0 : i32
    %1 = arith.muli %0, %arg1 : i32
    %c0_i32 = arith.constant 0 : i32
    %2 = arith.subi %c0_i32, %arg1 : i32
    %3 = arith.muli %arg0, %2 : i32
    %4 = arith.addi %1, %3 : i32
    %c0_i32_0 = arith.constant 0 : i32
    %c0_i32_1 = arith.constant 0 : i32
    %c0_i32_2 = arith.constant 0 : i32
    return %4, %c0_i32_0, %c0_i32_1 : i32, i32, i32
  }
  func.func @transform_2(%arg0: i32, %arg1: i32) -> (i32, i32, i32) {
    %c0_i32 = arith.constant 0 : i32
    %c0_i32_0 = arith.constant 0 : i32
    %c0_i32_1 = arith.constant 0 : i32
    return %arg0, %c0_i32, %c0_i32_0 : i32, i32, i32
  }
  func.func @transform_3(%arg0: i32, %arg1: i32) -> (i32, i32, i32) {
    %c0_i32 = arith.constant 0 : i32
    %c0_i32_0 = arith.constant 0 : i32
    %c0_i32_1 = arith.constant 0 : i32
    return %arg0, %c0_i32, %c0_i32_0 : i32, i32, i32
  }
  func.func @transform_4(%arg0: i32, %arg1: i32) -> (i32, i32, i32) {
    %c0_i32 = arith.constant 0 : i32
    %c0_i32_0 = arith.constant 0 : i32
    %c0_i32_1 = arith.constant 0 : i32
    return %arg0, %c0_i32, %c0_i32_0 : i32, i32, i32
  }
  func.func @transform_5(%arg0: i32, %arg1: i32) -> (i32, i32, i32) {
    %c1_i32 = arith.constant 1 : i32
    %0 = arith.subi %c1_i32, %arg0 : i32
    %1 = arith.muli %0, %arg1 : i32
    %c0_i32 = arith.constant 0 : i32
    %2 = arith.subi %c0_i32, %arg1 : i32
    %3 = arith.muli %arg0, %2 : i32
    %4 = arith.addi %1, %3 : i32
    %c0_i32_0 = arith.constant 0 : i32
    %c0_i32_1 = arith.constant 0 : i32
    return %4, %c0_i32_0, %arg0 : i32, i32, i32
  }
}

module attributes {stable_mosaic.version = 11 : i64} {
  func.func @_bilstm_layer_kernel(%arg0: i32, %arg1: i32, %arg2: memref<8x1xi32, #tpu.memory_space<vmem>>, %arg3: memref<8x8x256xf32, #tpu.memory_space<vmem>>, %arg4: memref<1x256x512xf32, #tpu.memory_space<vmem>>, %arg5: memref<1x128x512xf32, #tpu.memory_space<vmem>>, %arg6: memref<1x1x512xf32, #tpu.memory_space<vmem>>, %arg7: memref<8x8x128xf32, #tpu.memory_space<vmem>>, %arg8: memref<8x128xf32, #tpu.memory_space<vmem>>, %arg9: memref<8x128xf32, #tpu.memory_space<vmem>>, %arg10: memref<64x512xf32, #tpu.memory_space<vmem>>) attributes {dimension_semantics = [#tpu.dimension_semantics<parallel>, #tpu.dimension_semantics<arbitrary>], iteration_bounds = array<i64: 2, 1>, scalar_prefetch = 0 : i64, scratch_operands = 3 : i64, tpu.core_type = #tpu.core_type<tc>, window_params = [{pipeline_mode = #tpu.pipeline_mode<synchronous>, transform_indices = @transform_0, window_bounds = array<i64: 8, 1>}, {transform_indices = @transform_1, window_bounds = array<i64: 8, 8, 256>}, {transform_indices = @transform_2, window_bounds = array<i64: 1, 256, 512>}, {transform_indices = @transform_3, window_bounds = array<i64: 1, 128, 512>}, {transform_indices = @transform_4, window_bounds = array<i64: 1, 1, 512>}, {transform_indices = @transform_5, window_bounds = array<i64: 8, 8, 128>}]} {
    %c0_i32 = arith.constant 0 : i32
    %0 = arith.cmpi eq, %arg1, %c0_i32 : i32
    %1 = arith.extui %0 : i1 to i32
    %c0_i32_0 = arith.constant 0 : i32
    %2 = arith.cmpi ne, %1, %c0_i32_0 : i32
    scf.if %2 {
      %cst_171 = arith.constant 0.000000e+00 : f32
      %501 = vector.broadcast %cst_171 : f32 to vector<8x128xf32>
      %c0_172 = arith.constant 0 : index
      %c0_173 = arith.constant 0 : index
      %502 = vector.load %arg8[%c0_172, %c0_173] : memref<8x128xf32, #tpu.memory_space<vmem>>, vector<8x128xf32>
      tpu.vector_store %arg8[%c0_172, %c0_173], %501 {strides = array<i32>} : memref<8x128xf32, #tpu.memory_space<vmem>>, vector<8x128xf32>,
      %cst_174 = arith.constant 0.000000e+00 : f32
      %503 = vector.broadcast %cst_174 : f32 to vector<8x128xf32>
      %c0_175 = arith.constant 0 : index
      %c0_176 = arith.constant 0 : index
      %504 = vector.load %arg9[%c0_175, %c0_176] : memref<8x128xf32, #tpu.memory_space<vmem>>, vector<8x128xf32>
      tpu.vector_store %arg9[%c0_175, %c0_176], %503 {strides = array<i32>} : memref<8x128xf32, #tpu.memory_space<vmem>>, vector<8x128xf32>,
    } else {
    }
    %c0 = arith.constant 0 : index
    %c0_1 = arith.constant 0 : index
    %c0_2 = arith.constant 0 : index
    %3 = vector.load %arg3[%c0, %c0_1, %c0_2] : memref<8x8x256xf32, #tpu.memory_space<vmem>>, vector<8x8x256xf32>
    %4 = vector.shape_cast %3 : vector<8x8x256xf32> to vector<64x256xf32>
    %c0_3 = arith.constant 0 : index
    %c0_4 = arith.constant 0 : index
    %c0_5 = arith.constant 0 : index
    %5 = vector.load %arg4[%c0_3, %c0_4, %c0_5] : memref<1x256x512xf32, #tpu.memory_space<vmem>>, vector<1x256x512xf32>
    %6 = vector.shape_cast %5 : vector<1x256x512xf32> to vector<256x512xf32>
    %cst = arith.constant dense<0.000000e+00> : vector<64x512xf32>
    %7 = tpu.matmul %4, %6, %cst {dimension_numbers = #tpu.dot_dimension_numbers<[1], [0], [0], [1], [0, 0, 1, 1], [], []>} : vector<64x256xf32>, vector<256x512xf32>, vector<64x512xf32> -> vector<64x512xf32>
    %c0_6 = arith.constant 0 : index
    %c0_7 = arith.constant 0 : index
    %c0_8 = arith.constant 0 : index
    %8 = vector.load %arg6[%c0_6, %c0_7, %c0_8] : memref<1x1x512xf32, #tpu.memory_space<vmem>>, vector<1x1x512xf32>
    %9 = vector.shape_cast %8 : vector<1x1x512xf32> to vector<1x512xf32>
    %10 = vector.broadcast %9 : vector<1x512xf32> to vector<64x512xf32>
    %11 = arith.addf %7, %10 : vector<64x512xf32>
    %c0_9 = arith.constant 0 : index
    %c0_10 = arith.constant 0 : index
    %12 = vector.load %arg10[%c0_9, %c0_10] : memref<64x512xf32, #tpu.memory_space<vmem>>, vector<64x512xf32>
    tpu.vector_store %arg10[%c0_9, %c0_10], %11 {strides = array<i32>} : memref<64x512xf32, #tpu.memory_space<vmem>>, vector<64x512xf32>,
    %c0_11 = arith.constant 0 : index
    %c0_12 = arith.constant 0 : index
    %c0_13 = arith.constant 0 : index
    %13 = vector.load %arg5[%c0_11, %c0_12, %c0_13] : memref<1x128x512xf32, #tpu.memory_space<vmem>>, vector<1x128x512xf32>
    %14 = vector.shape_cast %13 : vector<1x128x512xf32> to vector<128x512xf32>
    %c0_14 = arith.constant 0 : index
    %c0_15 = arith.constant 0 : index
    %15 = vector.load %arg2[%c0_14, %c0_15] : memref<8x1xi32, #tpu.memory_space<vmem>>, vector<8x1xi32>
    %c1_i32 = arith.constant 1 : i32
    %16 = arith.subi %c1_i32, %arg0 : i32
    %17 = arith.muli %16, %arg1 : i32
    %c0_i32_16 = arith.constant 0 : i32
    %18 = arith.subi %c0_i32_16, %arg1 : i32
    %19 = arith.muli %arg0, %18 : i32
    %20 = arith.addi %17, %19 : i32
    %c0_i32_17 = arith.constant 0 : i32
    %c1_i32_18 = arith.constant 1 : i32
    %21 = arith.subi %c1_i32_18, %arg0 : i32
    %22 = arith.muli %21, %c0_i32_17 : i32
    %c7_i32 = arith.constant 7 : i32
    %23 = arith.subi %c7_i32, %c0_i32_17 : i32
    %24 = arith.muli %arg0, %23 : i32
    %25 = arith.addi %22, %24 : i32
    %c8_i32 = arith.constant 8 : i32
    %26 = arith.muli %20, %c8_i32 : i32
    %27 = arith.addi %26, %25 : i32
    %c0_19 = arith.constant 0 : index
    %c0_20 = arith.constant 0 : index
    %28 = vector.load %arg8[%c0_19, %c0_20] : memref<8x128xf32, #tpu.memory_space<vmem>>, vector<8x128xf32>
    %c0_21 = arith.constant 0 : index
    %c0_22 = arith.constant 0 : index
    %29 = vector.load %arg9[%c0_21, %c0_22] : memref<8x128xf32, #tpu.memory_space<vmem>>, vector<8x128xf32>
    %c8_i32_23 = arith.constant 8 : i32
    %30 = arith.muli %25, %c8_i32_23 : i32
    %31 = tpu.assume_multiple %30, 8 : i32
    %32 = arith.index_cast %31 : i32 to index
    %c0_24 = arith.constant 0 : index
    %33 = vector.load %arg10[%32, %c0_24] : memref<64x512xf32, #tpu.memory_space<vmem>>, vector<8x512xf32>
    %cst_25 = arith.constant dense<0.000000e+00> : vector<8x512xf32>
    %34 = tpu.matmul %28, %14, %cst_25 {dimension_numbers = #tpu.dot_dimension_numbers<[1], [0], [0], [1], [0, 0, 1, 1], [], []>} : vector<8x128xf32>, vector<128x512xf32>, vector<8x512xf32> -> vector<8x512xf32>
    %35 = arith.addf %33, %34 : vector<8x512xf32>
    %36 = vector.extract_strided_slice %35 {offsets = [0, 0], sizes = [8, 128], strides = [1, 1]} : vector<8x512xf32> to vector<8x128xf32>
    %37 = arith.negf %36 : vector<8x128xf32>
    %38 = math.exp %37 : vector<8x128xf32>
    %cst_26 = arith.constant 1.000000e+00 : f32
    %39 = vector.broadcast %cst_26 : f32 to vector<8x128xf32>
    %40 = arith.addf %39, %38 : vector<8x128xf32>
    %41 = arith.divf %39, %40 : vector<8x128xf32>
    %42 = vector.extract_strided_slice %35 {offsets = [0, 128], sizes = [8, 128], strides = [1, 1]} : vector<8x512xf32> to vector<8x128xf32>
    %43 = arith.negf %42 : vector<8x128xf32>
    %44 = math.exp %43 : vector<8x128xf32>
    %cst_27 = arith.constant 1.000000e+00 : f32
    %45 = vector.broadcast %cst_27 : f32 to vector<8x128xf32>
    %46 = arith.addf %45, %44 : vector<8x128xf32>
    %47 = arith.divf %45, %46 : vector<8x128xf32>
    %48 = vector.extract_strided_slice %35 {offsets = [0, 256], sizes = [8, 128], strides = [1, 1]} : vector<8x512xf32> to vector<8x128xf32>
    %49 = math.tanh %48 : vector<8x128xf32>
    %50 = vector.extract_strided_slice %35 {offsets = [0, 384], sizes = [8, 128], strides = [1, 1]} : vector<8x512xf32> to vector<8x128xf32>
    %51 = arith.negf %50 : vector<8x128xf32>
    %52 = math.exp %51 : vector<8x128xf32>
    %cst_28 = arith.constant 1.000000e+00 : f32
    %53 = vector.broadcast %cst_28 : f32 to vector<8x128xf32>
    %54 = arith.addf %53, %52 : vector<8x128xf32>
    %55 = arith.divf %53, %54 : vector<8x128xf32>
    %56 = arith.mulf %47, %29 : vector<8x128xf32>
    %57 = arith.mulf %41, %49 : vector<8x128xf32>
    %58 = arith.addf %56, %57 : vector<8x128xf32>
    %59 = math.tanh %58 : vector<8x128xf32>
    %60 = arith.mulf %55, %59 : vector<8x128xf32>
    %61 = vector.broadcast %27 : i32 to vector<8x1xi32>
    %62 = arith.cmpi slt, %61, %15 : vector<8x1xi32>
    %63 = arith.extui %62 : vector<8x1xi1> to vector<8x1xi32>
    %64 = arith.sitofp %63 : vector<8x1xi32> to vector<8x1xf32>
    %65 = arith.subf %58, %29 : vector<8x128xf32>
    %66 = vector.broadcast %64 : vector<8x1xf32> to vector<8x128xf32>
    %67 = arith.mulf %66, %65 : vector<8x128xf32>
    %68 = arith.addf %29, %67 : vector<8x128xf32>
    %c0_29 = arith.constant 0 : index
    %c0_30 = arith.constant 0 : index
    %69 = vector.load %arg9[%c0_29, %c0_30] : memref<8x128xf32, #tpu.memory_space<vmem>>, vector<8x128xf32>
    tpu.vector_store %arg9[%c0_29, %c0_30], %68 {strides = array<i32>} : memref<8x128xf32, #tpu.memory_space<vmem>>, vector<8x128xf32>,
    %70 = arith.subf %60, %28 : vector<8x128xf32>
    %71 = vector.broadcast %64 : vector<8x1xf32> to vector<8x128xf32>
    %72 = arith.mulf %71, %70 : vector<8x128xf32>
    %73 = arith.addf %28, %72 : vector<8x128xf32>
    %c0_31 = arith.constant 0 : index
    %c0_32 = arith.constant 0 : index
    %74 = vector.load %arg8[%c0_31, %c0_32] : memref<8x128xf32, #tpu.memory_space<vmem>>, vector<8x128xf32>
    tpu.vector_store %arg8[%c0_31, %c0_32], %73 {strides = array<i32>} : memref<8x128xf32, #tpu.memory_space<vmem>>, vector<8x128xf32>,
    %75 = vector.broadcast %64 : vector<8x1xf32> to vector<8x128xf32>
    %76 = arith.mulf %75, %60 : vector<8x128xf32>
    %77 = arith.index_cast %25 : i32 to index
    %c0_33 = arith.constant 0 : index
    %c0_34 = arith.constant 0 : index
    %78 = vector.load %arg7[%77, %c0_33, %c0_34] : memref<8x8x128xf32, #tpu.memory_space<vmem>>, vector<1x8x128xf32>
    %79 = vector.shape_cast %78 : vector<1x8x128xf32> to vector<8x128xf32>
    %80 = vector.shape_cast %76 : vector<8x128xf32> to vector<1x8x128xf32>
    tpu.vector_store %arg7[%77, %c0_33, %c0_34], %80 {strides = array<i32>} : memref<8x8x128xf32, #tpu.memory_space<vmem>>, vector<1x8x128xf32>,
    %c1_i32_35 = arith.constant 1 : i32
    %c1_i32_36 = arith.constant 1 : i32
    %81 = arith.subi %c1_i32_36, %arg0 : i32
    %82 = arith.muli %81, %c1_i32_35 : i32
    %c7_i32_37 = arith.constant 7 : i32
    %83 = arith.subi %c7_i32_37, %c1_i32_35 : i32
    %84 = arith.muli %arg0, %83 : i32
    %85 = arith.addi %82, %84 : i32
    %c8_i32_38 = arith.constant 8 : i32
    %86 = arith.muli %20, %c8_i32_38 : i32
    %87 = arith.addi %86, %85 : i32
    %c0_39 = arith.constant 0 : index
    %c0_40 = arith.constant 0 : index
    %88 = vector.load %arg8[%c0_39, %c0_40] : memref<8x128xf32, #tpu.memory_space<vmem>>, vector<8x128xf32>
    %c0_41 = arith.constant 0 : index
    %c0_42 = arith.constant 0 : index
    %89 = vector.load %arg9[%c0_41, %c0_42] : memref<8x128xf32, #tpu.memory_space<vmem>>, vector<8x128xf32>
    %c8_i32_43 = arith.constant 8 : i32
    %90 = arith.muli %85, %c8_i32_43 : i32
    %91 = tpu.assume_multiple %90, 8 : i32
    %92 = arith.index_cast %91 : i32 to index
    %c0_44 = arith.constant 0 : index
    %93 = vector.load %arg10[%92, %c0_44] : memref<64x512xf32, #tpu.memory_space<vmem>>, vector<8x512xf32>
    %cst_45 = arith.constant dense<0.000000e+00> : vector<8x512xf32>
    %94 = tpu.matmul %88, %14, %cst_45 {dimension_numbers = #tpu.dot_dimension_numbers<[1], [0], [0], [1], [0, 0, 1, 1], [], []>} : vector<8x128xf32>, vector<128x512xf32>, vector<8x512xf32> -> vector<8x512xf32>
    %95 = arith.addf %93, %94 : vector<8x512xf32>
    %96 = vector.extract_strided_slice %95 {offsets = [0, 0], sizes = [8, 128], strides = [1, 1]} : vector<8x512xf32> to vector<8x128xf32>
    %97 = arith.negf %96 : vector<8x128xf32>
    %98 = math.exp %97 : vector<8x128xf32>
    %cst_46 = arith.constant 1.000000e+00 : f32
    %99 = vector.broadcast %cst_46 : f32 to vector<8x128xf32>
    %100 = arith.addf %99, %98 : vector<8x128xf32>
    %101 = arith.divf %99, %100 : vector<8x128xf32>
    %102 = vector.extract_strided_slice %95 {offsets = [0, 128], sizes = [8, 128], strides = [1, 1]} : vector<8x512xf32> to vector<8x128xf32>
    %103 = arith.negf %102 : vector<8x128xf32>
    %104 = math.exp %103 : vector<8x128xf32>
    %cst_47 = arith.constant 1.000000e+00 : f32
    %105 = vector.broadcast %cst_47 : f32 to vector<8x128xf32>
    %106 = arith.addf %105, %104 : vector<8x128xf32>
    %107 = arith.divf %105, %106 : vector<8x128xf32>
    %108 = vector.extract_strided_slice %95 {offsets = [0, 256], sizes = [8, 128], strides = [1, 1]} : vector<8x512xf32> to vector<8x128xf32>
    %109 = math.tanh %108 : vector<8x128xf32>
    %110 = vector.extract_strided_slice %95 {offsets = [0, 384], sizes = [8, 128], strides = [1, 1]} : vector<8x512xf32> to vector<8x128xf32>
    %111 = arith.negf %110 : vector<8x128xf32>
    %112 = math.exp %111 : vector<8x128xf32>
    %cst_48 = arith.constant 1.000000e+00 : f32
    %113 = vector.broadcast %cst_48 : f32 to vector<8x128xf32>
    %114 = arith.addf %113, %112 : vector<8x128xf32>
    %115 = arith.divf %113, %114 : vector<8x128xf32>
    %116 = arith.mulf %107, %89 : vector<8x128xf32>
    %117 = arith.mulf %101, %109 : vector<8x128xf32>
    %118 = arith.addf %116, %117 : vector<8x128xf32>
    %119 = math.tanh %118 : vector<8x128xf32>
    %120 = arith.mulf %115, %119 : vector<8x128xf32>
    %121 = vector.broadcast %87 : i32 to vector<8x1xi32>
    %122 = arith.cmpi slt, %121, %15 : vector<8x1xi32>
    %123 = arith.extui %122 : vector<8x1xi1> to vector<8x1xi32>
    %124 = arith.sitofp %123 : vector<8x1xi32> to vector<8x1xf32>
    %125 = arith.subf %118, %89 : vector<8x128xf32>
    %126 = vector.broadcast %124 : vector<8x1xf32> to vector<8x128xf32>
    %127 = arith.mulf %126, %125 : vector<8x128xf32>
    %128 = arith.addf %89, %127 : vector<8x128xf32>
    %c0_49 = arith.constant 0 : index
    %c0_50 = arith.constant 0 : index
    %129 = vector.load %arg9[%c0_49, %c0_50] : memref<8x128xf32, #tpu.memory_space<vmem>>, vector<8x128xf32>
    tpu.vector_store %arg9[%c0_49, %c0_50], %128 {strides = array<i32>} : memref<8x128xf32, #tpu.memory_space<vmem>>, vector<8x128xf32>,
    %130 = arith.subf %120, %88 : vector<8x128xf32>
    %131 = vector.broadcast %124 : vector<8x1xf32> to vector<8x128xf32>
    %132 = arith.mulf %131, %130 : vector<8x128xf32>
    %133 = arith.addf %88, %132 : vector<8x128xf32>
    %c0_51 = arith.constant 0 : index
    %c0_52 = arith.constant 0 : index
    %134 = vector.load %arg8[%c0_51, %c0_52] : memref<8x128xf32, #tpu.memory_space<vmem>>, vector<8x128xf32>
    tpu.vector_store %arg8[%c0_51, %c0_52], %133 {strides = array<i32>} : memref<8x128xf32, #tpu.memory_space<vmem>>, vector<8x128xf32>,
    %135 = vector.broadcast %124 : vector<8x1xf32> to vector<8x128xf32>
    %136 = arith.mulf %135, %120 : vector<8x128xf32>
    %137 = arith.index_cast %85 : i32 to index
    %c0_53 = arith.constant 0 : index
    %c0_54 = arith.constant 0 : index
    %138 = vector.load %arg7[%137, %c0_53, %c0_54] : memref<8x8x128xf32, #tpu.memory_space<vmem>>, vector<1x8x128xf32>
    %139 = vector.shape_cast %138 : vector<1x8x128xf32> to vector<8x128xf32>
    %140 = vector.shape_cast %136 : vector<8x128xf32> to vector<1x8x128xf32>
    tpu.vector_store %arg7[%137, %c0_53, %c0_54], %140 {strides = array<i32>} : memref<8x8x128xf32, #tpu.memory_space<vmem>>, vector<1x8x128xf32>,
    %c2_i32 = arith.constant 2 : i32
    %c1_i32_55 = arith.constant 1 : i32
    %141 = arith.subi %c1_i32_55, %arg0 : i32
    %142 = arith.muli %141, %c2_i32 : i32
    %c7_i32_56 = arith.constant 7 : i32
    %143 = arith.subi %c7_i32_56, %c2_i32 : i32
    %144 = arith.muli %arg0, %143 : i32
    %145 = arith.addi %142, %144 : i32
    %c8_i32_57 = arith.constant 8 : i32
    %146 = arith.muli %20, %c8_i32_57 : i32
    %147 = arith.addi %146, %145 : i32
    %c0_58 = arith.constant 0 : index
    %c0_59 = arith.constant 0 : index
    %148 = vector.load %arg8[%c0_58, %c0_59] : memref<8x128xf32, #tpu.memory_space<vmem>>, vector<8x128xf32>
    %c0_60 = arith.constant 0 : index
    %c0_61 = arith.constant 0 : index
    %149 = vector.load %arg9[%c0_60, %c0_61] : memref<8x128xf32, #tpu.memory_space<vmem>>, vector<8x128xf32>
    %c8_i32_62 = arith.constant 8 : i32
    %150 = arith.muli %145, %c8_i32_62 : i32
    %151 = tpu.assume_multiple %150, 8 : i32
    %152 = arith.index_cast %151 : i32 to index
    %c0_63 = arith.constant 0 : index
    %153 = vector.load %arg10[%152, %c0_63] : memref<64x512xf32, #tpu.memory_space<vmem>>, vector<8x512xf32>
    %cst_64 = arith.constant dense<0.000000e+00> : vector<8x512xf32>
    %154 = tpu.matmul %148, %14, %cst_64 {dimension_numbers = #tpu.dot_dimension_numbers<[1], [0], [0], [1], [0, 0, 1, 1], [], []>} : vector<8x128xf32>, vector<128x512xf32>, vector<8x512xf32> -> vector<8x512xf32>
    %155 = arith.addf %153, %154 : vector<8x512xf32>
    %156 = vector.extract_strided_slice %155 {offsets = [0, 0], sizes = [8, 128], strides = [1, 1]} : vector<8x512xf32> to vector<8x128xf32>
    %157 = arith.negf %156 : vector<8x128xf32>
    %158 = math.exp %157 : vector<8x128xf32>
    %cst_65 = arith.constant 1.000000e+00 : f32
    %159 = vector.broadcast %cst_65 : f32 to vector<8x128xf32>
    %160 = arith.addf %159, %158 : vector<8x128xf32>
    %161 = arith.divf %159, %160 : vector<8x128xf32>
    %162 = vector.extract_strided_slice %155 {offsets = [0, 128], sizes = [8, 128], strides = [1, 1]} : vector<8x512xf32> to vector<8x128xf32>
    %163 = arith.negf %162 : vector<8x128xf32>
    %164 = math.exp %163 : vector<8x128xf32>
    %cst_66 = arith.constant 1.000000e+00 : f32
    %165 = vector.broadcast %cst_66 : f32 to vector<8x128xf32>
    %166 = arith.addf %165, %164 : vector<8x128xf32>
    %167 = arith.divf %165, %166 : vector<8x128xf32>
    %168 = vector.extract_strided_slice %155 {offsets = [0, 256], sizes = [8, 128], strides = [1, 1]} : vector<8x512xf32> to vector<8x128xf32>
    %169 = math.tanh %168 : vector<8x128xf32>
    %170 = vector.extract_strided_slice %155 {offsets = [0, 384], sizes = [8, 128], strides = [1, 1]} : vector<8x512xf32> to vector<8x128xf32>
    %171 = arith.negf %170 : vector<8x128xf32>
    %172 = math.exp %171 : vector<8x128xf32>
    %cst_67 = arith.constant 1.000000e+00 : f32
    %173 = vector.broadcast %cst_67 : f32 to vector<8x128xf32>
    %174 = arith.addf %173, %172 : vector<8x128xf32>
    %175 = arith.divf %173, %174 : vector<8x128xf32>
    %176 = arith.mulf %167, %149 : vector<8x128xf32>
    %177 = arith.mulf %161, %169 : vector<8x128xf32>
    %178 = arith.addf %176, %177 : vector<8x128xf32>
    %179 = math.tanh %178 : vector<8x128xf32>
    %180 = arith.mulf %175, %179 : vector<8x128xf32>
    %181 = vector.broadcast %147 : i32 to vector<8x1xi32>
    %182 = arith.cmpi slt, %181, %15 : vector<8x1xi32>
    %183 = arith.extui %182 : vector<8x1xi1> to vector<8x1xi32>
    %184 = arith.sitofp %183 : vector<8x1xi32> to vector<8x1xf32>
    %185 = arith.subf %178, %149 : vector<8x128xf32>
    %186 = vector.broadcast %184 : vector<8x1xf32> to vector<8x128xf32>
    %187 = arith.mulf %186, %185 : vector<8x128xf32>
    %188 = arith.addf %149, %187 : vector<8x128xf32>
    %c0_68 = arith.constant 0 : index
    %c0_69 = arith.constant 0 : index
    %189 = vector.load %arg9[%c0_68, %c0_69] : memref<8x128xf32, #tpu.memory_space<vmem>>, vector<8x128xf32>
    tpu.vector_store %arg9[%c0_68, %c0_69], %188 {strides = array<i32>} : memref<8x128xf32, #tpu.memory_space<vmem>>, vector<8x128xf32>,
    %190 = arith.subf %180, %148 : vector<8x128xf32>
    %191 = vector.broadcast %184 : vector<8x1xf32> to vector<8x128xf32>
    %192 = arith.mulf %191, %190 : vector<8x128xf32>
    %193 = arith.addf %148, %192 : vector<8x128xf32>
    %c0_70 = arith.constant 0 : index
    %c0_71 = arith.constant 0 : index
    %194 = vector.load %arg8[%c0_70, %c0_71] : memref<8x128xf32, #tpu.memory_space<vmem>>, vector<8x128xf32>
    tpu.vector_store %arg8[%c0_70, %c0_71], %193 {strides = array<i32>} : memref<8x128xf32, #tpu.memory_space<vmem>>, vector<8x128xf32>,
    %195 = vector.broadcast %184 : vector<8x1xf32> to vector<8x128xf32>
    %196 = arith.mulf %195, %180 : vector<8x128xf32>
    %197 = arith.index_cast %145 : i32 to index
    %c0_72 = arith.constant 0 : index
    %c0_73 = arith.constant 0 : index
    %198 = vector.load %arg7[%197, %c0_72, %c0_73] : memref<8x8x128xf32, #tpu.memory_space<vmem>>, vector<1x8x128xf32>
    %199 = vector.shape_cast %198 : vector<1x8x128xf32> to vector<8x128xf32>
    %200 = vector.shape_cast %196 : vector<8x128xf32> to vector<1x8x128xf32>
    tpu.vector_store %arg7[%197, %c0_72, %c0_73], %200 {strides = array<i32>} : memref<8x8x128xf32, #tpu.memory_space<vmem>>, vector<1x8x128xf32>,
    %c3_i32 = arith.constant 3 : i32
    %c1_i32_74 = arith.constant 1 : i32
    %201 = arith.subi %c1_i32_74, %arg0 : i32
    %202 = arith.muli %201, %c3_i32 : i32
    %c7_i32_75 = arith.constant 7 : i32
    %203 = arith.subi %c7_i32_75, %c3_i32 : i32
    %204 = arith.muli %arg0, %203 : i32
    %205 = arith.addi %202, %204 : i32
    %c8_i32_76 = arith.constant 8 : i32
    %206 = arith.muli %20, %c8_i32_76 : i32
    %207 = arith.addi %206, %205 : i32
    %c0_77 = arith.constant 0 : index
    %c0_78 = arith.constant 0 : index
    %208 = vector.load %arg8[%c0_77, %c0_78] : memref<8x128xf32, #tpu.memory_space<vmem>>, vector<8x128xf32>
    %c0_79 = arith.constant 0 : index
    %c0_80 = arith.constant 0 : index
    %209 = vector.load %arg9[%c0_79, %c0_80] : memref<8x128xf32, #tpu.memory_space<vmem>>, vector<8x128xf32>
    %c8_i32_81 = arith.constant 8 : i32
    %210 = arith.muli %205, %c8_i32_81 : i32
    %211 = tpu.assume_multiple %210, 8 : i32
    %212 = arith.index_cast %211 : i32 to index
    %c0_82 = arith.constant 0 : index
    %213 = vector.load %arg10[%212, %c0_82] : memref<64x512xf32, #tpu.memory_space<vmem>>, vector<8x512xf32>
    %cst_83 = arith.constant dense<0.000000e+00> : vector<8x512xf32>
    %214 = tpu.matmul %208, %14, %cst_83 {dimension_numbers = #tpu.dot_dimension_numbers<[1], [0], [0], [1], [0, 0, 1, 1], [], []>} : vector<8x128xf32>, vector<128x512xf32>, vector<8x512xf32> -> vector<8x512xf32>
    %215 = arith.addf %213, %214 : vector<8x512xf32>
    %216 = vector.extract_strided_slice %215 {offsets = [0, 0], sizes = [8, 128], strides = [1, 1]} : vector<8x512xf32> to vector<8x128xf32>
    %217 = arith.negf %216 : vector<8x128xf32>
    %218 = math.exp %217 : vector<8x128xf32>
    %cst_84 = arith.constant 1.000000e+00 : f32
    %219 = vector.broadcast %cst_84 : f32 to vector<8x128xf32>
    %220 = arith.addf %219, %218 : vector<8x128xf32>
    %221 = arith.divf %219, %220 : vector<8x128xf32>
    %222 = vector.extract_strided_slice %215 {offsets = [0, 128], sizes = [8, 128], strides = [1, 1]} : vector<8x512xf32> to vector<8x128xf32>
    %223 = arith.negf %222 : vector<8x128xf32>
    %224 = math.exp %223 : vector<8x128xf32>
    %cst_85 = arith.constant 1.000000e+00 : f32
    %225 = vector.broadcast %cst_85 : f32 to vector<8x128xf32>
    %226 = arith.addf %225, %224 : vector<8x128xf32>
    %227 = arith.divf %225, %226 : vector<8x128xf32>
    %228 = vector.extract_strided_slice %215 {offsets = [0, 256], sizes = [8, 128], strides = [1, 1]} : vector<8x512xf32> to vector<8x128xf32>
    %229 = math.tanh %228 : vector<8x128xf32>
    %230 = vector.extract_strided_slice %215 {offsets = [0, 384], sizes = [8, 128], strides = [1, 1]} : vector<8x512xf32> to vector<8x128xf32>
    %231 = arith.negf %230 : vector<8x128xf32>
    %232 = math.exp %231 : vector<8x128xf32>
    %cst_86 = arith.constant 1.000000e+00 : f32
    %233 = vector.broadcast %cst_86 : f32 to vector<8x128xf32>
    %234 = arith.addf %233, %232 : vector<8x128xf32>
    %235 = arith.divf %233, %234 : vector<8x128xf32>
    %236 = arith.mulf %227, %209 : vector<8x128xf32>
    %237 = arith.mulf %221, %229 : vector<8x128xf32>
    %238 = arith.addf %236, %237 : vector<8x128xf32>
    %239 = math.tanh %238 : vector<8x128xf32>
    %240 = arith.mulf %235, %239 : vector<8x128xf32>
    %241 = vector.broadcast %207 : i32 to vector<8x1xi32>
    %242 = arith.cmpi slt, %241, %15 : vector<8x1xi32>
    %243 = arith.extui %242 : vector<8x1xi1> to vector<8x1xi32>
    %244 = arith.sitofp %243 : vector<8x1xi32> to vector<8x1xf32>
    %245 = arith.subf %238, %209 : vector<8x128xf32>
    %246 = vector.broadcast %244 : vector<8x1xf32> to vector<8x128xf32>
    %247 = arith.mulf %246, %245 : vector<8x128xf32>
    %248 = arith.addf %209, %247 : vector<8x128xf32>
    %c0_87 = arith.constant 0 : index
    %c0_88 = arith.constant 0 : index
    %249 = vector.load %arg9[%c0_87, %c0_88] : memref<8x128xf32, #tpu.memory_space<vmem>>, vector<8x128xf32>
    tpu.vector_store %arg9[%c0_87, %c0_88], %248 {strides = array<i32>} : memref<8x128xf32, #tpu.memory_space<vmem>>, vector<8x128xf32>,
    %250 = arith.subf %240, %208 : vector<8x128xf32>
    %251 = vector.broadcast %244 : vector<8x1xf32> to vector<8x128xf32>
    %252 = arith.mulf %251, %250 : vector<8x128xf32>
    %253 = arith.addf %208, %252 : vector<8x128xf32>
    %c0_89 = arith.constant 0 : index
    %c0_90 = arith.constant 0 : index
    %254 = vector.load %arg8[%c0_89, %c0_90] : memref<8x128xf32, #tpu.memory_space<vmem>>, vector<8x128xf32>
    tpu.vector_store %arg8[%c0_89, %c0_90], %253 {strides = array<i32>} : memref<8x128xf32, #tpu.memory_space<vmem>>, vector<8x128xf32>,
    %255 = vector.broadcast %244 : vector<8x1xf32> to vector<8x128xf32>
    %256 = arith.mulf %255, %240 : vector<8x128xf32>
    %257 = arith.index_cast %205 : i32 to index
    %c0_91 = arith.constant 0 : index
    %c0_92 = arith.constant 0 : index
    %258 = vector.load %arg7[%257, %c0_91, %c0_92] : memref<8x8x128xf32, #tpu.memory_space<vmem>>, vector<1x8x128xf32>
    %259 = vector.shape_cast %258 : vector<1x8x128xf32> to vector<8x128xf32>
    %260 = vector.shape_cast %256 : vector<8x128xf32> to vector<1x8x128xf32>
    tpu.vector_store %arg7[%257, %c0_91, %c0_92], %260 {strides = array<i32>} : memref<8x8x128xf32, #tpu.memory_space<vmem>>, vector<1x8x128xf32>,
    %c4_i32 = arith.constant 4 : i32
    %c1_i32_93 = arith.constant 1 : i32
    %261 = arith.subi %c1_i32_93, %arg0 : i32
    %262 = arith.muli %261, %c4_i32 : i32
    %c7_i32_94 = arith.constant 7 : i32
    %263 = arith.subi %c7_i32_94, %c4_i32 : i32
    %264 = arith.muli %arg0, %263 : i32
    %265 = arith.addi %262, %264 : i32
    %c8_i32_95 = arith.constant 8 : i32
    %266 = arith.muli %20, %c8_i32_95 : i32
    %267 = arith.addi %266, %265 : i32
    %c0_96 = arith.constant 0 : index
    %c0_97 = arith.constant 0 : index
    %268 = vector.load %arg8[%c0_96, %c0_97] : memref<8x128xf32, #tpu.memory_space<vmem>>, vector<8x128xf32>
    %c0_98 = arith.constant 0 : index
    %c0_99 = arith.constant 0 : index
    %269 = vector.load %arg9[%c0_98, %c0_99] : memref<8x128xf32, #tpu.memory_space<vmem>>, vector<8x128xf32>
    %c8_i32_100 = arith.constant 8 : i32
    %270 = arith.muli %265, %c8_i32_100 : i32
    %271 = tpu.assume_multiple %270, 8 : i32
    %272 = arith.index_cast %271 : i32 to index
    %c0_101 = arith.constant 0 : index
    %273 = vector.load %arg10[%272, %c0_101] : memref<64x512xf32, #tpu.memory_space<vmem>>, vector<8x512xf32>
    %cst_102 = arith.constant dense<0.000000e+00> : vector<8x512xf32>
    %274 = tpu.matmul %268, %14, %cst_102 {dimension_numbers = #tpu.dot_dimension_numbers<[1], [0], [0], [1], [0, 0, 1, 1], [], []>} : vector<8x128xf32>, vector<128x512xf32>, vector<8x512xf32> -> vector<8x512xf32>
    %275 = arith.addf %273, %274 : vector<8x512xf32>
    %276 = vector.extract_strided_slice %275 {offsets = [0, 0], sizes = [8, 128], strides = [1, 1]} : vector<8x512xf32> to vector<8x128xf32>
    %277 = arith.negf %276 : vector<8x128xf32>
    %278 = math.exp %277 : vector<8x128xf32>
    %cst_103 = arith.constant 1.000000e+00 : f32
    %279 = vector.broadcast %cst_103 : f32 to vector<8x128xf32>
    %280 = arith.addf %279, %278 : vector<8x128xf32>
    %281 = arith.divf %279, %280 : vector<8x128xf32>
    %282 = vector.extract_strided_slice %275 {offsets = [0, 128], sizes = [8, 128], strides = [1, 1]} : vector<8x512xf32> to vector<8x128xf32>
    %283 = arith.negf %282 : vector<8x128xf32>
    %284 = math.exp %283 : vector<8x128xf32>
    %cst_104 = arith.constant 1.000000e+00 : f32
    %285 = vector.broadcast %cst_104 : f32 to vector<8x128xf32>
    %286 = arith.addf %285, %284 : vector<8x128xf32>
    %287 = arith.divf %285, %286 : vector<8x128xf32>
    %288 = vector.extract_strided_slice %275 {offsets = [0, 256], sizes = [8, 128], strides = [1, 1]} : vector<8x512xf32> to vector<8x128xf32>
    %289 = math.tanh %288 : vector<8x128xf32>
    %290 = vector.extract_strided_slice %275 {offsets = [0, 384], sizes = [8, 128], strides = [1, 1]} : vector<8x512xf32> to vector<8x128xf32>
    %291 = arith.negf %290 : vector<8x128xf32>
    %292 = math.exp %291 : vector<8x128xf32>
    %cst_105 = arith.constant 1.000000e+00 : f32
    %293 = vector.broadcast %cst_105 : f32 to vector<8x128xf32>
    %294 = arith.addf %293, %292 : vector<8x128xf32>
    %295 = arith.divf %293, %294 : vector<8x128xf32>
    %296 = arith.mulf %287, %269 : vector<8x128xf32>
    %297 = arith.mulf %281, %289 : vector<8x128xf32>
    %298 = arith.addf %296, %297 : vector<8x128xf32>
    %299 = math.tanh %298 : vector<8x128xf32>
    %300 = arith.mulf %295, %299 : vector<8x128xf32>
    %301 = vector.broadcast %267 : i32 to vector<8x1xi32>
    %302 = arith.cmpi slt, %301, %15 : vector<8x1xi32>
    %303 = arith.extui %302 : vector<8x1xi1> to vector<8x1xi32>
    %304 = arith.sitofp %303 : vector<8x1xi32> to vector<8x1xf32>
    %305 = arith.subf %298, %269 : vector<8x128xf32>
    %306 = vector.broadcast %304 : vector<8x1xf32> to vector<8x128xf32>
    %307 = arith.mulf %306, %305 : vector<8x128xf32>
    %308 = arith.addf %269, %307 : vector<8x128xf32>
    %c0_106 = arith.constant 0 : index
    %c0_107 = arith.constant 0 : index
    %309 = vector.load %arg9[%c0_106, %c0_107] : memref<8x128xf32, #tpu.memory_space<vmem>>, vector<8x128xf32>
    tpu.vector_store %arg9[%c0_106, %c0_107], %308 {strides = array<i32>} : memref<8x128xf32, #tpu.memory_space<vmem>>, vector<8x128xf32>,
    %310 = arith.subf %300, %268 : vector<8x128xf32>
    %311 = vector.broadcast %304 : vector<8x1xf32> to vector<8x128xf32>
    %312 = arith.mulf %311, %310 : vector<8x128xf32>
    %313 = arith.addf %268, %312 : vector<8x128xf32>
    %c0_108 = arith.constant 0 : index
    %c0_109 = arith.constant 0 : index
    %314 = vector.load %arg8[%c0_108, %c0_109] : memref<8x128xf32, #tpu.memory_space<vmem>>, vector<8x128xf32>
    tpu.vector_store %arg8[%c0_108, %c0_109], %313 {strides = array<i32>} : memref<8x128xf32, #tpu.memory_space<vmem>>, vector<8x128xf32>,
    %315 = vector.broadcast %304 : vector<8x1xf32> to vector<8x128xf32>
    %316 = arith.mulf %315, %300 : vector<8x128xf32>
    %317 = arith.index_cast %265 : i32 to index
    %c0_110 = arith.constant 0 : index
    %c0_111 = arith.constant 0 : index
    %318 = vector.load %arg7[%317, %c0_110, %c0_111] : memref<8x8x128xf32, #tpu.memory_space<vmem>>, vector<1x8x128xf32>
    %319 = vector.shape_cast %318 : vector<1x8x128xf32> to vector<8x128xf32>
    %320 = vector.shape_cast %316 : vector<8x128xf32> to vector<1x8x128xf32>
    tpu.vector_store %arg7[%317, %c0_110, %c0_111], %320 {strides = array<i32>} : memref<8x8x128xf32, #tpu.memory_space<vmem>>, vector<1x8x128xf32>,
    %c5_i32 = arith.constant 5 : i32
    %c1_i32_112 = arith.constant 1 : i32
    %321 = arith.subi %c1_i32_112, %arg0 : i32
    %322 = arith.muli %321, %c5_i32 : i32
    %c7_i32_113 = arith.constant 7 : i32
    %323 = arith.subi %c7_i32_113, %c5_i32 : i32
    %324 = arith.muli %arg0, %323 : i32
    %325 = arith.addi %322, %324 : i32
    %c8_i32_114 = arith.constant 8 : i32
    %326 = arith.muli %20, %c8_i32_114 : i32
    %327 = arith.addi %326, %325 : i32
    %c0_115 = arith.constant 0 : index
    %c0_116 = arith.constant 0 : index
    %328 = vector.load %arg8[%c0_115, %c0_116] : memref<8x128xf32, #tpu.memory_space<vmem>>, vector<8x128xf32>
    %c0_117 = arith.constant 0 : index
    %c0_118 = arith.constant 0 : index
    %329 = vector.load %arg9[%c0_117, %c0_118] : memref<8x128xf32, #tpu.memory_space<vmem>>, vector<8x128xf32>
    %c8_i32_119 = arith.constant 8 : i32
    %330 = arith.muli %325, %c8_i32_119 : i32
    %331 = tpu.assume_multiple %330, 8 : i32
    %332 = arith.index_cast %331 : i32 to index
    %c0_120 = arith.constant 0 : index
    %333 = vector.load %arg10[%332, %c0_120] : memref<64x512xf32, #tpu.memory_space<vmem>>, vector<8x512xf32>
    %cst_121 = arith.constant dense<0.000000e+00> : vector<8x512xf32>
    %334 = tpu.matmul %328, %14, %cst_121 {dimension_numbers = #tpu.dot_dimension_numbers<[1], [0], [0], [1], [0, 0, 1, 1], [], []>} : vector<8x128xf32>, vector<128x512xf32>, vector<8x512xf32> -> vector<8x512xf32>
    %335 = arith.addf %333, %334 : vector<8x512xf32>
    %336 = vector.extract_strided_slice %335 {offsets = [0, 0], sizes = [8, 128], strides = [1, 1]} : vector<8x512xf32> to vector<8x128xf32>
    %337 = arith.negf %336 : vector<8x128xf32>
    %338 = math.exp %337 : vector<8x128xf32>
    %cst_122 = arith.constant 1.000000e+00 : f32
    %339 = vector.broadcast %cst_122 : f32 to vector<8x128xf32>
    %340 = arith.addf %339, %338 : vector<8x128xf32>
    %341 = arith.divf %339, %340 : vector<8x128xf32>
    %342 = vector.extract_strided_slice %335 {offsets = [0, 128], sizes = [8, 128], strides = [1, 1]} : vector<8x512xf32> to vector<8x128xf32>
    %343 = arith.negf %342 : vector<8x128xf32>
    %344 = math.exp %343 : vector<8x128xf32>
    %cst_123 = arith.constant 1.000000e+00 : f32
    %345 = vector.broadcast %cst_123 : f32 to vector<8x128xf32>
    %346 = arith.addf %345, %344 : vector<8x128xf32>
    %347 = arith.divf %345, %346 : vector<8x128xf32>
    %348 = vector.extract_strided_slice %335 {offsets = [0, 256], sizes = [8, 128], strides = [1, 1]} : vector<8x512xf32> to vector<8x128xf32>
    %349 = math.tanh %348 : vector<8x128xf32>
    %350 = vector.extract_strided_slice %335 {offsets = [0, 384], sizes = [8, 128], strides = [1, 1]} : vector<8x512xf32> to vector<8x128xf32>
    %351 = arith.negf %350 : vector<8x128xf32>
    %352 = math.exp %351 : vector<8x128xf32>
    %cst_124 = arith.constant 1.000000e+00 : f32
    %353 = vector.broadcast %cst_124 : f32 to vector<8x128xf32>
    %354 = arith.addf %353, %352 : vector<8x128xf32>
    %355 = arith.divf %353, %354 : vector<8x128xf32>
    %356 = arith.mulf %347, %329 : vector<8x128xf32>
    %357 = arith.mulf %341, %349 : vector<8x128xf32>
    %358 = arith.addf %356, %357 : vector<8x128xf32>
    %359 = math.tanh %358 : vector<8x128xf32>
    %360 = arith.mulf %355, %359 : vector<8x128xf32>
    %361 = vector.broadcast %327 : i32 to vector<8x1xi32>
    %362 = arith.cmpi slt, %361, %15 : vector<8x1xi32>
    %363 = arith.extui %362 : vector<8x1xi1> to vector<8x1xi32>
    %364 = arith.sitofp %363 : vector<8x1xi32> to vector<8x1xf32>
    %365 = arith.subf %358, %329 : vector<8x128xf32>
    %366 = vector.broadcast %364 : vector<8x1xf32> to vector<8x128xf32>
    %367 = arith.mulf %366, %365 : vector<8x128xf32>
    %368 = arith.addf %329, %367 : vector<8x128xf32>
    %c0_125 = arith.constant 0 : index
    %c0_126 = arith.constant 0 : index
    %369 = vector.load %arg9[%c0_125, %c0_126] : memref<8x128xf32, #tpu.memory_space<vmem>>, vector<8x128xf32>
    tpu.vector_store %arg9[%c0_125, %c0_126], %368 {strides = array<i32>} : memref<8x128xf32, #tpu.memory_space<vmem>>, vector<8x128xf32>,
    %370 = arith.subf %360, %328 : vector<8x128xf32>
    %371 = vector.broadcast %364 : vector<8x1xf32> to vector<8x128xf32>
    %372 = arith.mulf %371, %370 : vector<8x128xf32>
    %373 = arith.addf %328, %372 : vector<8x128xf32>
    %c0_127 = arith.constant 0 : index
    %c0_128 = arith.constant 0 : index
    %374 = vector.load %arg8[%c0_127, %c0_128] : memref<8x128xf32, #tpu.memory_space<vmem>>, vector<8x128xf32>
    tpu.vector_store %arg8[%c0_127, %c0_128], %373 {strides = array<i32>} : memref<8x128xf32, #tpu.memory_space<vmem>>, vector<8x128xf32>,
    %375 = vector.broadcast %364 : vector<8x1xf32> to vector<8x128xf32>
    %376 = arith.mulf %375, %360 : vector<8x128xf32>
    %377 = arith.index_cast %325 : i32 to index
    %c0_129 = arith.constant 0 : index
    %c0_130 = arith.constant 0 : index
    %378 = vector.load %arg7[%377, %c0_129, %c0_130] : memref<8x8x128xf32, #tpu.memory_space<vmem>>, vector<1x8x128xf32>
    %379 = vector.shape_cast %378 : vector<1x8x128xf32> to vector<8x128xf32>
    %380 = vector.shape_cast %376 : vector<8x128xf32> to vector<1x8x128xf32>
    tpu.vector_store %arg7[%377, %c0_129, %c0_130], %380 {strides = array<i32>} : memref<8x8x128xf32, #tpu.memory_space<vmem>>, vector<1x8x128xf32>,
    %c6_i32 = arith.constant 6 : i32
    %c1_i32_131 = arith.constant 1 : i32
    %381 = arith.subi %c1_i32_131, %arg0 : i32
    %382 = arith.muli %381, %c6_i32 : i32
    %c7_i32_132 = arith.constant 7 : i32
    %383 = arith.subi %c7_i32_132, %c6_i32 : i32
    %384 = arith.muli %arg0, %383 : i32
    %385 = arith.addi %382, %384 : i32
    %c8_i32_133 = arith.constant 8 : i32
    %386 = arith.muli %20, %c8_i32_133 : i32
    %387 = arith.addi %386, %385 : i32
    %c0_134 = arith.constant 0 : index
    %c0_135 = arith.constant 0 : index
    %388 = vector.load %arg8[%c0_134, %c0_135] : memref<8x128xf32, #tpu.memory_space<vmem>>, vector<8x128xf32>
    %c0_136 = arith.constant 0 : index
    %c0_137 = arith.constant 0 : index
    %389 = vector.load %arg9[%c0_136, %c0_137] : memref<8x128xf32, #tpu.memory_space<vmem>>, vector<8x128xf32>
    %c8_i32_138 = arith.constant 8 : i32
    %390 = arith.muli %385, %c8_i32_138 : i32
    %391 = tpu.assume_multiple %390, 8 : i32
    %392 = arith.index_cast %391 : i32 to index
    %c0_139 = arith.constant 0 : index
    %393 = vector.load %arg10[%392, %c0_139] : memref<64x512xf32, #tpu.memory_space<vmem>>, vector<8x512xf32>
    %cst_140 = arith.constant dense<0.000000e+00> : vector<8x512xf32>
    %394 = tpu.matmul %388, %14, %cst_140 {dimension_numbers = #tpu.dot_dimension_numbers<[1], [0], [0], [1], [0, 0, 1, 1], [], []>} : vector<8x128xf32>, vector<128x512xf32>, vector<8x512xf32> -> vector<8x512xf32>
    %395 = arith.addf %393, %394 : vector<8x512xf32>
    %396 = vector.extract_strided_slice %395 {offsets = [0, 0], sizes = [8, 128], strides = [1, 1]} : vector<8x512xf32> to vector<8x128xf32>
    %397 = arith.negf %396 : vector<8x128xf32>
    %398 = math.exp %397 : vector<8x128xf32>
    %cst_141 = arith.constant 1.000000e+00 : f32
    %399 = vector.broadcast %cst_141 : f32 to vector<8x128xf32>
    %400 = arith.addf %399, %398 : vector<8x128xf32>
    %401 = arith.divf %399, %400 : vector<8x128xf32>
    %402 = vector.extract_strided_slice %395 {offsets = [0, 128], sizes = [8, 128], strides = [1, 1]} : vector<8x512xf32> to vector<8x128xf32>
    %403 = arith.negf %402 : vector<8x128xf32>
    %404 = math.exp %403 : vector<8x128xf32>
    %cst_142 = arith.constant 1.000000e+00 : f32
    %405 = vector.broadcast %cst_142 : f32 to vector<8x128xf32>
    %406 = arith.addf %405, %404 : vector<8x128xf32>
    %407 = arith.divf %405, %406 : vector<8x128xf32>
    %408 = vector.extract_strided_slice %395 {offsets = [0, 256], sizes = [8, 128], strides = [1, 1]} : vector<8x512xf32> to vector<8x128xf32>
    %409 = math.tanh %408 : vector<8x128xf32>
    %410 = vector.extract_strided_slice %395 {offsets = [0, 384], sizes = [8, 128], strides = [1, 1]} : vector<8x512xf32> to vector<8x128xf32>
    %411 = arith.negf %410 : vector<8x128xf32>
    %412 = math.exp %411 : vector<8x128xf32>
    %cst_143 = arith.constant 1.000000e+00 : f32
    %413 = vector.broadcast %cst_143 : f32 to vector<8x128xf32>
    %414 = arith.addf %413, %412 : vector<8x128xf32>
    %415 = arith.divf %413, %414 : vector<8x128xf32>
    %416 = arith.mulf %407, %389 : vector<8x128xf32>
    %417 = arith.mulf %401, %409 : vector<8x128xf32>
    %418 = arith.addf %416, %417 : vector<8x128xf32>
    %419 = math.tanh %418 : vector<8x128xf32>
    %420 = arith.mulf %415, %419 : vector<8x128xf32>
    %421 = vector.broadcast %387 : i32 to vector<8x1xi32>
    %422 = arith.cmpi slt, %421, %15 : vector<8x1xi32>
    %423 = arith.extui %422 : vector<8x1xi1> to vector<8x1xi32>
    %424 = arith.sitofp %423 : vector<8x1xi32> to vector<8x1xf32>
    %425 = arith.subf %418, %389 : vector<8x128xf32>
    %426 = vector.broadcast %424 : vector<8x1xf32> to vector<8x128xf32>
    %427 = arith.mulf %426, %425 : vector<8x128xf32>
    %428 = arith.addf %389, %427 : vector<8x128xf32>
    %c0_144 = arith.constant 0 : index
    %c0_145 = arith.constant 0 : index
    %429 = vector.load %arg9[%c0_144, %c0_145] : memref<8x128xf32, #tpu.memory_space<vmem>>, vector<8x128xf32>
    tpu.vector_store %arg9[%c0_144, %c0_145], %428 {strides = array<i32>} : memref<8x128xf32, #tpu.memory_space<vmem>>, vector<8x128xf32>,
    %430 = arith.subf %420, %388 : vector<8x128xf32>
    %431 = vector.broadcast %424 : vector<8x1xf32> to vector<8x128xf32>
    %432 = arith.mulf %431, %430 : vector<8x128xf32>
    %433 = arith.addf %388, %432 : vector<8x128xf32>
    %c0_146 = arith.constant 0 : index
    %c0_147 = arith.constant 0 : index
    %434 = vector.load %arg8[%c0_146, %c0_147] : memref<8x128xf32, #tpu.memory_space<vmem>>, vector<8x128xf32>
    tpu.vector_store %arg8[%c0_146, %c0_147], %433 {strides = array<i32>} : memref<8x128xf32, #tpu.memory_space<vmem>>, vector<8x128xf32>,
    %435 = vector.broadcast %424 : vector<8x1xf32> to vector<8x128xf32>
    %436 = arith.mulf %435, %420 : vector<8x128xf32>
    %437 = arith.index_cast %385 : i32 to index
    %c0_148 = arith.constant 0 : index
    %c0_149 = arith.constant 0 : index
    %438 = vector.load %arg7[%437, %c0_148, %c0_149] : memref<8x8x128xf32, #tpu.memory_space<vmem>>, vector<1x8x128xf32>
    %439 = vector.shape_cast %438 : vector<1x8x128xf32> to vector<8x128xf32>
    %440 = vector.shape_cast %436 : vector<8x128xf32> to vector<1x8x128xf32>
    tpu.vector_store %arg7[%437, %c0_148, %c0_149], %440 {strides = array<i32>} : memref<8x8x128xf32, #tpu.memory_space<vmem>>, vector<1x8x128xf32>,
    %c7_i32_150 = arith.constant 7 : i32
    %c1_i32_151 = arith.constant 1 : i32
    %441 = arith.subi %c1_i32_151, %arg0 : i32
    %442 = arith.muli %441, %c7_i32_150 : i32
    %c7_i32_152 = arith.constant 7 : i32
    %443 = arith.subi %c7_i32_152, %c7_i32_150 : i32
    %444 = arith.muli %arg0, %443 : i32
    %445 = arith.addi %442, %444 : i32
    %c8_i32_153 = arith.constant 8 : i32
    %446 = arith.muli %20, %c8_i32_153 : i32
    %447 = arith.addi %446, %445 : i32
    %c0_154 = arith.constant 0 : index
    %c0_155 = arith.constant 0 : index
    %448 = vector.load %arg8[%c0_154, %c0_155] : memref<8x128xf32, #tpu.memory_space<vmem>>, vector<8x128xf32>
    %c0_156 = arith.constant 0 : index
    %c0_157 = arith.constant 0 : index
    %449 = vector.load %arg9[%c0_156, %c0_157] : memref<8x128xf32, #tpu.memory_space<vmem>>, vector<8x128xf32>
    %c8_i32_158 = arith.constant 8 : i32
    %450 = arith.muli %445, %c8_i32_158 : i32
    %451 = tpu.assume_multiple %450, 8 : i32
    %452 = arith.index_cast %451 : i32 to index
    %c0_159 = arith.constant 0 : index
    %453 = vector.load %arg10[%452, %c0_159] : memref<64x512xf32, #tpu.memory_space<vmem>>, vector<8x512xf32>
    %cst_160 = arith.constant dense<0.000000e+00> : vector<8x512xf32>
    %454 = tpu.matmul %448, %14, %cst_160 {dimension_numbers = #tpu.dot_dimension_numbers<[1], [0], [0], [1], [0, 0, 1, 1], [], []>} : vector<8x128xf32>, vector<128x512xf32>, vector<8x512xf32> -> vector<8x512xf32>
    %455 = arith.addf %453, %454 : vector<8x512xf32>
    %456 = vector.extract_strided_slice %455 {offsets = [0, 0], sizes = [8, 128], strides = [1, 1]} : vector<8x512xf32> to vector<8x128xf32>
    %457 = arith.negf %456 : vector<8x128xf32>
    %458 = math.exp %457 : vector<8x128xf32>
    %cst_161 = arith.constant 1.000000e+00 : f32
    %459 = vector.broadcast %cst_161 : f32 to vector<8x128xf32>
    %460 = arith.addf %459, %458 : vector<8x128xf32>
    %461 = arith.divf %459, %460 : vector<8x128xf32>
    %462 = vector.extract_strided_slice %455 {offsets = [0, 128], sizes = [8, 128], strides = [1, 1]} : vector<8x512xf32> to vector<8x128xf32>
    %463 = arith.negf %462 : vector<8x128xf32>
    %464 = math.exp %463 : vector<8x128xf32>
    %cst_162 = arith.constant 1.000000e+00 : f32
    %465 = vector.broadcast %cst_162 : f32 to vector<8x128xf32>
    %466 = arith.addf %465, %464 : vector<8x128xf32>
    %467 = arith.divf %465, %466 : vector<8x128xf32>
    %468 = vector.extract_strided_slice %455 {offsets = [0, 256], sizes = [8, 128], strides = [1, 1]} : vector<8x512xf32> to vector<8x128xf32>
    %469 = math.tanh %468 : vector<8x128xf32>
    %470 = vector.extract_strided_slice %455 {offsets = [0, 384], sizes = [8, 128], strides = [1, 1]} : vector<8x512xf32> to vector<8x128xf32>
    %471 = arith.negf %470 : vector<8x128xf32>
    %472 = math.exp %471 : vector<8x128xf32>
    %cst_163 = arith.constant 1.000000e+00 : f32
    %473 = vector.broadcast %cst_163 : f32 to vector<8x128xf32>
    %474 = arith.addf %473, %472 : vector<8x128xf32>
    %475 = arith.divf %473, %474 : vector<8x128xf32>
    %476 = arith.mulf %467, %449 : vector<8x128xf32>
    %477 = arith.mulf %461, %469 : vector<8x128xf32>
    %478 = arith.addf %476, %477 : vector<8x128xf32>
    %479 = math.tanh %478 : vector<8x128xf32>
    %480 = arith.mulf %475, %479 : vector<8x128xf32>
    %481 = vector.broadcast %447 : i32 to vector<8x1xi32>
    %482 = arith.cmpi slt, %481, %15 : vector<8x1xi32>
    %483 = arith.extui %482 : vector<8x1xi1> to vector<8x1xi32>
    %484 = arith.sitofp %483 : vector<8x1xi32> to vector<8x1xf32>
    %485 = arith.subf %478, %449 : vector<8x128xf32>
    %486 = vector.broadcast %484 : vector<8x1xf32> to vector<8x128xf32>
    %487 = arith.mulf %486, %485 : vector<8x128xf32>
    %488 = arith.addf %449, %487 : vector<8x128xf32>
    %c0_164 = arith.constant 0 : index
    %c0_165 = arith.constant 0 : index
    %489 = vector.load %arg9[%c0_164, %c0_165] : memref<8x128xf32, #tpu.memory_space<vmem>>, vector<8x128xf32>
    tpu.vector_store %arg9[%c0_164, %c0_165], %488 {strides = array<i32>} : memref<8x128xf32, #tpu.memory_space<vmem>>, vector<8x128xf32>,
    %490 = arith.subf %480, %448 : vector<8x128xf32>
    %491 = vector.broadcast %484 : vector<8x1xf32> to vector<8x128xf32>
    %492 = arith.mulf %491, %490 : vector<8x128xf32>
    %493 = arith.addf %448, %492 : vector<8x128xf32>
    %c0_166 = arith.constant 0 : index
    %c0_167 = arith.constant 0 : index
    %494 = vector.load %arg8[%c0_166, %c0_167] : memref<8x128xf32, #tpu.memory_space<vmem>>, vector<8x128xf32>
    tpu.vector_store %arg8[%c0_166, %c0_167], %493 {strides = array<i32>} : memref<8x128xf32, #tpu.memory_space<vmem>>, vector<8x128xf32>,
    %495 = vector.broadcast %484 : vector<8x1xf32> to vector<8x128xf32>
    %496 = arith.mulf %495, %480 : vector<8x128xf32>
    %497 = arith.index_cast %445 : i32 to index
    %c0_168 = arith.constant 0 : index
    %c0_169 = arith.constant 0 : index
    %498 = vector.load %arg7[%497, %c0_168, %c0_169] : memref<8x8x128xf32, #tpu.memory_space<vmem>>, vector<1x8x128xf32>
    %499 = vector.shape_cast %498 : vector<1x8x128xf32> to vector<8x128xf32>
    %500 = vector.shape_cast %496 : vector<8x128xf32> to vector<1x8x128xf32>
    tpu.vector_store %arg7[%497, %c0_168, %c0_169], %500 {strides = array<i32>} : memref<8x8x128xf32, #tpu.memory_space<vmem>>, vector<1x8x128xf32>,
    %c8_i32_170 = arith.constant 8 : i32
    return
  }
  func.func @transform_0(%arg0: i32, %arg1: i32) -> (i32, i32) {
    %c0_i32 = arith.constant 0 : i32
    %c0_i32_0 = arith.constant 0 : i32
    %c0_i32_1 = arith.constant 0 : i32
    return %c0_i32, %c0_i32_0 : i32, i32
  }
  func.func @transform_1(%arg0: i32, %arg1: i32) -> (i32, i32, i32) {
    %c1_i32 = arith.constant 1 : i32
    %0 = arith.subi %c1_i32, %arg0 : i32
    %1 = arith.muli %0, %arg1 : i32
    %c0_i32 = arith.constant 0 : i32
    %2 = arith.subi %c0_i32, %arg1 : i32
    %3 = arith.muli %arg0, %2 : i32
    %4 = arith.addi %1, %3 : i32
    %c0_i32_0 = arith.constant 0 : i32
    %c0_i32_1 = arith.constant 0 : i32
    %c0_i32_2 = arith.constant 0 : i32
    return %4, %c0_i32_0, %c0_i32_1 : i32, i32, i32
  }
  func.func @transform_2(%arg0: i32, %arg1: i32) -> (i32, i32, i32) {
    %c0_i32 = arith.constant 0 : i32
    %c0_i32_0 = arith.constant 0 : i32
    %c0_i32_1 = arith.constant 0 : i32
    return %arg0, %c0_i32, %c0_i32_0 : i32, i32, i32
  }
  func.func @transform_3(%arg0: i32, %arg1: i32) -> (i32, i32, i32) {
    %c0_i32 = arith.constant 0 : i32
    %c0_i32_0 = arith.constant 0 : i32
    %c0_i32_1 = arith.constant 0 : i32
    return %arg0, %c0_i32, %c0_i32_0 : i32, i32, i32
  }
  func.func @transform_4(%arg0: i32, %arg1: i32) -> (i32, i32, i32) {
    %c0_i32 = arith.constant 0 : i32
    %c0_i32_0 = arith.constant 0 : i32
    %c0_i32_1 = arith.constant 0 : i32
    return %arg0, %c0_i32, %c0_i32_0 : i32, i32, i32
  }
  func.func @transform_5(%arg0: i32, %arg1: i32) -> (i32, i32, i32) {
    %c1_i32 = arith.constant 1 : i32
    %0 = arith.subi %c1_i32, %arg0 : i32
    %1 = arith.muli %0, %arg1 : i32
    %c0_i32 = arith.constant 0 : i32
    %2 = arith.subi %c0_i32, %arg1 : i32
    %3 = arith.muli %arg0, %2 : i32
    %4 = arith.addi %1, %3 : i32
    %c0_i32_0 = arith.constant 0 : i32
    %c0_i32_1 = arith.constant 0 : i32
    return %4, %c0_i32_0, %arg0 : i32, i32, i32
  }
}

module attributes {stable_mosaic.version = 11 : i64} {
  func.func @_fc_kernel(%arg0: i32, %arg1: i32, %arg2: memref<64x256xf32, #tpu.memory_space<vmem>>, %arg3: memref<256x128xf32, #tpu.memory_space<vmem>>, %arg4: memref<1x128xf32, #tpu.memory_space<vmem>>, %arg5: memref<64x128xf32, #tpu.memory_space<vmem>>) attributes {dimension_semantics = [#tpu.dimension_semantics<parallel>, #tpu.dimension_semantics<parallel>], iteration_bounds = array<i64: 1, 1>, scalar_prefetch = 0 : i64, scratch_operands = 0 : i64, tpu.core_type = #tpu.core_type<tc>, window_params = [{transform_indices = @transform_0, window_bounds = array<i64: 64, 256>}, {transform_indices = @transform_1, window_bounds = array<i64: 256, 128>}, {transform_indices = @transform_2, window_bounds = array<i64: 1, 128>}, {transform_indices = @transform_3, window_bounds = array<i64: 64, 128>}]} {
    %c0 = arith.constant 0 : index
    %c0_0 = arith.constant 0 : index
    %0 = vector.load %arg2[%c0, %c0_0] : memref<64x256xf32, #tpu.memory_space<vmem>>, vector<64x256xf32>
    %c0_1 = arith.constant 0 : index
    %c0_2 = arith.constant 0 : index
    %1 = vector.load %arg3[%c0_1, %c0_2] : memref<256x128xf32, #tpu.memory_space<vmem>>, vector<256x128xf32>
    %cst = arith.constant dense<0.000000e+00> : vector<64x128xf32>
    %2 = tpu.matmul %0, %1, %cst {dimension_numbers = #tpu.dot_dimension_numbers<[1], [0], [0], [1], [0, 0, 1, 1], [], []>} : vector<64x256xf32>, vector<256x128xf32>, vector<64x128xf32> -> vector<64x128xf32>
    %c0_3 = arith.constant 0 : index
    %c0_4 = arith.constant 0 : index
    %3 = vector.load %arg4[%c0_3, %c0_4] : memref<1x128xf32, #tpu.memory_space<vmem>>, vector<1x128xf32>
    %4 = vector.broadcast %3 : vector<1x128xf32> to vector<64x128xf32>
    %5 = arith.addf %2, %4 : vector<64x128xf32>
    %c0_5 = arith.constant 0 : index
    %c0_6 = arith.constant 0 : index
    %6 = vector.load %arg5[%c0_5, %c0_6] : memref<64x128xf32, #tpu.memory_space<vmem>>, vector<64x128xf32>
    tpu.vector_store %arg5[%c0_5, %c0_6], %5 {strides = array<i32>} : memref<64x128xf32, #tpu.memory_space<vmem>>, vector<64x128xf32>,
    return
  }
  func.func @transform_0(%arg0: i32, %arg1: i32) -> (i32, i32) {
    %c0_i32 = arith.constant 0 : i32
    %c0_i32_0 = arith.constant 0 : i32
    return %arg0, %c0_i32 : i32, i32
  }
  func.func @transform_1(%arg0: i32, %arg1: i32) -> (i32, i32) {
    %c0_i32 = arith.constant 0 : i32
    %c0_i32_0 = arith.constant 0 : i32
    return %c0_i32, %arg1 : i32, i32
  }
  func.func @transform_2(%arg0: i32, %arg1: i32) -> (i32, i32) {
    %c0_i32 = arith.constant 0 : i32
    %c0_i32_0 = arith.constant 0 : i32
    return %c0_i32, %arg1 : i32, i32
  }
  func.func @transform_3(%arg0: i32, %arg1: i32) -> (i32, i32) {
    %c0_i32 = arith.constant 0 : i32
    return %arg0, %arg1 : i32, i32
  }
}

</mosaic_0001>

<bundles_post_ra>
// kernel: large_word_rnn_forward.9
= control target key start
LH: loop header
LB: loop body
LE: loop exit
PB: predicated region body
PF: predicated region fallthrough
CT: control target
= control target key end

     0   :  { %s482_s1 = inlined_call_operand.vmem [shape: f32[256,128], index: 1, kind: input, shape index: {}]   ;;  %s483_s0 = inlined_call_operand.vmem [shape: f32[64,256], index: 0, kind: input, shape index: {}]   ;;  %s484_s2 = inlined_call_operand.vmem [shape: f32[1,128], index: 2, kind: input, shape index: {}]   ;;  %s485_s3 = inlined_call_operand.vmem [shape: f32[64,128], index: 3, kind: output, shape index: {}]  }
   0x1   :  { %v46_v0 = vld [vmem:[%s482_s1 + $0x80] sm:$0xff]  ;;  %v47_v1 = vld [vmem:[%s482_s1 + $0x88] sm:$0xff]  ;;  %v48_v5 = vld [vmem:[%s482_s1 + $0x90] sm:$0xff] }
   0x2   :  { %v30_v2 = vld [vmem:[%s482_s1] sm:$0xff]  ;;  %v243_v3 = vpack.c.bf16 %v47_v1, %v46_v0  ;;  %v31_v4 = vld [vmem:[%s482_s1 + $0x8] sm:$0xff]  ;;  %v49_v6 = vld [vmem:[%s482_s1 + $0x98] sm:$0xff] }
   0x3   :  { %v245_v7 = vpack.c.bf16 %v31_v4, %v30_v2  ;;  %v247_v8 = vpack.c.bf16 %v49_v6, %v48_v5  ;;  %v32_v9 = vld [vmem:[%s482_s1 + $0x10] sm:$0xff]  ;;  %v33_v10 = vld [vmem:[%s482_s1 + $0x18] sm:$0xff]  ;;  %v50_v11 = vld [vmem:[%s482_s1 + $0xa0] sm:$0xff] }
   0x4   :  { %244 = vmatprep.subr.bf16.mxu0 %v243_v3  ;;  %275 = vmatprep.subr.bf16.mxu1 %v243_v3  ;;  %v51_v12 = vld [vmem:[%s482_s1 + $0xa8] sm:$0xff]  ;;  %v249_v13 = vpack.c.bf16 %v33_v10, %v32_v9  ;;  %v34_v15 = vld [vmem:[%s482_s1 + $0x20] sm:$0xff]  ;;  %v52_v17 = vld [vmem:[%s482_s1 + $0xb0] sm:$0xff] }
   0x5   :  { %246 = vmatpush3.bf16.msra.mxu0 %v245_v7  ;;  %283 = vmatpush3.bf16.msra.mxu1 %v245_v7  ;;  %v251_v14 = vpack.c.bf16 %v51_v12, %v50_v11  ;;  %v35_v16 = vld [vmem:[%s482_s1 + $0x28] sm:$0xff]  ;;  %v53_v18 = vld [vmem:[%s482_s1 + $0xb8] sm:$0xff]  ;;  %v36_v21 = vld [vmem:[%s482_s1 + $0x30] sm:$0xff] }
   0x6   :  { %248 = vmatprep.subr.bf16.mxu0 %v247_v8  ;;  %276 = vmatprep.subr.bf16.mxu1 %v247_v8  ;;  %v253_v19 = vpack.c.bf16 %v35_v16, %v34_v15  ;;  %v255_v20 = vpack.c.bf16 %v53_v18, %v52_v17  ;;  %v37_v22 = vld [vmem:[%s482_s1 + $0x38] sm:$0xff]  ;;  %v54_v23 = vld [vmem:[%s482_s1 + $0xc0] sm:$0xff]  ;;  %v55_v24 = vld [vmem:[%s482_s1 + $0xc8] sm:$0xff] }
   0x7   :  { %v15_v25 = vld [vmem:[%s483_s0 + $0x8] sm:$0xff]  ;;  %v257_v27 = vpack.c.bf16 %v37_v22, %v36_v21  ;;  %v259_v28 = vpack.c.bf16 %v55_v24, %v54_v23  ;;  %v38_v29 = vld [vmem:[%s482_s1 + $0x40] sm:$0xff]  ;;  %v56_v31 = vld [vmem:[%s482_s1 + $0xd0] sm:$0xff] }
   0x8   :  { %133 = vmatprep.mubr.f32.mxu0 %v15_v25  ;;  %v23_v26 = vld [vmem:[%s483_s0 + $0x48] sm:$0xff]  ;;  %v57_v32 = vld [vmem:[%s482_s1 + $0xd8] sm:$0xff]  ;;  %v40_v35 = vld [vmem:[%s482_s1 + $0x50] sm:$0xff] }
   0x9   :  { %250 = vmatpush3.bf16.msra.mxu0 %v249_v13  ;;  %284 = vmatpush3.bf16.msra.mxu1 %v249_v13  ;;  %v39_v30 = vld [vmem:[%s482_s1 + $0x48] sm:$0xff]  ;;  %v263_v34 = vpack.c.bf16 %v57_v32, %v56_v31  ;;  %v41_v36 = vld [vmem:[%s482_s1 + $0x58] sm:$0xff]  ;;  %v58_v37 = vld [vmem:[%s482_s1 + $0xe0] sm:$0xff] }
   0xa   :  { %252 = vmatprep.subr.bf16.mxu0 %v251_v14  ;;  %277 = vmatprep.subr.bf16.mxu1 %v251_v14  ;;  %v261_v33 = vpack.c.bf16 %v39_v30, %v38_v29  ;;  %v59_v38 = vld [vmem:[%s482_s1 + $0xe8] sm:$0xff]  ;;  %v265_v39 = vpack.c.bf16 %v41_v36, %v40_v35  ;;  %v42_v41 = vld [vmem:[%s482_s1 + $0x60] sm:$0xff]  ;;  %v60_v43 = vld [vmem:[%s482_s1 + $0xf0] sm:$0xff] }
   0xb   :  { %153 = vmatprep.mubr.f32.mxu1 %v23_v26  ;;  %v267_v40 = vpack.c.bf16 %v59_v38, %v58_v37  ;;  %v43_v42 = vld [vmem:[%s482_s1 + $0x68] sm:$0xff]  ;;  %v61_v44 = vld [vmem:[%s482_s1 + $0xf8] sm:$0xff]  ;;  %v44_v47 = vld [vmem:[%s482_s1 + $0x70] sm:$0xff] }
   0xc   :  { %v269_v45 = vpack.c.bf16 %v43_v42, %v42_v41  ;;  %v271_v46 = vpack.c.bf16 %v61_v44, %v60_v43  ;;  %v45_v48 = vld [vmem:[%s482_s1 + $0x78] sm:$0xff]  ;;  %v14_v50 = vld [vmem:[%s483_s0] sm:$0xff]  ;;  %v16_v54 = vld [vmem:[%s483_s0 + $0x10] sm:$0xff] }
   0xd   :  { %254 = vmatpush3.bf16.msra.mxu0 %v253_v19  ;;  %285 = vmatpush3.bf16.msra.mxu1 %v253_v19  ;;  %v273_v49 = vpack.c.bf16 %v45_v48, %v44_v47  ;;  %v22_v51 = vld [vmem:[%s483_s0 + $0x40] sm:$0xff]  ;;  %v17_v52 = vld [vmem:[%s483_s0 + $0x18] sm:$0xff]  ;;  %v24_v55 = vld [vmem:[%s483_s0 + $0x50] sm:$0xff] }
   0xe   :  { %256 = vmatprep.subr.bf16.mxu0 %v255_v20  ;;  %278 = vmatprep.subr.bf16.mxu1 %v255_v20  ;;  %v25_v53 = vld [vmem:[%s483_s0 + $0x58] sm:$0xff]  ;;  %v19_v56 = vld [vmem:[%s483_s0 + $0x28] sm:$0xff]  ;;  %v18_v58 = vld [vmem:[%s483_s0 + $0x20] sm:$0xff] }
   0xf   :  { %v27_v57 = vld [vmem:[%s483_s0 + $0x68] sm:$0xff]  ;;  %v26_v59 = vld [vmem:[%s483_s0 + $0x60] sm:$0xff]  ;;  %v21_v60 = vld [vmem:[%s483_s0 + $0x38] sm:$0xff] }
  0x10   :  { %v29_v61 = vld [vmem:[%s483_s0 + $0x78] sm:$0xff]  ;;  %v20_v62 = vld [vmem:[%s483_s0 + $0x30] sm:$0xff]  ;;  %v186_v2 = vld [vmem:[%s484_s2] ss:$0 sm:$0xff] }
  0x11   :  { %258 = vmatpush3.bf16.msra.mxu0 %v257_v27  ;;  %286 = vmatpush3.bf16.msra.mxu1 %v257_v27  ;;  %v28_v63 = vld [vmem:[%s483_s0 + $0x70] sm:$0xff] }
  0x12   :  { %260 = vmatprep.subr.bf16.mxu0 %v259_v28  ;;  %279 = vmatprep.subr.bf16.mxu1 %v259_v28 }
  0x15   :  { %262 = vmatpush3.bf16.msra.mxu0 %v261_v33  ;;  %287 = vmatpush3.bf16.msra.mxu1 %v261_v33 }
  0x16   :  { %264 = vmatprep.subr.bf16.mxu0 %v263_v34  ;;  %280 = vmatprep.subr.bf16.mxu1 %v263_v34 }
  0x19   :  { %266 = vmatpush3.bf16.msra.mxu0 %v265_v39  ;;  %288 = vmatpush3.bf16.msra.mxu1 %v265_v39 }
  0x1a   :  { %268 = vmatprep.subr.bf16.mxu0 %v267_v40  ;;  %281 = vmatprep.subr.bf16.mxu1 %v267_v40 }
  0x1d   :  { %270 = vmatpush3.bf16.msra.mxu0 %v269_v45  ;;  %289 = vmatpush3.bf16.msra.mxu1 %v269_v45 }
  0x1e   :  { %272 = vmatprep.subr.bf16.mxu0 %v271_v46  ;;  %282 = vmatprep.subr.bf16.mxu1 %v271_v46 }
  0x21   :  { %274 = vmatpush3.bf16.msra.mxu0 %v273_v49  ;;  %290 = vmatpush3.bf16.msra.mxu1 %v273_v49 }
  0x24   :  { %134 = vmatmul.mubr.f32.vlgmr.msra.gmra.mrb[0].mxu0 %v14_v50  ;;  %154 = vmatmul.mubr.f32.vlgmr.msra.gmra.mrb[0].mxu1 %v22_v51 }
  0x25   :  { %138 = vmatprep.mubr.f32.mxu0 %v17_v52  ;;  %158 = vmatprep.mubr.f32.mxu1 %v25_v53 }
  0x28   :  { %139 = vmatmul.mubr.f32.gmra.mrb[2].mxu0 %v16_v54  ;;  %159 = vmatmul.mubr.f32.gmra.mrb[2].mxu1 %v24_v55 }
  0x29   :  { %143 = vmatprep.mubr.f32.mxu0 %v19_v56  ;;  %163 = vmatprep.mubr.f32.mxu1 %v27_v57 }
  0x2c   :  { %144 = vmatmul.mubr.f32.gmra.mrb[4].mxu0 %v18_v58  ;;  %164 = vmatmul.mubr.f32.gmra.mrb[4].mxu1 %v26_v59 }
  0x2d   :  { %148 = vmatprep.mubr.f32.mxu0 %v21_v60  ;;  %168 = vmatprep.mubr.f32.mxu1 %v29_v61 }
  0x30   :  { %149 = vmatmul.mubr.f32.gmra.mrb[6].mxu0 %v20_v62  ;;  %169 = vmatmul.mubr.f32.gmra.mrb[6].mxu1 %v28_v63 }
  0xf7   :  { %v219_v0 = vpop.f32.mrb[0].mxu0  ;;  %v231_v1 = vpop.f32.mrb[0].mxu1 }
  0xf8   :  { %v220_v3 = vpop.f32.mrb[1].mxu0  ;;  %v232_v4 = vpop.f32.mrb[1].mxu1 }
  0xf9   :  { %v221_v5 = vadd.f32 %v220_v3, %v219_v0  ;;  %v233_v6 = vadd.f32 %v232_v4, %v231_v1 }
  0xfb   :  { %v136_v7 = vadd.f32 %v221_v5, %v186_v2  ;;  %v156_v8 = vadd.f32 %v233_v6, %v186_v2  ;;  %v222_v9 = vpop.f32.mrb[2].mxu0  ;;  %v234_v10 = vpop.f32.mrb[2].mxu1 }
  0xfc   :  { %v223_v11 = vpop.f32.mrb[3].mxu0  ;;  %v235_v12 = vpop.f32.mrb[3].mxu1 }
  0xfd   :  { %174 = vst [vmem:[%s485_s3] sm:$0xff] %v136_v7  ;;  %178 = vst [vmem:[%s485_s3 + $0x20] sm:$0xff] %v156_v8  ;;  %v224_v13 = vadd.f32 %v223_v11, %v222_v9  ;;  %v236_v14 = vadd.f32 %v235_v12, %v234_v10 }
  0xff   :  { %v141_v15 = vadd.f32 %v224_v13, %v186_v2  ;;  %v161_v16 = vadd.f32 %v236_v14, %v186_v2  ;;  %v225_v17 = vpop.f32.mrb[4].mxu0  ;;  %v237_v18 = vpop.f32.mrb[4].mxu1 }
 0x100   :  { %v226_v19 = vpop.f32.mrb[5].mxu0  ;;  %v238_v20 = vpop.f32.mrb[5].mxu1 }
 0x101   :  { %175 = vst [vmem:[%s485_s3 + $0x8] sm:$0xff] %v141_v15  ;;  %179 = vst [vmem:[%s485_s3 + $0x28] sm:$0xff] %v161_v16  ;;  %v227_v21 = vadd.f32 %v226_v19, %v225_v17  ;;  %v239_v22 = vadd.f32 %v238_v20, %v237_v18 }
 0x103   :  { %v146_v23 = vadd.f32 %v227_v21, %v186_v2  ;;  %v166_v24 = vadd.f32 %v239_v22, %v186_v2  ;;  %v228_v25 = vpop.f32.mrb[6].mxu0  ;;  %v240_v26 = vpop.f32.mrb[6].mxu1 }
 0x104   :  { %v229_v27 = vpop.f32.mrb[7].mxu0  ;;  %v241_v28 = vpop.f32.mrb[7].mxu1 }
 0x105   :  { %176 = vst [vmem:[%s485_s3 + $0x10] sm:$0xff] %v146_v23  ;;  %180 = vst [vmem:[%s485_s3 + $0x30] sm:$0xff] %v166_v24  ;;  %v230_v29 = vadd.f32 %v229_v27, %v228_v25  ;;  %v242_v30 = vadd.f32 %v241_v28, %v240_v26 }
 0x107   :  { %v151_v31 = vadd.f32 %v230_v29, %v186_v2  ;;  %v171_v32 = vadd.f32 %v242_v30, %v186_v2 }
 0x109   :  { %177 = vst [vmem:[%s485_s3 + $0x18] sm:$0xff] %v151_v31  ;;  %181 = vst [vmem:[%s485_s3 + $0x38] sm:$0xff] %v171_v32 }

// kernel: large_word_rnn_forward.5
= control target key start
LH: loop header
LB: loop body
LE: loop exit
PB: predicated region body
PF: predicated region fallthrough
CT: control target
= control target key end

     0   :  { %s3474_s18 = smov 0   ;;  %s3476_s19 = smov 0   ;;  %s4239_s0 = inlined_call_operand.vmem [shape: s32[8,1], index: 0, kind: input, shape index: {}]   ;;  %s4240_s1 = inlined_call_operand.vmem [shape: f32[8,8,16], index: 1, kind: input, shape index: {}]   ;;  %s4241_s2 = inlined_call_operand.vmem [shape: f32[2,16,512], index: 2, kind: input, shape index: {}]   ;;  %s4242_s3 = inlined_call_operand.vmem [shape: f32[2,128,512], index: 3, kind: input, shape index: {}]   ;;  %s4243_s4 = inlined_call_operand.vmem [shape: f32[2,1,512], index: 4, kind: input, shape index: {}]   ;;  %s4244_s5 = inlined_call_operand.vmem [shape: f32[8,8,256], index: 5, kind: output, shape index: {}]  }
   0x1   :  { %s3478_s20 = smov 0   ;;  %s3480_s21 = smov 0  }
   0x2   :  { %s3482_s22 = smov 0  }
   0x3 LB: > { %s2608_s23 = sadd.s32 4294967295, %s3440_s22   ;;  %s27_s24 = sadd.s32 1, %s3436_s21  ;;  %s3440_s22 = sphi %s3482_s22, %s15_s22   ;;  %s3436_s21 = sphi %s3480_s21, %s4249_s21   ;;  %s3432_s20 = sphi %s3478_s20, %s4248_s20   ;;  %s3428_s19 = sphi %s3476_s19, %s4247_s19   ;;  %s3424_s18 = sphi %s3474_s18, %s4246_s18  }
   0x4   : > { %p29_p0 = scmp.ge.s32.totalorder %s27_s24, 2  ;;  %s181_s25 = sadd.s32 1, %s3428_s19 }
   0x5   : > { %p191_p1 = scmp.ne.s32.totalorder %s3428_s19, %s3424_s18  ;;  %p192_p2 = scmp.eq.s32.totalorder %s2608_s23, 1 }
   0x6   : > { %s4251_s24 = smov (%p29_p0, %s27_s24), 0  ;;  %p2613_p4 = scmp.ge.s32.totalorder %s3440_s22, 1 }
   0x7   : > { %p3506_p3 = por %p192_p2, %p191_p1  ;;  %s177_s27 = ssub.s32 %s3436_s21, %s4251_s24 }
   0x8   : > { %p261_p5 = scmp.lt.s32.totalorder %s3440_s22, 3  ;;  %p179_p6 = scmp.eq.s32.totalorder %s177_s27, 0 }
   0xa   : > { %p262_p7 = pnand %p2613_p4, %p261_p5 }
   0xb   : > { %s3515_s28 = scalar_select %p179_p6, %s3428_s19, %s181_s25  }
   0xc   : > { %265 = sbr.rel (%p262_p7) target bundleno = 2188 (0x88c), region = 40  ;;  %p323_p8 = scmp.lt.s32.totalorder (!%p262_p7), %s3432_s20, 1  ;;  %v3442_v0 = vmov (!%p262_p7), 0.0   ;;  %v3443_v1 = vmov (!%p262_p7), 0   ;;  %v3527_v2 = vld [vmem:[%s4239_s0] sm:$0xff] (!%p262_p7)  ;;  %vm387_vm2 = vcmask (!%p262_p7), 130048  }
   0xd   : > { %476 = vmatprep.mubr.f32.mxu0 (!%p262_p7), %v3442_v0  ;;  %589 = vmatprep.mubr.f32.mxu1 (!%p262_p7), %v3442_v0  ;;  %s740_s29 = smul.u32 (!%p262_p7), 7, %s3432_s20  ;;  %s3530_s8 = ssub.s32 (!%p262_p7), 1, %s3432_s20  ;;  %v349_v17 = vld [vmem:[%s4240_s1] sm:$0xff] (!%p262_p7)  ;;  %v350_v32 = vld [vmem:[%s4240_s1 + $0x8] sm:$0xff] (!%p262_p7)  ;;  %v351_v57 = vld [vmem:[%s4240_s1 + $0x10] sm:$0xff] (!%p262_p7) }
   0xe   : > { %3272 = vset.pattern.permute.xlu0 (!%p262_p7), %v3443_v1  ;;  %3273 = vset.pattern.permute.xlu1 (!%p262_p7), %v3443_v1  ;;  %s946_s9 = smul.u32 (!%p262_p7), 6, %s3432_s20  ;;  %s2666_s15 = sshll.u32 (!%p262_p7), %s3530_s8, 2 }
   0xf   : > { %v925_v3 = vstv (!%p262_p7), %s740_s29  ;;  %s1975_s29 = smul.u32 (!%p262_p7), 6, %s3530_s8  ;;  %s2658_s12 = sshll.u32 (!%p262_p7), %s3432_s20, 2 }
  0x10   : > { %vm926_vm0 = vcmp.lt.s32.totalorder (!%p262_p7), %v925_v3, %v3527_v2  ;;  %s3546_s23 = sadd.s32 (!%p262_p7), %s946_s9, %s3530_s8  ;;  %s1769_s13 = smul.u32 (!%p262_p7), 5, %s3530_s8 }
  0x11   : > { %v2641_v4 = vsel (!%p262_p7), %vm926_vm0, 1.0, %v3442_v0  ;;  %v1131_v12 = vstv (!%p262_p7), %s3546_s23  ;;  %s3748_s9 = sadd.s32 (!%p262_p7), %s3432_s20, %s1975_s29  ;;  %s304_s29 = sand.u32 (!%p262_p7), 1, %s3424_s18  }
  0x12   : > { %932 = vperm.xlu0 (!%p262_p7), %3272, %v2641_v4   ;;  %vm1132_vm1 = vcmp.lt.s32.totalorder (!%p262_p7), %v1131_v12, %v3527_v2  ;;  %s2614_s6 = sshll.u32 (!%p262_p7), %s304_s29, 6  ;;  %s1152_s18 = smul.u32 (!%p262_p7), 5, %s3432_s20 }
  0x13   : > { %s3522_s30 = scalar_select %p323_p8, %s3432_s20, 1  ;;  %v2649_v22 = vsel %vm1132_vm1, 1.0, %v3442_v0 }
  0x14   : > { %s3872_s7 = scalar_lea.vmem [#allocation5], %s2614_s6  ;;  %s2643_s29 = sshll.u32 %s3546_s23, 3 }
  0x15   : > { %s2700_s10 = sshll.u32 %s3522_s30, 6  ;;  %s2701_s11 = sshll.u32 %s3522_s30, 9 }
  0x16   : > { %s327_s14 = scalar_lea.vmem %s4241_s2, %s2700_s10  ;;  %s3543_s17 = scalar_lea.vmem %s4242_s3, %s2701_s11  ;;  %1138 = vperm.xlu0 %3272, %v2649_v22  }
  0x17   : > { %v358_v5 = vld [vmem:[%s327_s14 + $0x8] sm:$0xff]  ;;  %v360_v7 = vld [vmem:[%s327_s14 + $0x18] sm:$0xff]  ;;  %v357_v10 = vld [vmem:[%s327_s14] sm:$0xff]  ;;  %s1357_s11 = smul.u32 3, %s3530_s8  ;;  %s952_s6 = sshra.s32 %s2643_s29, 3 }
  0x18   : > { %v362_v6 = vld [vmem:[%s327_s14 + $0x28] sm:$0xff]  ;;  %v364_v9 = vld [vmem:[%s327_s14 + $0x38] sm:$0xff]  ;;  %v361_v11 = vld [vmem:[%s327_s14 + $0x20] sm:$0xff] }
  0x19   : > { %v2710_v8 = vpack.c.bf16 %v362_v6, %v358_v5  ;;  %v2714_v13 = vpack.c.bf16 %v364_v9, %v360_v7  ;;  %v2712_v14 = vpack.c.bf16 %v361_v11, %v357_v10  ;;  %v359_v15 = vld [vmem:[%s327_s14 + $0x10] sm:$0xff]  ;;  %v671_v19 = vld [vmem:[%s3543_s17 + $0x8] sm:$0xff]  ;;  %v670_v21 = vld [vmem:[%s3543_s17] sm:$0xff] }
  0x1a   : > { %v363_v16 = vld [vmem:[%s327_s14 + $0x30] sm:$0xff]  ;;  %v675_v20 = vld [vmem:[%s3543_s17 + $0x28] sm:$0xff]  ;;  %v674_v24 = vld [vmem:[%s3543_s17 + $0x20] sm:$0xff]  ;;  %s1564_s14 = smul.u32 3, %s3432_s20 }
  0x1b   : > { %2711 = vmatprep.subr.bf16.mxu0 %v2710_v8  ;;  %v2716_v18 = vpack.c.bf16 %v363_v16, %v359_v15  ;;  %2715 = vmatprep.subr.bf16.mxu1 %v2714_v13  ;;  %v3557_v23 = vpack.c.bf16 %v675_v20, %v671_v19  ;;  %v673_v25 = vld [vmem:[%s3543_s17 + $0x18] sm:$0xff]  ;;  %v3562_v27 = vpack.c.bf16 %v674_v24, %v670_v21  ;;  %v672_v29 = vld [vmem:[%s3543_s17 + $0x10] sm:$0xff]  ;;  %v679_v31 = vld [vmem:[%s3543_s17 + $0x48] sm:$0xff] }
  0x1c   : > { %2713 = vmatpush1.bf16.msra.mxu0 %v2712_v14  ;;  %v677_v26 = vld [vmem:[%s3543_s17 + $0x38] sm:$0xff]  ;;  %v676_v30 = vld [vmem:[%s3543_s17 + $0x30] sm:$0xff]  ;;  %v683_v34 = vld [vmem:[%s3543_s17 + $0x68] sm:$0xff]  ;;  %s3717_s27 = sadd.s32 %s2666_s15, %s1564_s14 }
  0x1d   : > { %2717 = vmatpush1.bf16.msra.mxu1 %v2716_v18  ;;  %v3564_v28 = vpack.c.bf16 %v677_v26, %v673_v25  ;;  %2719 = vmatprep.subr.bf16.mxu0 %v3557_v23  ;;  %v3573_v33 = vpack.c.bf16 %v676_v30, %v672_v29  ;;  %v678_v35 = vld [vmem:[%s3543_s17 + $0x40] sm:$0xff]  ;;  %v3580_v37 = vpack.c.bf16 %v683_v34, %v679_v31  ;;  %v681_v38 = vld [vmem:[%s3543_s17 + $0x58] sm:$0xff]  ;;  %v680_v40 = vld [vmem:[%s3543_s17 + $0x50] sm:$0xff] }
  0x1e   : > { %v682_v36 = vld [vmem:[%s3543_s17 + $0x60] sm:$0xff]  ;;  %v685_v39 = vld [vmem:[%s3543_s17 + $0x78] sm:$0xff]  ;;  %v684_v42 = vld [vmem:[%s3543_s17 + $0x70] sm:$0xff] }
  0x1f   : > { %2620 = vmatmul.mubr.msk.f32.vlgmr.msra.gmra.mrb[0].mxu0 %vm387_vm2, %v349_v17  ;;  %2751 = vmatprep.subr.bf16.mxu1 %v3564_v28  ;;  %v3587_v41 = vpack.c.bf16 %v685_v39, %v681_v38  ;;  %v687_v43 = vld [vmem:[%s3543_s17 + $0x88] sm:$0xff]  ;;  %v3594_v45 = vpack.c.bf16 %v682_v36, %v678_v35  ;;  %v686_v46 = vld [vmem:[%s3543_s17 + $0x80] sm:$0xff]  ;;  %v689_v47 = vld [vmem:[%s3543_s17 + $0x98] sm:$0xff]  ;;  %v3600_v48 = vpack.c.bf16 %v684_v42, %v680_v40 }
  0x20   : > { %2628 = vmatmul.mubr.msk.f32.vlgmr.msra.gmra.mrb[0].mxu1 %vm387_vm2, %v349_v17  ;;  %482 = vmatprep.mubr.f32.mxu0 %v3442_v0  ;;  %v691_v44 = vld [vmem:[%s3543_s17 + $0xa8] sm:$0xff]  ;;  %v690_v50 = vld [vmem:[%s3543_s17 + $0xa0] sm:$0xff]  ;;  %v693_v51 = vld [vmem:[%s3543_s17 + $0xb8] sm:$0xff] }
  0x21   : > { %595 = vmatprep.mubr.f32.mxu1 %v3442_v0  ;;  %2721 = vmatpush1.bf16.msra.mxu0 %v3562_v27  ;;  %v3602_v49 = vpack.c.bf16 %v691_v44, %v687_v43  ;;  %v688_v52 = vld [vmem:[%s3543_s17 + $0x90] sm:$0xff]  ;;  %v3609_v53 = vpack.c.bf16 %v693_v51, %v689_v47  ;;  %v695_v55 = vld [vmem:[%s3543_s17 + $0xc8] sm:$0xff]  ;;  %v697_v58 = vld [vmem:[%s3543_s17 + $0xd8] sm:$0xff]  ;;  %v3623_v60 = vpack.c.bf16 %v690_v50, %v686_v46 }
  0x22   : > { %2753 = vmatpush1.bf16.msra.mxu1 %v3573_v33  ;;  %2723 = vmatprep.subr.bf16.mxu0 %v3580_v37  ;;  %v692_v54 = vld [vmem:[%s3543_s17 + $0xb0] sm:$0xff]  ;;  %v699_v56 = vld [vmem:[%s3543_s17 + $0xe8] sm:$0xff]  ;;  %v701_v59 = vld [vmem:[%s3543_s17 + $0xf8] sm:$0xff] }
  0x23   : > { %2621 = vmatmul.mubr.msk.f32.gmra.mrb[2].mxu0 %vm387_vm2, %v350_v32  ;;  %2755 = vmatprep.subr.bf16.mxu1 %v3587_v41  ;;  %v3627_v61 = vpack.c.bf16 %v692_v54, %v688_v52  ;;  %v3629_v62 = vpack.c.bf16 %v699_v56, %v695_v55  ;;  %v694_v63 = vld [vmem:[%s3543_s17 + $0xc0] sm:$0xff]  ;;  %v696_v3 = vld [vmem:[%s3543_s17 + $0xd0] sm:$0xff]  ;;  %v3636_v4 = vpack.c.bf16 %v701_v59, %v697_v58  ;;  %v703_v6 = vld [vmem:[%s3543_s17 + $0x108] sm:$0xff] }
  0x24   : > { %2629 = vmatmul.mubr.msk.f32.gmra.mrb[2].mxu1 %vm387_vm2, %v350_v32  ;;  %488 = vmatprep.mubr.f32.mxu0 %v3442_v0  ;;  %v698_v1 = vld [vmem:[%s3543_s17 + $0xe0] sm:$0xff]  ;;  %v700_v5 = vld [vmem:[%s3543_s17 + $0xf0] sm:$0xff]  ;;  %v707_v7 = vld [vmem:[%s3543_s17 + $0x128] sm:$0xff] }
  0x25   : > { %601 = vmatprep.mubr.f32.mxu1 %v3442_v0  ;;  %2725 = vmatpush1.bf16.msra.mxu0 %v3594_v45  ;;  %v352_v8 = vld [vmem:[%s4240_s1 + $0x18] sm:$0xff]  ;;  %v3650_v11 = vpack.c.bf16 %v698_v1, %v694_v63  ;;  %v3654_v12 = vpack.c.bf16 %v700_v5, %v696_v3  ;;  %v3656_v13 = vpack.c.bf16 %v707_v7, %v703_v6  ;;  %v702_v14 = vld [vmem:[%s3543_s17 + $0x100] sm:$0xff]  ;;  %v704_v16 = vld [vmem:[%s3543_s17 + $0x110] sm:$0xff]  ;;  %v1749_v1 = vstv %s3717_s27 }
  0x26   : > { %2757 = vmatpush1.bf16.msra.mxu1 %v3600_v48  ;;  %2727 = vmatprep.subr.bf16.mxu0 %v3602_v49  ;;  %v705_v9 = vld [vmem:[%s3543_s17 + $0x118] sm:$0xff]  ;;  %v706_v15 = vld [vmem:[%s3543_s17 + $0x120] sm:$0xff]  ;;  %v708_v18 = vld [vmem:[%s3543_s17 + $0x130] sm:$0xff]  ;;  %vm1750_vm3 = vcmp.lt.s32.totalorder %v1749_v1, %v3527_v2 }
  0x27   : > { %2622 = vmatmul.mubr.msk.f32.gmra.mrb[4].mxu0 %vm387_vm2, %v351_v57  ;;  %2759 = vmatprep.subr.bf16.mxu1 %v3609_v53  ;;  %v709_v10 = vld [vmem:[%s3543_s17 + $0x138] sm:$0xff]  ;;  %v711_v19 = vld [vmem:[%s3543_s17 + $0x148] sm:$0xff]  ;;  %v353_v21 = vld [vmem:[%s4240_s1 + $0x20] sm:$0xff]  ;;  %v3677_v25 = vpack.c.bf16 %v706_v15, %v702_v14  ;;  %v3681_v26 = vpack.c.bf16 %v708_v18, %v704_v16  ;;  %v2160_v16 = vstv %s3748_s9 }
  0x28   : > { %2630 = vmatmul.mubr.msk.f32.gmra.mrb[4].mxu1 %vm387_vm2, %v351_v57  ;;  %494 = vmatprep.mubr.f32.mxu0 %v3442_v0  ;;  %v3663_v17 = vpack.c.bf16 %v709_v10, %v705_v9  ;;  %v715_v20 = vld [vmem:[%s3543_s17 + $0x168] sm:$0xff]  ;;  %v713_v22 = vld [vmem:[%s3543_s17 + $0x158] sm:$0xff]  ;;  %v710_v30 = vld [vmem:[%s3543_s17 + $0x140] sm:$0xff]  ;;  %vm2161_vm4 = vcmp.lt.s32.totalorder %v2160_v16, %v3527_v2 }
  0x29   : > { %607 = vmatprep.mubr.f32.mxu1 %v3442_v0  ;;  %2729 = vmatpush1.bf16.msra.mxu0 %v3623_v60  ;;  %v717_v24 = vld [vmem:[%s3543_s17 + $0x178] sm:$0xff]  ;;  %v3683_v29 = vpack.c.bf16 %v715_v20, %v711_v19  ;;  %v714_v31 = vld [vmem:[%s3543_s17 + $0x160] sm:$0xff]  ;;  %v712_v32 = vld [vmem:[%s3543_s17 + $0x150] sm:$0xff]  ;;  %v2673_v19 = vsel %vm1750_vm3, 1.0, %v3442_v0  ;;  %v2688_v20 = vsel %vm2161_vm4, 1.0, %v3442_v0 }
  0x2a   : > { %2761 = vmatpush1.bf16.msra.mxu1 %v3627_v61  ;;  %2731 = vmatprep.subr.bf16.mxu0 %v3629_v62  ;;  %v3691_v34 = vpack.c.bf16 %v717_v24, %v713_v22  ;;  %v716_v35 = vld [vmem:[%s3543_s17 + $0x170] sm:$0xff]  ;;  %v719_v36 = vld [vmem:[%s3543_s17 + $0x188] sm:$0xff]  ;;  %v721_v40 = vld [vmem:[%s3543_s17 + $0x198] sm:$0xff]  ;;  %v3706_v43 = vpack.c.bf16 %v714_v31, %v710_v30 }
  0x2b   : > { %2623 = vmatmul.mubr.msk.f32.gmra.mrb[6].mxu0 %vm387_vm2, %v352_v8  ;;  %2763 = vmatprep.subr.bf16.mxu1 %v3636_v4  ;;  %v723_v38 = vld [vmem:[%s3543_s17 + $0x1a8] sm:$0xff]  ;;  %v725_v42 = vld [vmem:[%s3543_s17 + $0x1b8] sm:$0xff]  ;;  %v3710_v44 = vpack.c.bf16 %v716_v35, %v712_v32  ;;  %v718_v47 = vld [vmem:[%s3543_s17 + $0x180] sm:$0xff] }
  0x2c   : > { %2631 = vmatmul.mubr.msk.f32.gmra.mrb[6].mxu1 %vm387_vm2, %v352_v8  ;;  %500 = vmatprep.mubr.f32.mxu0 %v3442_v0  ;;  %v354_v39 = vld [vmem:[%s4240_s1 + $0x28] sm:$0xff]  ;;  %v3712_v46 = vpack.c.bf16 %v723_v38, %v719_v36  ;;  %v722_v50 = vld [vmem:[%s3543_s17 + $0x1a0] sm:$0xff]  ;;  %v720_v51 = vld [vmem:[%s3543_s17 + $0x190] sm:$0xff]  ;;  %v3722_v52 = vpack.c.bf16 %v725_v42, %v721_v40 }
  0x2d   : > { %613 = vmatprep.mubr.f32.mxu1 %v3442_v0  ;;  %2733 = vmatpush1.bf16.msra.mxu0 %v3650_v11  ;;  %v724_v54 = vld [vmem:[%s3543_s17 + $0x1b0] sm:$0xff]  ;;  %v727_v55 = vld [vmem:[%s3543_s17 + $0x1c8] sm:$0xff]  ;;  %v729_v58 = vld [vmem:[%s3543_s17 + $0x1d8] sm:$0xff]  ;;  %v3736_v63 = vpack.c.bf16 %v722_v50, %v718_v47 }
  0x2e   : > { %2765 = vmatpush1.bf16.msra.mxu1 %v3654_v12  ;;  %2735 = vmatprep.subr.bf16.mxu0 %v3656_v13  ;;  %v731_v56 = vld [vmem:[%s3543_s17 + $0x1e8] sm:$0xff]  ;;  %v355_v57 = vld [vmem:[%s4240_s1 + $0x30] sm:$0xff]  ;;  %v733_v59 = vld [vmem:[%s3543_s17 + $0x1f8] sm:$0xff]  ;;  %v3741_v3 = vpack.c.bf16 %v724_v54, %v720_v51 }
  0x2f   : > { %2624 = vmatmul.mubr.msk.f32.gmra.mrb[8].mxu0 %vm387_vm2, %v353_v21  ;;  %2767 = vmatprep.subr.bf16.mxu1 %v3663_v17  ;;  %v3743_v5 = vpack.c.bf16 %v731_v56, %v727_v55  ;;  %v726_v6 = vld [vmem:[%s3543_s17 + $0x1c0] sm:$0xff]  ;;  %v3752_v8 = vpack.c.bf16 %v733_v59, %v729_v58  ;;  %v728_v9 = vld [vmem:[%s3543_s17 + $0x1d0] sm:$0xff]  ;;  %v356_v14 = vld [vmem:[%s4240_s1 + $0x38] sm:$0xff] }
  0x30   : > { %2632 = vmatmul.mubr.msk.f32.gmra.mrb[8].mxu1 %vm387_vm2, %v353_v21  ;;  %506 = vmatprep.mubr.f32.mxu0 %v3442_v0  ;;  %v730_v7 = vld [vmem:[%s3543_s17 + $0x1e0] sm:$0xff]  ;;  %v732_v10 = vld [vmem:[%s3543_s17 + $0x1f0] sm:$0xff]  ;;  %v367_v21 = vlaneseq  ;;  %s2619_s17 = sshll.u32 %s3522_s30, 2  ;;  %s745_s30 = smul.u32 56, %s3432_s20 }
  0x31   : > { %619 = vmatprep.mubr.f32.mxu1 %v3442_v0  ;;  %2737 = vmatpush1.bf16.msra.mxu0 %v3677_v25  ;;  %v3764_v15 = vpack.c.bf16 %v730_v7, %v726_v6  ;;  %v3769_v18 = vpack.c.bf16 %v732_v10, %v728_v9  ;;  %s336_s14 = scalar_lea.vmem %s4243_s4, %s2619_s17  ;;  %s2650_s17 = sshll.u32 %s3530_s8, 1 }
  0x32   : > { %2769 = vmatpush1.bf16.msra.mxu1 %v3681_v26  ;;  %2739 = vmatprep.subr.bf16.mxu0 %v3683_v29  ;;  %v368_v22 = vshrl.u32 %v367_v21, 7  ;;  %v365_v30 = vld [vmem:[%s336_s14] sm:$0xf]  ;;  %s746_s15 = sshra.s32 %s745_s30, 3  ;;  %s944_s10 = scalar_lea.vmem %s3872_s7, %s745_s30 [#allocation5] }
  0x33   : > { %2625 = vmatmul.mubr.msk.f32.gmra.mrb[10].mxu0 %vm387_vm2, %v354_v39  ;;  %2771 = vmatprep.subr.bf16.mxu1 %v3691_v34  ;;  %s2702_s16 = sshll.u32 %s746_s15, 5  ;;  %s2674_s14 = sshll.u32 %s3432_s20, 1 }
  0x34   : > { %2633 = vmatmul.mubr.msk.f32.gmra.mrb[10].mxu1 %vm387_vm2, %v354_v39  ;;  %512 = vmatprep.mubr.f32.mxu0 %v3442_v0  ;;  %v369_v24 = vsub.s32 0, %v368_v22  ;;  %v377_v31 = vsub.s32 2, %v368_v22  ;;  %v373_v32 = vsub.s32 1, %v368_v22  ;;  %v381_v35 = vsub.s32 3, %v368_v22  ;;  %s750_s25 = scalar_lea.vmem [#allocation4], %s2702_s16  ;;  %s3923_s30 = sadd.s32 %s2650_s17, %s1152_s18 }
  0x35   : > { %625 = vmatprep.mubr.f32.mxu1 %v3442_v0  ;;  %2741 = vmatpush1.bf16.msra.mxu0 %v3706_v43  ;;  %s3925_s15 = sadd.s32 %s2658_s12, %s1357_s11  ;;  %s3931_s16 = sadd.s32 %s2674_s14, %s1769_s13 }
  0x36   : > { %2773 = vmatpush1.bf16.msra.mxu1 %v3710_v44  ;;  %2743 = vmatprep.subr.bf16.mxu0 %v3712_v46  ;;  %v3823_v36 = vrot.slane %v365_v30, %v369_v24  ;;  %v3825_v38 = vrot.slane %v365_v30, %v377_v31  ;;  %v3827_v39 = vrot.slane %v365_v30, %v373_v32  ;;  %s1149_s11 = scalar_lea.vmem %s3872_s7, %s2643_s29 [#allocation5]  ;;  %s2651_s23 = sshll.u32 %s3923_s30, 3 }
  0x37   : > { %2626 = vmatmul.mubr.msk.f32.gmra.mrb[12].mxu0 %vm387_vm2, %v355_v57  ;;  %2775 = vmatprep.subr.bf16.mxu1 %v3722_v52  ;;  %v3829_v40 = vrot.slane %v365_v30, %v381_v35  ;;  %s1158_s17 = sshra.s32 %s2651_s23, 3  ;;  %s1355_s14 = scalar_lea.vmem %s3872_s7, %s2651_s23 [#allocation5] }
  0x38   : > { %2634 = vmatmul.mubr.msk.f32.gmra.mrb[12].mxu1 %vm387_vm2, %v355_v57  ;;  %518 = vmatprep.mubr.f32.mxu0 %v3442_v0  ;;  %s2704_s12 = sshll.u32 %s1158_s17, 5 }
  0x39   : > { %631 = vmatprep.mubr.f32.mxu1 %v3442_v0  ;;  %2745 = vmatpush1.bf16.msra.mxu0 %v3736_v63  ;;  %s1162_s13 = scalar_lea.vmem [#allocation4], %s2704_s12 }
  0x3a   : > { %2777 = vmatpush1.bf16.msra.mxu1 %v3741_v3  ;;  %2747 = vmatprep.subr.bf16.mxu0 %v3743_v5 }
  0x3b   : > { %2627 = vmatmul.mubr.msk.f32.gmra.mrb[14].mxu0 %vm387_vm2, %v356_v14  ;;  %2779 = vmatprep.subr.bf16.mxu1 %v3752_v8 }
  0x3c   : > { %2635 = vmatmul.mubr.msk.f32.gmra.mrb[14].mxu1 %vm387_vm2, %v356_v14  ;;  %819 = vmatprep.mubr.f32.mxu0 %v3442_v0 }
  0x3d   : > { %2749 = vmatpush1.bf16.msra.mxu0 %v3764_v15  ;;  %890 = vmatprep.mubr.f32.mxu1 %v3442_v0 }
  0x3e   : > { %2781 = vmatpush1.bf16.msra.mxu1 %v3769_v18  ;;  %1756 = vperm.xlu0 %3272, %v2673_v19  }
  0x3f   : > { %2783 = vmatprep.subr.bf16.mxu0 %v3557_v23  ;;  %2815 = vmatprep.subr.bf16.mxu1 %v3564_v28 }
  0x40   : > { %820 = vmatmul.mubr.f32.vlgmr.msra.gmra.mrb[16].mxu0 %v3442_v0 }
  0x41   : > { %891 = vmatmul.mubr.f32.vlgmr.msra.gmra.mrb[16].mxu1 %v3442_v0  ;;  %2785 = vmatpush1.bf16.msra.mxu0 %v3562_v27 }
  0x42   : > { %2167 = vperm.xlu0 %3272, %v2688_v20   ;;  %2817 = vmatpush1.bf16.msra.mxu1 %v3573_v33 }
  0x43   : > { %2787 = vmatprep.subr.bf16.mxu0 %v3580_v37  ;;  %2819 = vmatprep.subr.bf16.mxu1 %v3587_v41 }
  0x44   : > { %1025 = vmatprep.mubr.f32.mxu0 %v3442_v0  ;;  %1096 = vmatprep.mubr.f32.mxu1 %v3442_v0 }
  0x45   : > { %2789 = vmatpush1.bf16.msra.mxu0 %v3594_v45 }
  0x46   : > { %2821 = vmatpush1.bf16.msra.mxu1 %v3600_v48  ;;  %2791 = vmatprep.subr.bf16.mxu0 %v3602_v49 }
  0x47   : > { %2823 = vmatprep.subr.bf16.mxu1 %v3609_v53 }
  0x49   : > { %2793 = vmatpush1.bf16.msra.mxu0 %v3623_v60 }
  0x4a   : > { %2825 = vmatpush1.bf16.msra.mxu1 %v3627_v61  ;;  %2795 = vmatprep.subr.bf16.mxu0 %v3629_v62 }
  0x4b   : > { %2827 = vmatprep.subr.bf16.mxu1 %v3636_v4 }
  0x4d   : > { %2797 = vmatpush1.bf16.msra.mxu0 %v3650_v11 }
  0x4e   : > { %2829 = vmatpush1.bf16.msra.mxu1 %v3654_v12  ;;  %2799 = vmatprep.subr.bf16.mxu0 %v3656_v13 }
  0x4f   : > { %2831 = vmatprep.subr.bf16.mxu1 %v3663_v17 }
  0x51   : > { %2801 = vmatpush1.bf16.msra.mxu0 %v3677_v25 }
  0x52   : > { %2833 = vmatpush1.bf16.msra.mxu1 %v3681_v26  ;;  %2803 = vmatprep.subr.bf16.mxu0 %v3683_v29 }
  0x53   : > { %2835 = vmatprep.subr.bf16.mxu1 %v3691_v34 }
  0x55   : > { %2805 = vmatpush1.bf16.msra.mxu0 %v3706_v43 }
  0x56   : > { %2837 = vmatpush1.bf16.msra.mxu1 %v3710_v44  ;;  %2807 = vmatprep.subr.bf16.mxu0 %v3712_v46 }
  0x57   : > { %2839 = vmatprep.subr.bf16.mxu1 %v3722_v52 }
  0x59   : > { %2809 = vmatpush1.bf16.msra.mxu0 %v3736_v63 }
  0x5a   : > { %2841 = vmatpush1.bf16.msra.mxu1 %v3741_v3  ;;  %2811 = vmatprep.subr.bf16.mxu0 %v3743_v5 }
  0x5b   : > { %2843 = vmatprep.subr.bf16.mxu1 %v3752_v8 }
  0x5d   : > { %2813 = vmatpush1.bf16.msra.mxu0 %v3764_v15 }
  0x5e   : > { %2845 = vmatpush1.bf16.msra.mxu1 %v3769_v18  ;;  %2847 = vmatprep.subr.bf16.mxu0 %v3557_v23 }
  0x5f   : > { %2879 = vmatprep.subr.bf16.mxu1 %v3564_v28 }
  0xf2   : > { %v478_v42 = vpop.f32.mrb[0].mxu0 }
  0xf3   : > { %v479_v47 = vadd.f32 %v478_v42, %v3823_v36  ;;  %v591_v50 = vpop.f32.mrb[0].mxu1  ;;  %v480_v51 = vpop.f32.mrb[1].mxu0 }
  0xf4   : > { %v592_v54 = vadd.f32 %v591_v50, %v3825_v38  ;;  %v481_v55 = vadd.f32 %v480_v51, %v3827_v39  ;;  %v593_v56 = vpop.f32.mrb[1].mxu1 }
  0xf5   : > { %638 = vst [vmem:[#allocation4] sm:$0xff] %v479_v47  ;;  %v594_v57 = vadd.f32 %v593_v56, %v3829_v40 }
  0xf6   : > { %640 = vst [vmem:[#allocation4 + $0x10] sm:$0xff] %v592_v54  ;;  %639 = vst [vmem:[#allocation4 + $0x8] sm:$0xff] %v481_v55  ;;  %v484_v58 = vpop.f32.mrb[2].mxu0 }
  0xf7   : > { %641 = vst [vmem:[#allocation4 + $0x18] sm:$0xff] %v594_v57  ;;  %v485_v59 = vadd.f32 %v484_v58, %v3823_v36  ;;  %v597_v1 = vpop.f32.mrb[2].mxu1  ;;  %v486_v6 = vpop.f32.mrb[3].mxu0 }
  0xf8   : > { %v598_v7 = vadd.f32 %v597_v1, %v3825_v38  ;;  %v487_v9 = vadd.f32 %v486_v6, %v3827_v39  ;;  %v599_v10 = vpop.f32.mrb[3].mxu1 }
  0xf9   : > { %642 = vst [vmem:[#allocation4 + $0x20] sm:$0xff] %v485_v59  ;;  %v600_v14 = vadd.f32 %v599_v10, %v3829_v40 }
  0xfa   : > { %644 = vst [vmem:[#allocation4 + $0x30] sm:$0xff] %v598_v7  ;;  %643 = vst [vmem:[#allocation4 + $0x28] sm:$0xff] %v487_v9  ;;  %v490_v16 = vpop.f32.mrb[4].mxu0 }
  0xfb   : > { %645 = vst [vmem:[#allocation4 + $0x38] sm:$0xff] %v600_v14  ;;  %v491_v19 = vadd.f32 %v490_v16, %v3823_v36  ;;  %v603_v20 = vpop.f32.mrb[4].mxu1  ;;  %v492_v21 = vpop.f32.mrb[5].mxu0 }
  0xfc   : > { %v604_v22 = vadd.f32 %v603_v20, %v3825_v38  ;;  %v493_v24 = vadd.f32 %v492_v21, %v3827_v39  ;;  %v605_v30 = vpop.f32.mrb[5].mxu1 }
  0xfd   : > { %646 = vst [vmem:[#allocation4 + $0x40] sm:$0xff] %v491_v19  ;;  %v606_v31 = vadd.f32 %v605_v30, %v3829_v40 }
  0xfe   : > { %648 = vst [vmem:[#allocation4 + $0x50] sm:$0xff] %v604_v22  ;;  %647 = vst [vmem:[#allocation4 + $0x48] sm:$0xff] %v493_v24  ;;  %v496_v32 = vpop.f32.mrb[6].mxu0 }
  0xff   : > { %649 = vst [vmem:[#allocation4 + $0x58] sm:$0xff] %v606_v31  ;;  %v497_v35 = vadd.f32 %v496_v32, %v3823_v36  ;;  %v609_v42 = vpop.f32.mrb[6].mxu1  ;;  %v498_v47 = vpop.f32.mrb[7].mxu0 }
 0x100   : > { %v610_v50 = vadd.f32 %v609_v42, %v3825_v38  ;;  %v499_v51 = vadd.f32 %v498_v47, %v3827_v39  ;;  %v611_v54 = vpop.f32.mrb[7].mxu1 }
 0x101   : > { %650 = vst [vmem:[#allocation4 + $0x60] sm:$0xff] %v497_v35  ;;  %v612_v55 = vadd.f32 %v611_v54, %v3829_v40 }
 0x102   : > { %652 = vst [vmem:[#allocation4 + $0x70] sm:$0xff] %v610_v50  ;;  %651 = vst [vmem:[#allocation4 + $0x68] sm:$0xff] %v499_v51  ;;  %v502_v56 = vpop.f32.mrb[8].mxu0 }
 0x103   : > { %653 = vst [vmem:[#allocation4 + $0x78] sm:$0xff] %v612_v55  ;;  %v503_v57 = vadd.f32 %v502_v56, %v3823_v36  ;;  %v615_v58 = vpop.f32.mrb[8].mxu1  ;;  %v504_v59 = vpop.f32.mrb[9].mxu0 }
 0x104   : > { %v616_v1 = vadd.f32 %v615_v58, %v3825_v38  ;;  %v505_v6 = vadd.f32 %v504_v59, %v3827_v39  ;;  %v617_v7 = vpop.f32.mrb[9].mxu1 }
 0x105   : > { %654 = vst [vmem:[#allocation4 + $0x80] sm:$0xff] %v503_v57  ;;  %v618_v9 = vadd.f32 %v617_v7, %v3829_v40 }
 0x106   : > { %656 = vst [vmem:[#allocation4 + $0x90] sm:$0xff] %v616_v1  ;;  %655 = vst [vmem:[#allocation4 + $0x88] sm:$0xff] %v505_v6  ;;  %v508_v10 = vpop.f32.mrb[10].mxu0 }
 0x107   : > { %657 = vst [vmem:[#allocation4 + $0x98] sm:$0xff] %v618_v9  ;;  %v509_v14 = vadd.f32 %v508_v10, %v3823_v36  ;;  %v621_v16 = vpop.f32.mrb[10].mxu1  ;;  %v510_v19 = vpop.f32.mrb[11].mxu0 }
 0x108   : > { %v622_v20 = vadd.f32 %v621_v16, %v3825_v38  ;;  %v511_v21 = vadd.f32 %v510_v19, %v3827_v39  ;;  %v623_v22 = vpop.f32.mrb[11].mxu1 }
 0x109   : > { %658 = vst [vmem:[#allocation4 + $0xa0] sm:$0xff] %v509_v14  ;;  %v624_v24 = vadd.f32 %v623_v22, %v3829_v40 }
 0x10a   : > { %660 = vst [vmem:[#allocation4 + $0xb0] sm:$0xff] %v622_v20  ;;  %659 = vst [vmem:[#allocation4 + $0xa8] sm:$0xff] %v511_v21  ;;  %v514_v30 = vpop.f32.mrb[12].mxu0 }
 0x10b   : > { %661 = vst [vmem:[#allocation4 + $0xb8] sm:$0xff] %v624_v24  ;;  %v515_v31 = vadd.f32 %v514_v30, %v3823_v36  ;;  %v627_v32 = vpop.f32.mrb[12].mxu1  ;;  %v516_v35 = vpop.f32.mrb[13].mxu0 }
 0x10c   : > { %v628_v42 = vadd.f32 %v627_v32, %v3825_v38  ;;  %v517_v47 = vadd.f32 %v516_v35, %v3827_v39  ;;  %v629_v50 = vpop.f32.mrb[13].mxu1 }
 0x10d   : > { %662 = vst [vmem:[#allocation4 + $0xc0] sm:$0xff] %v515_v31  ;;  %v630_v51 = vadd.f32 %v629_v50, %v3829_v40 }
 0x10e   : > { %664 = vst [vmem:[#allocation4 + $0xd0] sm:$0xff] %v628_v42  ;;  %663 = vst [vmem:[#allocation4 + $0xc8] sm:$0xff] %v517_v47  ;;  %v520_v54 = vpop.f32.mrb[14].mxu0 }
 0x10f   : > { %665 = vst [vmem:[#allocation4 + $0xd8] sm:$0xff] %v630_v51  ;;  %v521_v55 = vadd.f32 %v520_v54, %v3823_v36  ;;  %v633_v56 = vpop.f32.mrb[14].mxu1  ;;  %v522_v57 = vpop.f32.mrb[15].mxu0 }
 0x110   : > { %v634_v58 = vadd.f32 %v633_v56, %v3825_v38  ;;  %v523_v59 = vadd.f32 %v522_v57, %v3827_v39  ;;  %v635_v1 = vpop.f32.mrb[15].mxu1 }
 0x111   : > { %666 = vst [vmem:[#allocation4 + $0xe0] sm:$0xff] %v521_v55  ;;  %v636_v6 = vadd.f32 %v635_v1, %v3829_v40 }
 0x112   : > { %668 = vst [vmem:[#allocation4 + $0xf0] sm:$0xff] %v634_v58  ;;  %667 = vst [vmem:[#allocation4 + $0xe8] sm:$0xff] %v523_v59 }
 0x113   : > { %669 = vst [vmem:[#allocation4 + $0xf8] sm:$0xff] %v636_v6  ;;  %v821_v7 = vpop.f32.mrb[16].mxu0 }
 0x114   : > { %v823_v9 = vpop.f32.mrb[17].mxu0  ;;  %v892_v10 = vpop.f32.mrb[16].mxu1 }
 0x115   : > { %v894_v36 = vpop.f32.mrb[17].mxu1 }
 0x11a   : > { %v751_v14 = vld [vmem:[%s750_s25] sm:$0xff]  ;;  %v752_v16 = vld [vmem:[%s750_s25 + $0x8] sm:$0xff]  ;;  %v754_v21 = vld [vmem:[%s750_s25 + $0x18] sm:$0xff] }
 0x11b   : > { %v897_v38 = vadd.f32 %v821_v7, %v751_v14  ;;  %v898_v19 = vadd.f32 %v823_v9, %v752_v16  ;;  %v900_v40 = vadd.f32 %v894_v36, %v754_v21  ;;  %v753_v22 = vld [vmem:[%s750_s25 + $0x10] sm:$0xff]  ;;  %v3870_v7 = vpop.permute.xlu0 %932  ;;  %v1543_v36 = vstv %s3925_s15  ;;  %s2180_s25 = smul.u32 7, %s3530_s8 }
 0x11c   : > { %v899_v30 = vadd.f32 %v892_v10, %v753_v22  ;;  %v1337_v10 = vstv %s3923_s30  ;;  %vm1544_vm6 = vcmp.lt.s32.totalorder %v1543_v36, %v3527_v2  ;;  %v1955_v16 = vstv %s3931_s16  ;;  %s2659_s30 = sshll.u32 %s3925_s15, 3  ;;  %s2667_s15 = sshll.u32 %s3717_s27, 3 }
 0x11d   : > { %v2638_v39 = vmul.f32 -1.442695, %v897_v38  ;;  %v2639_v20 = vmul.f32 -1.442695, %v898_v19  ;;  %v2640_v24 = vmul.f32 -1.442695, %v900_v40  ;;  %vm1338_vm5 = vcmp.lt.s32.totalorder %v1337_v10, %v3527_v2  ;;  %s1767_s17 = scalar_lea.vmem %s3872_s7, %s2667_s15 [#allocation5] }
 0x11e   : > { %v2657_v14 = vsel %vm1338_vm5, 1.0, %v3442_v0  ;;  %v2665_v38 = vsel %vm1544_vm6, 1.0, %v3442_v0  ;;  %vm1956_vm7 = vcmp.lt.s32.totalorder %v1955_v16, %v3527_v2  ;;  %v2364_v19 = vstv %s2180_s25  ;;  %s1364_s25 = sshra.s32 %s2659_s30, 3  ;;  %s2675_s27 = sshll.u32 %s3931_s16, 3 }
 0x11f   : > { %3274 = vpow2.f32 %v2638_v39  ;;  %1344 = vperm.xlu1 %3273, %v2657_v14   ;;  %v2681_v39 = vsel %vm1956_vm7, 1.0, %v3442_v0  ;;  %vm2365_vm8 = vcmp.lt.s32.totalorder %v2364_v19, %v3527_v2  ;;  %s2705_s29 = sshll.u32 %s1364_s25, 5  ;;  %s1776_s12 = sshra.s32 %s2675_s27, 3 }
 0x120   : > { %3276 = vpow2.f32 %v2639_v20  ;;  %v2694_v20 = vsel %vm2365_vm8, 1.0, %v3442_v0  ;;  %s2682_s16 = sshll.u32 %s3748_s9, 3 }
 0x121   : > { %3278 = vpow2.f32 %v2640_v24  ;;  %s1981_s25 = sshra.s32 %s2682_s16, 3 }
 0x122   : > { %3280 = vtanh.f32 %v899_v30 }
 0x123   : > { %1550 = vperm.xlu1 %3273, %v2665_v38  }
 0x127   : > { %1962 = vperm.xlu1 %3273, %v2681_v39  }
 0x129   : > { %v3275_v31 = vpop.eup %3274 }
 0x12a   : > { %v3277_v32 = vpop.eup %3276  ;;  %v904_v35 = vadd.f32 1.0, %v3275_v31 }
 0x12b   : > { %v910_v42 = vadd.f32 1.0, %v3277_v32  ;;  %v3279_v47 = vpop.eup %3278  ;;  %2371 = vperm.xlu1 %3273, %v2694_v20  }
 0x12c   : > { %3282 = vrcp.f32 %v904_v35  ;;  %v3281_v50 = vpop.eup %3280  ;;  %v917_v55 = vadd.f32 1.0, %v3279_v47 }
 0x12d   : > { %3284 = vrcp.f32 %v910_v42 }
 0x12e   : > { %3286 = vrcp.f32 %v917_v55 }
 0x136   : > { %v3283_v51 = vpop.eup %3282 }
 0x137   : > { %v3285_v54 = vpop.eup %3284  ;;  %v921_v56 = vmul.f32 %v3283_v51, %v3281_v50 }
 0x138   : > { %v920_v57 = vmul.f32 0.0, %v3285_v54  ;;  %v3287_v59 = vpop.eup %3286 }
 0x13a   : > { %v3866_v58 = vadd.f32 %v921_v56, %v920_v57 }
 0x13c   : > { %3288 = vtanh.f32 %v3866_v58  ;;  %v935_v14 = vmul.f32 %v3870_v7, %v3866_v58 }
 0x146   : > { %v3289_v1 = vpop.eup %3288 }
 0x147   : > { %v924_v6 = vmul.f32 %v3289_v1, %v3287_v59 }
 0x149   : > { %v3878_v9 = vmul.f32 %v3870_v7, %v924_v6 }
 0x14b   : > { %945 = vst [vmem:[%s944_s10] sm:$0xff] %v3878_v9  ;;  %1026 = vmatmul.mubr.f32.vlgmr.msra.gmra.mrb[18].mxu0 %v3878_v9  ;;  %1097 = vmatmul.mubr.f32.vlgmr.msra.gmra.mrb[18].mxu1 %v3878_v9  ;;  %s2703_s10 = sshll.u32 %s952_s6, 5  ;;  %s1368_s6 = scalar_lea.vmem [#allocation4], %s2705_s29 }
 0x14c   : > { %2849 = vmatpush1.bf16.msra.mxu0 %v3562_v27  ;;  %2881 = vmatpush1.bf16.msra.mxu1 %v3573_v33  ;;  %s956_s18 = scalar_lea.vmem [#allocation4], %s2703_s10  ;;  %s1561_s10 = scalar_lea.vmem %s3872_s7, %s2659_s30 [#allocation5] }
 0x14d   : > { %2851 = vmatprep.subr.bf16.mxu0 %v3580_v37  ;;  %2883 = vmatprep.subr.bf16.mxu1 %v3587_v41  ;;  %v957_v21 = vld [vmem:[%s956_s18] sm:$0xff]  ;;  %v959_v22 = vld [vmem:[%s956_s18 + $0x10] sm:$0xff]  ;;  %v958_v32 = vld [vmem:[%s956_s18 + $0x8] sm:$0xff]  ;;  %s1973_s30 = scalar_lea.vmem %s3872_s7, %s2675_s27 [#allocation5]  ;;  %s2708_s29 = sshll.u32 %s1981_s25, 5 }
 0x14e   : > { %1231 = vmatprep.mubr.f32.mxu0 %v3442_v0  ;;  %1302 = vmatprep.mubr.f32.mxu1 %v3442_v0  ;;  %v960_v42 = vld [vmem:[%s956_s18 + $0x18] sm:$0xff]  ;;  %s1570_s18 = sshra.s32 %s2667_s15, 3  ;;  %s2184_s15 = smul.u32 56, %s3530_s8 }
 0x150   : > { %2853 = vmatpush1.bf16.msra.mxu0 %v3594_v45  ;;  %2885 = vmatpush1.bf16.msra.mxu1 %v3600_v48  ;;  %s2383_s9 = scalar_lea.vmem %s3872_s7, %s2184_s15 [#allocation5] }
 0x151   : > { %2855 = vmatprep.subr.bf16.mxu0 %v3602_v49  ;;  %2887 = vmatprep.subr.bf16.mxu1 %v3609_v53 }
 0x154   : > { %2857 = vmatpush1.bf16.msra.mxu0 %v3623_v60  ;;  %2889 = vmatpush1.bf16.msra.mxu1 %v3627_v61 }
 0x155   : > { %2859 = vmatprep.subr.bf16.mxu0 %v3629_v62  ;;  %2891 = vmatprep.subr.bf16.mxu1 %v3636_v4 }
 0x158   : > { %2861 = vmatpush1.bf16.msra.mxu0 %v3650_v11  ;;  %2893 = vmatpush1.bf16.msra.mxu1 %v3654_v12 }
 0x159   : > { %2863 = vmatprep.subr.bf16.mxu0 %v3656_v13  ;;  %2895 = vmatprep.subr.bf16.mxu1 %v3663_v17 }
 0x15c   : > { %2865 = vmatpush1.bf16.msra.mxu0 %v3677_v25  ;;  %2897 = vmatpush1.bf16.msra.mxu1 %v3681_v26 }
 0x15d   : > { %2867 = vmatprep.subr.bf16.mxu0 %v3683_v29  ;;  %2899 = vmatprep.subr.bf16.mxu1 %v3691_v34 }
 0x160   : > { %2869 = vmatpush1.bf16.msra.mxu0 %v3706_v43  ;;  %2901 = vmatpush1.bf16.msra.mxu1 %v3710_v44 }
 0x161   : > { %2871 = vmatprep.subr.bf16.mxu0 %v3712_v46  ;;  %2903 = vmatprep.subr.bf16.mxu1 %v3722_v52 }
 0x164   : > { %2873 = vmatpush1.bf16.msra.mxu0 %v3736_v63  ;;  %2905 = vmatpush1.bf16.msra.mxu1 %v3741_v3 }
 0x165   : > { %2875 = vmatprep.subr.bf16.mxu0 %v3743_v5  ;;  %2907 = vmatprep.subr.bf16.mxu1 %v3752_v8 }
 0x168   : > { %2877 = vmatpush1.bf16.msra.mxu0 %v3764_v15  ;;  %2909 = vmatpush1.bf16.msra.mxu1 %v3769_v18 }
 0x169   : > { %2911 = vmatprep.subr.bf16.mxu0 %v3557_v23  ;;  %2943 = vmatprep.subr.bf16.mxu1 %v3564_v28 }
 0x21e   : > { %v1027_v40 = vpop.f32.mrb[18].mxu0  ;;  %v1098_v24 = vpop.f32.mrb[18].mxu1 }
 0x21f   : > { %v1103_v30 = vadd.f32 %v1027_v40, %v957_v21  ;;  %v1105_v31 = vadd.f32 %v1098_v24, %v959_v22  ;;  %v1029_v35 = vpop.f32.mrb[19].mxu0  ;;  %v1100_v47 = vpop.f32.mrb[19].mxu1 }
 0x220   : > { %v1104_v2 = vadd.f32 %v1029_v35, %v958_v32  ;;  %v1106_v50 = vadd.f32 %v1100_v47, %v960_v42  ;;  %v1139_v40 = vpop.permute.xlu0 %1138 }
 0x221   : > { %v2646_v51 = vmul.f32 -1.442695, %v1103_v30 }
 0x222   : > { %v2647_v54 = vmul.f32 -1.442695, %v1104_v2  ;;  %v2648_v55 = vmul.f32 -1.442695, %v1106_v50 }
 0x223   : > { %3290 = vpow2.f32 %v2646_v51  ;;  %v1164_v51 = vld [vmem:[%s1162_s13 + $0x8] sm:$0xff] }
 0x224   : > { %3292 = vpow2.f32 %v2647_v54 }
 0x225   : > { %3294 = vpow2.f32 %v2648_v55 }
 0x226   : > { %3296 = vtanh.f32 %v1105_v31 }
 0x22d   : > { %v3291_v56 = vpop.eup %3290 }
 0x22e   : > { %v3293_v57 = vpop.eup %3292  ;;  %v1110_v59 = vadd.f32 1.0, %v3291_v56 }
 0x22f   : > { %v1116_v1 = vadd.f32 1.0, %v3293_v57  ;;  %v3295_v6 = vpop.eup %3294 }
 0x230   : > { %3298 = vrcp.f32 %v1110_v59  ;;  %v3297_v10 = vpop.eup %3296  ;;  %v1123_v19 = vadd.f32 1.0, %v3295_v6 }
 0x231   : > { %3300 = vrcp.f32 %v1116_v1  ;;  %v1166_v1 = vld [vmem:[%s1162_s13 + $0x18] sm:$0xff] }
 0x232   : > { %3302 = vrcp.f32 %v1123_v19 }
 0x23a   : > { %v3299_v36 = vpop.eup %3298 }
 0x23b   : > { %v3301_v16 = vpop.eup %3300  ;;  %v1127_v38 = vmul.f32 %v3299_v36, %v3297_v10  ;;  %v1165_v10 = vld [vmem:[%s1162_s13 + $0x10] sm:$0xff] }
 0x23c   : > { %v1126_v39 = vmul.f32 %v3301_v16, %v935_v14  ;;  %v3303_v30 = vpop.eup %3302 }
 0x23e   : > { %v1128_v20 = vadd.f32 %v1127_v38, %v1126_v39 }
 0x240   : > { %3304 = vtanh.f32 %v1128_v20  ;;  %v1135_v21 = vsub.f32 %v1128_v20, %v935_v14 }
 0x242   : > { %v1141_v22 = vmul.f32 %v1139_v40, %v1135_v21 }
 0x244   : > { %v3946_v24 = vadd.f32 %v1141_v22, %v935_v14 }
 0x24a   : > { %v3305_v31 = vpop.eup %3304 }
 0x24b   : > { %v1130_v32 = vmul.f32 %v3305_v31, %v3303_v30 }
 0x24d   : > { %v1144_v35 = vsub.f32 %v1130_v32, %v3878_v9  ;;  %v1148_v58 = vmul.f32 %v1139_v40, %v1130_v32 }
 0x24f   : > { %v1145_v7 = vmul.f32 %v1144_v35, %v1139_v40  ;;  %1150 = vst [vmem:[%s1149_s11] sm:$0xff] %v1148_v58  ;;  %v1345_v58 = vpop.permute.xlu1 %1344  ;;  %s2706_s11 = sshll.u32 %s1570_s18, 5  ;;  %s2185_s18 = sshra.s32 %s2184_s15, 3 }
 0x250   : > { %s1574_s23 = scalar_lea.vmem [#allocation4], %s2706_s11  ;;  %s2709_s11 = sshll.u32 %s2185_s18, 5 }
 0x251   : > { %v3953_v42 = vadd.f32 %v1145_v7, %v3878_v9  ;;  %v1163_v9 = vld [vmem:[%s1162_s13] sm:$0xff]  ;;  %s2707_s13 = sshll.u32 %s1776_s12, 5 }
 0x253   : > { %1232 = vmatmul.mubr.f32.vlgmr.msra.gmra.mrb[20].mxu0 %v3953_v42  ;;  %1303 = vmatmul.mubr.f32.vlgmr.msra.gmra.mrb[20].mxu1 %v3953_v42 }
 0x254   : > { %2913 = vmatpush1.bf16.msra.mxu0 %v3562_v27  ;;  %2945 = vmatpush1.bf16.msra.mxu1 %v3573_v33 }
 0x255   : > { %2915 = vmatprep.subr.bf16.mxu0 %v3580_v37  ;;  %2947 = vmatprep.subr.bf16.mxu1 %v3587_v41 }
 0x256   : > { %1437 = vmatprep.mubr.f32.mxu0 %v3442_v0  ;;  %1508 = vmatprep.mubr.f32.mxu1 %v3442_v0 }
 0x258   : > { %2917 = vmatpush1.bf16.msra.mxu0 %v3594_v45  ;;  %2949 = vmatpush1.bf16.msra.mxu1 %v3600_v48 }
 0x259   : > { %2919 = vmatprep.subr.bf16.mxu0 %v3602_v49  ;;  %2951 = vmatprep.subr.bf16.mxu1 %v3609_v53 }
 0x25c   : > { %2921 = vmatpush1.bf16.msra.mxu0 %v3623_v60  ;;  %2953 = vmatpush1.bf16.msra.mxu1 %v3627_v61 }
 0x25d   : > { %2923 = vmatprep.subr.bf16.mxu0 %v3629_v62  ;;  %2955 = vmatprep.subr.bf16.mxu1 %v3636_v4 }
 0x260   : > { %2925 = vmatpush1.bf16.msra.mxu0 %v3650_v11  ;;  %2957 = vmatpush1.bf16.msra.mxu1 %v3654_v12 }
 0x261   : > { %2927 = vmatprep.subr.bf16.mxu0 %v3656_v13  ;;  %2959 = vmatprep.subr.bf16.mxu1 %v3663_v17 }
 0x264   : > { %2929 = vmatpush1.bf16.msra.mxu0 %v3677_v25  ;;  %2961 = vmatpush1.bf16.msra.mxu1 %v3681_v26 }
 0x265   : > { %2931 = vmatprep.subr.bf16.mxu0 %v3683_v29  ;;  %2963 = vmatprep.subr.bf16.mxu1 %v3691_v34 }
 0x268   : > { %2933 = vmatpush1.bf16.msra.mxu0 %v3706_v43  ;;  %2965 = vmatpush1.bf16.msra.mxu1 %v3710_v44 }
 0x269   : > { %2935 = vmatprep.subr.bf16.mxu0 %v3712_v46  ;;  %2967 = vmatprep.subr.bf16.mxu1 %v3722_v52 }
 0x26c   : > { %2937 = vmatpush1.bf16.msra.mxu0 %v3736_v63  ;;  %2969 = vmatpush1.bf16.msra.mxu1 %v3741_v3 }
 0x26d   : > { %2939 = vmatprep.subr.bf16.mxu0 %v3743_v5  ;;  %2971 = vmatprep.subr.bf16.mxu1 %v3752_v8 }
 0x270   : > { %2941 = vmatpush1.bf16.msra.mxu0 %v3764_v15  ;;  %2973 = vmatpush1.bf16.msra.mxu1 %v3769_v18 }
 0x271   : > { %2975 = vmatprep.subr.bf16.mxu0 %v3557_v23  ;;  %3007 = vmatprep.subr.bf16.mxu1 %v3564_v28 }
 0x326   : > { %v1233_v47 = vpop.f32.mrb[20].mxu0  ;;  %v1304_v2 = vpop.f32.mrb[20].mxu1 }
 0x327   : > { %v1309_v50 = vadd.f32 %v1233_v47, %v1163_v9  ;;  %v1235_v54 = vpop.f32.mrb[21].mxu0  ;;  %v1306_v55 = vpop.f32.mrb[21].mxu1  ;;  %v1311_v14 = vadd.f32 %v1304_v2, %v1165_v10 }
 0x328   : > { %v1310_v56 = vadd.f32 %v1235_v54, %v1164_v51  ;;  %v1312_v6 = vadd.f32 %v1306_v55, %v1166_v1 }
 0x329   : > { %v2654_v57 = vmul.f32 -1.442695, %v1309_v50 }
 0x32a   : > { %v2655_v59 = vmul.f32 -1.442695, %v1310_v56  ;;  %v2656_v36 = vmul.f32 -1.442695, %v1312_v6  ;;  %v1370_v6 = vld [vmem:[%s1368_s6 + $0x8] sm:$0xff] }
 0x32b   : > { %3306 = vpow2.f32 %v2654_v57 }
 0x32c   : > { %3308 = vpow2.f32 %v2655_v59 }
 0x32d   : > { %3310 = vpow2.f32 %v2656_v36 }
 0x32e   : > { %3312 = vtanh.f32 %v1311_v14 }
 0x335   : > { %v3307_v16 = vpop.eup %3306 }
 0x336   : > { %v3309_v38 = vpop.eup %3308  ;;  %v1316_v19 = vadd.f32 1.0, %v3307_v16 }
 0x337   : > { %v1322_v39 = vadd.f32 1.0, %v3309_v38  ;;  %v3311_v20 = vpop.eup %3310 }
 0x338   : > { %3314 = vrcp.f32 %v1316_v19  ;;  %v3313_v21 = vpop.eup %3312  ;;  %v1329_v30 = vadd.f32 1.0, %v3311_v20  ;;  %v1372_v19 = vld [vmem:[%s1368_s6 + $0x18] sm:$0xff]  ;;  %v1371_v20 = vld [vmem:[%s1368_s6 + $0x10] sm:$0xff] }
 0x339   : > { %3316 = vrcp.f32 %v1322_v39 }
 0x33a   : > { %3318 = vrcp.f32 %v1329_v30 }
 0x342   : > { %v3315_v40 = vpop.eup %3314 }
 0x343   : > { %v3317_v22 = vpop.eup %3316  ;;  %v1333_v31 = vmul.f32 %v3315_v40, %v3313_v21 }
 0x344   : > { %v1332_v32 = vmul.f32 %v3317_v22, %v3946_v24  ;;  %v3319_v2 = vpop.eup %3318 }
 0x346   : > { %v1334_v35 = vadd.f32 %v1333_v31, %v1332_v32 }
 0x348   : > { %3320 = vtanh.f32 %v1334_v35  ;;  %v1341_v7 = vsub.f32 %v1334_v35, %v3946_v24 }
 0x34a   : > { %v1347_v9 = vmul.f32 %v1345_v58, %v1341_v7 }
 0x34c   : > { %v3997_v47 = vadd.f32 %v1347_v9, %v3946_v24  ;;  %v1369_v24 = vld [vmem:[%s1368_s6] sm:$0xff]  ;;  %s1985_s6 = scalar_lea.vmem [#allocation4], %s2708_s29 }
 0x352   : > { %v3321_v50 = vpop.eup %3320 }
 0x353   : > { %v1336_v51 = vmul.f32 %v3321_v50, %v3319_v2 }
 0x355   : > { %v1350_v54 = vsub.f32 %v1336_v51, %v3953_v42  ;;  %v1354_v55 = vmul.f32 %v1345_v58, %v1336_v51 }
 0x357   : > { %v1351_v56 = vmul.f32 %v1350_v54, %v1345_v58  ;;  %1356 = vst [vmem:[%s1355_s14] sm:$0xff] %v1354_v55  ;;  %s1780_s14 = scalar_lea.vmem [#allocation4], %s2707_s13 }
 0x359   : > { %v4004_v57 = vadd.f32 %v1351_v56, %v3953_v42  ;;  %v1551_v56 = vpop.permute.xlu1 %1550 }
 0x35b   : > { %1438 = vmatmul.mubr.f32.vlgmr.msra.gmra.mrb[22].mxu0 %v4004_v57  ;;  %1509 = vmatmul.mubr.f32.vlgmr.msra.gmra.mrb[22].mxu1 %v4004_v57 }
 0x35c   : > { %2977 = vmatpush1.bf16.msra.mxu0 %v3562_v27  ;;  %3009 = vmatpush1.bf16.msra.mxu1 %v3573_v33 }
 0x35d   : > { %2979 = vmatprep.subr.bf16.mxu0 %v3580_v37  ;;  %3011 = vmatprep.subr.bf16.mxu1 %v3587_v41 }
 0x35e   : > { %1643 = vmatprep.mubr.f32.mxu0 %v3442_v0  ;;  %1714 = vmatprep.mubr.f32.mxu1 %v3442_v0 }
 0x360   : > { %2981 = vmatpush1.bf16.msra.mxu0 %v3594_v45  ;;  %3013 = vmatpush1.bf16.msra.mxu1 %v3600_v48 }
 0x361   : > { %2983 = vmatprep.subr.bf16.mxu0 %v3602_v49  ;;  %3015 = vmatprep.subr.bf16.mxu1 %v3609_v53 }
 0x364   : > { %2985 = vmatpush1.bf16.msra.mxu0 %v3623_v60  ;;  %3017 = vmatpush1.bf16.msra.mxu1 %v3627_v61 }
 0x365   : > { %2987 = vmatprep.subr.bf16.mxu0 %v3629_v62  ;;  %3019 = vmatprep.subr.bf16.mxu1 %v3636_v4 }
 0x368   : > { %2989 = vmatpush1.bf16.msra.mxu0 %v3650_v11  ;;  %3021 = vmatpush1.bf16.msra.mxu1 %v3654_v12 }
 0x369   : > { %2991 = vmatprep.subr.bf16.mxu0 %v3656_v13  ;;  %3023 = vmatprep.subr.bf16.mxu1 %v3663_v17 }
 0x36c   : > { %2993 = vmatpush1.bf16.msra.mxu0 %v3677_v25  ;;  %3025 = vmatpush1.bf16.msra.mxu1 %v3681_v26 }
 0x36d   : > { %2995 = vmatprep.subr.bf16.mxu0 %v3683_v29  ;;  %3027 = vmatprep.subr.bf16.mxu1 %v3691_v34 }
 0x370   : > { %2997 = vmatpush1.bf16.msra.mxu0 %v3706_v43  ;;  %3029 = vmatpush1.bf16.msra.mxu1 %v3710_v44 }
 0x371   : > { %2999 = vmatprep.subr.bf16.mxu0 %v3712_v46  ;;  %3031 = vmatprep.subr.bf16.mxu1 %v3722_v52 }
 0x374   : > { %3001 = vmatpush1.bf16.msra.mxu0 %v3736_v63  ;;  %3033 = vmatpush1.bf16.msra.mxu1 %v3741_v3 }
 0x375   : > { %3003 = vmatprep.subr.bf16.mxu0 %v3743_v5  ;;  %3035 = vmatprep.subr.bf16.mxu1 %v3752_v8 }
 0x378   : > { %3005 = vmatpush1.bf16.msra.mxu0 %v3764_v15  ;;  %3037 = vmatpush1.bf16.msra.mxu1 %v3769_v18 }
 0x379   : > { %3039 = vmatprep.subr.bf16.mxu0 %v3557_v23  ;;  %3071 = vmatprep.subr.bf16.mxu1 %v3564_v28 }
 0x42e   : > { %v1439_v42 = vpop.f32.mrb[22].mxu0  ;;  %v1510_v59 = vpop.f32.mrb[22].mxu1 }
 0x42f   : > { %v1515_v1 = vadd.f32 %v1439_v42, %v1369_v24  ;;  %v1441_v10 = vpop.f32.mrb[23].mxu0  ;;  %v1512_v36 = vpop.f32.mrb[23].mxu1  ;;  %v1517_v40 = vadd.f32 %v1510_v59, %v1371_v20 }
 0x430   : > { %v1516_v14 = vadd.f32 %v1441_v10, %v1370_v6  ;;  %v1518_v39 = vadd.f32 %v1512_v36, %v1372_v19 }
 0x431   : > { %v2662_v16 = vmul.f32 -1.442695, %v1515_v1 }
 0x432   : > { %v2663_v38 = vmul.f32 -1.442695, %v1516_v14  ;;  %v2664_v21 = vmul.f32 -1.442695, %v1518_v39 }
 0x433   : > { %3322 = vpow2.f32 %v2662_v16 }
 0x434   : > { %3324 = vpow2.f32 %v2663_v38  ;;  %v1577_v38 = vld [vmem:[%s1574_s23 + $0x10] sm:$0xff] }
 0x435   : > { %3326 = vpow2.f32 %v2664_v21  ;;  %v1576_v21 = vld [vmem:[%s1574_s23 + $0x8] sm:$0xff] }
 0x436   : > { %3328 = vtanh.f32 %v1517_v40 }
 0x43d   : > { %v3323_v22 = vpop.eup %3322 }
 0x43e   : > { %v3325_v30 = vpop.eup %3324  ;;  %v1522_v31 = vadd.f32 1.0, %v3323_v22  ;;  %v1578_v22 = vld [vmem:[%s1574_s23 + $0x18] sm:$0xff] }
 0x43f   : > { %v1528_v32 = vadd.f32 1.0, %v3325_v30  ;;  %v3327_v35 = vpop.eup %3326 }
 0x440   : > { %3330 = vrcp.f32 %v1522_v31  ;;  %v3329_v58 = vpop.eup %3328  ;;  %v1535_v50 = vadd.f32 1.0, %v3327_v35 }
 0x441   : > { %3332 = vrcp.f32 %v1528_v32 }
 0x442   : > { %3334 = vrcp.f32 %v1535_v50 }
 0x44a   : > { %v3331_v7 = vpop.eup %3330 }
 0x44b   : > { %v3333_v9 = vpop.eup %3332  ;;  %v1539_v2 = vmul.f32 %v3331_v7, %v3329_v58 }
 0x44c   : > { %v1538_v51 = vmul.f32 %v3333_v9, %v3997_v47  ;;  %v3335_v59 = vpop.eup %3334 }
 0x44e   : > { %v1540_v54 = vadd.f32 %v1539_v2, %v1538_v51 }
 0x450   : > { %3336 = vtanh.f32 %v1540_v54  ;;  %v1547_v55 = vsub.f32 %v1540_v54, %v3997_v47 }
 0x452   : > { %v1553_v24 = vmul.f32 %v1551_v56, %v1547_v55 }
 0x454   : > { %v4048_v42 = vadd.f32 %v1553_v24, %v3997_v47  ;;  %v1575_v47 = vld [vmem:[%s1574_s23] sm:$0xff]  ;;  %s2189_s23 = scalar_lea.vmem [#allocation4], %s2709_s11 }
 0x45a   : > { %v3337_v1 = vpop.eup %3336 }
 0x45b   : > { %v1542_v6 = vmul.f32 %v3337_v1, %v3335_v59 }
 0x45d   : > { %v1556_v10 = vsub.f32 %v1542_v6, %v4004_v57  ;;  %v1560_v36 = vmul.f32 %v1551_v56, %v1542_v6 }
 0x45f   : > { %v1557_v14 = vmul.f32 %v1556_v10, %v1551_v56  ;;  %1562 = vst [vmem:[%s1561_s10] sm:$0xff] %v1560_v36  ;;  %s2178_s10 = scalar_lea.vmem %s3872_s7, %s2682_s16 [#allocation5] }
 0x461   : > { %v4055_v16 = vadd.f32 %v1557_v14, %v4004_v57  ;;  %v1757_v14 = vpop.permute.xlu0 %1756 }
 0x463   : > { %1644 = vmatmul.mubr.f32.vlgmr.msra.gmra.mrb[24].mxu0 %v4055_v16  ;;  %1715 = vmatmul.mubr.f32.vlgmr.msra.gmra.mrb[24].mxu1 %v4055_v16 }
 0x464   : > { %3041 = vmatpush1.bf16.msra.mxu0 %v3562_v27  ;;  %3073 = vmatpush1.bf16.msra.mxu1 %v3573_v33 }
 0x465   : > { %3043 = vmatprep.subr.bf16.mxu0 %v3580_v37  ;;  %3075 = vmatprep.subr.bf16.mxu1 %v3587_v41 }
 0x466   : > { %1849 = vmatprep.mubr.f32.mxu0 %v3442_v0  ;;  %1920 = vmatprep.mubr.f32.mxu1 %v3442_v0 }
 0x468   : > { %3045 = vmatpush1.bf16.msra.mxu0 %v3594_v45  ;;  %3077 = vmatpush1.bf16.msra.mxu1 %v3600_v48 }
 0x469   : > { %3047 = vmatprep.subr.bf16.mxu0 %v3602_v49  ;;  %3079 = vmatprep.subr.bf16.mxu1 %v3609_v53 }
 0x46c   : > { %3049 = vmatpush1.bf16.msra.mxu0 %v3623_v60  ;;  %3081 = vmatpush1.bf16.msra.mxu1 %v3627_v61 }
 0x46d   : > { %3051 = vmatprep.subr.bf16.mxu0 %v3629_v62  ;;  %3083 = vmatprep.subr.bf16.mxu1 %v3636_v4 }
 0x470   : > { %3053 = vmatpush1.bf16.msra.mxu0 %v3650_v11  ;;  %3085 = vmatpush1.bf16.msra.mxu1 %v3654_v12 }
 0x471   : > { %3055 = vmatprep.subr.bf16.mxu0 %v3656_v13  ;;  %3087 = vmatprep.subr.bf16.mxu1 %v3663_v17 }
 0x474   : > { %3057 = vmatpush1.bf16.msra.mxu0 %v3677_v25  ;;  %3089 = vmatpush1.bf16.msra.mxu1 %v3681_v26 }
 0x475   : > { %3059 = vmatprep.subr.bf16.mxu0 %v3683_v29  ;;  %3091 = vmatprep.subr.bf16.mxu1 %v3691_v34 }
 0x478   : > { %3061 = vmatpush1.bf16.msra.mxu0 %v3706_v43  ;;  %3093 = vmatpush1.bf16.msra.mxu1 %v3710_v44 }
 0x479   : > { %3063 = vmatprep.subr.bf16.mxu0 %v3712_v46  ;;  %3095 = vmatprep.subr.bf16.mxu1 %v3722_v52 }
 0x47c   : > { %3065 = vmatpush1.bf16.msra.mxu0 %v3736_v63  ;;  %3097 = vmatpush1.bf16.msra.mxu1 %v3741_v3 }
 0x47d   : > { %3067 = vmatprep.subr.bf16.mxu0 %v3743_v5  ;;  %3099 = vmatprep.subr.bf16.mxu1 %v3752_v8 }
 0x480   : > { %3069 = vmatpush1.bf16.msra.mxu0 %v3764_v15  ;;  %3101 = vmatpush1.bf16.msra.mxu1 %v3769_v18 }
 0x481   : > { %3103 = vmatprep.subr.bf16.mxu0 %v3557_v23  ;;  %3135 = vmatprep.subr.bf16.mxu1 %v3564_v28 }
 0x536   : > { %v1645_v57 = vpop.f32.mrb[24].mxu0  ;;  %v1716_v19 = vpop.f32.mrb[24].mxu1 }
 0x537   : > { %v1721_v39 = vadd.f32 %v1645_v57, %v1575_v47  ;;  %v1723_v20 = vadd.f32 %v1716_v19, %v1577_v38  ;;  %v1647_v40 = vpop.f32.mrb[25].mxu0  ;;  %v1718_v30 = vpop.f32.mrb[25].mxu1 }
 0x538   : > { %v1722_v31 = vadd.f32 %v1647_v40, %v1576_v21  ;;  %v1724_v32 = vadd.f32 %v1718_v30, %v1578_v22 }
 0x539   : > { %v2670_v35 = vmul.f32 -1.442695, %v1721_v39 }
 0x53a   : > { %v2671_v58 = vmul.f32 -1.442695, %v1722_v31  ;;  %v2672_v7 = vmul.f32 -1.442695, %v1724_v32  ;;  %v1782_v32 = vld [vmem:[%s1780_s14 + $0x8] sm:$0xff] }
 0x53b   : > { %3338 = vpow2.f32 %v2670_v35 }
 0x53c   : > { %3340 = vpow2.f32 %v2671_v58 }
 0x53d   : > { %3342 = vpow2.f32 %v2672_v7 }
 0x53e   : > { %3344 = vtanh.f32 %v1723_v20 }
 0x545   : > { %v3339_v9 = vpop.eup %3338 }
 0x546   : > { %v3341_v2 = vpop.eup %3340  ;;  %v1728_v50 = vadd.f32 1.0, %v3339_v9 }
 0x547   : > { %v1734_v51 = vadd.f32 1.0, %v3341_v2  ;;  %v3343_v54 = vpop.eup %3342 }
 0x548   : > { %3346 = vrcp.f32 %v1728_v50  ;;  %v3345_v55 = vpop.eup %3344  ;;  %v1741_v1 = vadd.f32 1.0, %v3343_v54 }
 0x549   : > { %3348 = vrcp.f32 %v1734_v51 }
 0x54a   : > { %3350 = vrcp.f32 %v1741_v1 }
 0x552   : > { %v3347_v56 = vpop.eup %3346 }
 0x553   : > { %v3349_v24 = vpop.eup %3348  ;;  %v1745_v59 = vmul.f32 %v3347_v56, %v3345_v55 }
 0x554   : > { %v1744_v6 = vmul.f32 %v3349_v24, %v4048_v42  ;;  %v3351_v38 = vpop.eup %3350 }
 0x556   : > { %v1746_v10 = vadd.f32 %v1745_v59, %v1744_v6 }
 0x558   : > { %3352 = vtanh.f32 %v1746_v10  ;;  %v1753_v36 = vsub.f32 %v1746_v10, %v4048_v42 }
 0x55a   : > { %v1759_v47 = vmul.f32 %v1757_v14, %v1753_v36 }
 0x55c   : > { %v4099_v57 = vadd.f32 %v1759_v47, %v4048_v42  ;;  %v1781_v42 = vld [vmem:[%s1780_s14] sm:$0xff] }
 0x562   : > { %v3353_v19 = vpop.eup %3352 }
 0x563   : > { %v1748_v39 = vmul.f32 %v3353_v19, %v3351_v38 }
 0x565   : > { %v1762_v20 = vsub.f32 %v1748_v39, %v4055_v16  ;;  %v1766_v21 = vmul.f32 %v1757_v14, %v1748_v39 }
 0x567   : > { %v1763_v40 = vmul.f32 %v1762_v20, %v1757_v14  ;;  %1768 = vst [vmem:[%s1767_s17] sm:$0xff] %v1766_v21  ;;  %v1963_v20 = vpop.permute.xlu1 %1962  ;;  %s2697_s17 = sshll.u32 (%p3506_p3), %s3432_s20, 3 }
 0x568   : > { %s2401_s12 = scalar_lea.vmem (%p3506_p3), %s4244_s5, %s2697_s17 }
 0x569   : > { %v4106_v22 = vadd.f32 %v1763_v40, %v4055_v16 }
 0x56b   : > { %1850 = vmatmul.mubr.f32.vlgmr.msra.gmra.mrb[26].mxu0 %v4106_v22  ;;  %1921 = vmatmul.mubr.f32.vlgmr.msra.gmra.mrb[26].mxu1 %v4106_v22 }
 0x56c   : > { %3105 = vmatpush1.bf16.msra.mxu0 %v3562_v27  ;;  %3137 = vmatpush1.bf16.msra.mxu1 %v3573_v33 }
 0x56d   : > { %3107 = vmatprep.subr.bf16.mxu0 %v3580_v37  ;;  %3139 = vmatprep.subr.bf16.mxu1 %v3587_v41 }
 0x56e   : > { %2054 = vmatprep.mubr.f32.mxu0 %v3442_v0  ;;  %2125 = vmatprep.mubr.f32.mxu1 %v3442_v0 }
 0x570   : > { %3109 = vmatpush1.bf16.msra.mxu0 %v3594_v45  ;;  %3141 = vmatpush1.bf16.msra.mxu1 %v3600_v48 }
 0x571   : > { %3111 = vmatprep.subr.bf16.mxu0 %v3602_v49  ;;  %3143 = vmatprep.subr.bf16.mxu1 %v3609_v53 }
 0x574   : > { %3113 = vmatpush1.bf16.msra.mxu0 %v3623_v60  ;;  %3145 = vmatpush1.bf16.msra.mxu1 %v3627_v61 }
 0x575   : > { %3115 = vmatprep.subr.bf16.mxu0 %v3629_v62  ;;  %3147 = vmatprep.subr.bf16.mxu1 %v3636_v4 }
 0x578   : > { %3117 = vmatpush1.bf16.msra.mxu0 %v3650_v11  ;;  %3149 = vmatpush1.bf16.msra.mxu1 %v3654_v12 }
 0x579   : > { %3119 = vmatprep.subr.bf16.mxu0 %v3656_v13  ;;  %3151 = vmatprep.subr.bf16.mxu1 %v3663_v17 }
 0x57c   : > { %3121 = vmatpush1.bf16.msra.mxu0 %v3677_v25  ;;  %3153 = vmatpush1.bf16.msra.mxu1 %v3681_v26 }
 0x57d   : > { %3123 = vmatprep.subr.bf16.mxu0 %v3683_v29  ;;  %3155 = vmatprep.subr.bf16.mxu1 %v3691_v34 }
 0x580   : > { %3125 = vmatpush1.bf16.msra.mxu0 %v3706_v43  ;;  %3157 = vmatpush1.bf16.msra.mxu1 %v3710_v44 }
 0x581   : > { %3127 = vmatprep.subr.bf16.mxu0 %v3712_v46  ;;  %3159 = vmatprep.subr.bf16.mxu1 %v3722_v52 }
 0x584   : > { %3129 = vmatpush1.bf16.msra.mxu0 %v3736_v63  ;;  %3161 = vmatpush1.bf16.msra.mxu1 %v3741_v3 }
 0x585   : > { %3131 = vmatprep.subr.bf16.mxu0 %v3743_v5  ;;  %3163 = vmatprep.subr.bf16.mxu1 %v3752_v8 }
 0x588   : > { %3133 = vmatpush1.bf16.msra.mxu0 %v3764_v15  ;;  %3165 = vmatpush1.bf16.msra.mxu1 %v3769_v18 }
 0x589   : > { %3167 = vmatprep.subr.bf16.mxu0 %v3557_v23  ;;  %3199 = vmatprep.subr.bf16.mxu1 %v3564_v28  ;;  %v1784_v23 = vld [vmem:[%s1780_s14 + $0x18] sm:$0xff]  ;;  %v1783_v28 = vld [vmem:[%s1780_s14 + $0x10] sm:$0xff] }
 0x63e   : > { %v1851_v16 = vpop.f32.mrb[26].mxu0  ;;  %v1922_v30 = vpop.f32.mrb[26].mxu1 }
 0x63f   : > { %v1927_v31 = vadd.f32 %v1851_v16, %v1781_v42  ;;  %v1853_v35 = vpop.f32.mrb[27].mxu0  ;;  %v1924_v58 = vpop.f32.mrb[27].mxu1  ;;  %v1929_v54 = vadd.f32 %v1922_v30, %v1783_v28  ;;  %v2190_v28 = vld [vmem:[%s2189_s23] sm:$0xff] }
 0x640   : > { %v1928_v7 = vadd.f32 %v1853_v35, %v1782_v32  ;;  %v1930_v50 = vadd.f32 %v1924_v58, %v1784_v23 }
 0x641   : > { %v2678_v9 = vmul.f32 -1.442695, %v1927_v31 }
 0x642   : > { %v2679_v2 = vmul.f32 -1.442695, %v1928_v7  ;;  %v2680_v51 = vmul.f32 -1.442695, %v1930_v50 }
 0x643   : > { %3354 = vpow2.f32 %v2678_v9 }
 0x644   : > { %3356 = vpow2.f32 %v2679_v2 }
 0x645   : > { %3358 = vpow2.f32 %v2680_v51 }
 0x646   : > { %3360 = vtanh.f32 %v1929_v54 }
 0x64d   : > { %v3355_v55 = vpop.eup %3354 }
 0x64e   : > { %v3357_v56 = vpop.eup %3356  ;;  %v1934_v24 = vadd.f32 1.0, %v3355_v55 }
 0x64f   : > { %v1940_v59 = vadd.f32 1.0, %v3357_v56  ;;  %v3359_v1 = vpop.eup %3358  ;;  %v2191_v56 = vld [vmem:[%s2189_s23 + $0x8] sm:$0xff] }
 0x650   : > { %3362 = vrcp.f32 %v1934_v24  ;;  %v3361_v6 = vpop.eup %3360  ;;  %v1947_v47 = vadd.f32 1.0, %v3359_v1 }
 0x651   : > { %3364 = vrcp.f32 %v1940_v59 }
 0x652   : > { %3366 = vrcp.f32 %v1947_v47  ;;  %v2192_v47 = vld [vmem:[%s2189_s23 + $0x10] sm:$0xff] }
 0x65a   : > { %v3363_v10 = vpop.eup %3362 }
 0x65b   : > { %v3365_v36 = vpop.eup %3364  ;;  %v1951_v14 = vmul.f32 %v3363_v10, %v3361_v6 }
 0x65c   : > { %v1950_v38 = vmul.f32 %v3365_v36, %v4099_v57  ;;  %v3367_v42 = vpop.eup %3366  ;;  %v2193_v36 = vld [vmem:[%s2189_s23 + $0x18] sm:$0xff] }
 0x65e   : > { %v1952_v19 = vadd.f32 %v1951_v14, %v1950_v38 }
 0x660   : > { %3368 = vtanh.f32 %v1952_v19  ;;  %v1959_v39 = vsub.f32 %v1952_v19, %v4099_v57 }
 0x662   : > { %v1965_v21 = vmul.f32 %v1963_v20, %v1959_v39 }
 0x664   : > { %v4150_v40 = vadd.f32 %v1965_v21, %v4099_v57 }
 0x66a   : > { %v3369_v16 = vpop.eup %3368 }
 0x66b   : > { %v1954_v30 = vmul.f32 %v3369_v16, %v3367_v42 }
 0x66d   : > { %v1968_v31 = vsub.f32 %v1954_v30, %v4106_v22  ;;  %v1972_v32 = vmul.f32 %v1963_v20, %v1954_v30 }
 0x66f   : > { %v1969_v35 = vmul.f32 %v1968_v31, %v1963_v20  ;;  %1974 = vst [vmem:[%s1973_s30] sm:$0xff] %v1972_v32 }
 0x671   : > { %v4157_v58 = vadd.f32 %v1969_v35, %v4106_v22 }
 0x673   : > { %2055 = vmatmul.mubr.f32.vlgmr.msra.gmra.mrb[28].mxu0 %v4157_v58  ;;  %2126 = vmatmul.mubr.f32.vlgmr.msra.gmra.mrb[28].mxu1 %v4157_v58 }
 0x674   : > { %3169 = vmatpush1.bf16.msra.mxu0 %v3562_v27  ;;  %3201 = vmatpush1.bf16.msra.mxu1 %v3573_v33  ;;  %v1988_v33 = vld [vmem:[%s1985_s6 + $0x10] sm:$0xff] }
 0x675   : > { %3171 = vmatprep.subr.bf16.mxu0 %v3580_v37  ;;  %3203 = vmatprep.subr.bf16.mxu1 %v3587_v41 }
 0x676   : > { %2258 = vmatprep.mubr.f32.mxu0 %v3442_v0  ;;  %2329 = vmatprep.mubr.f32.mxu1 %v3442_v0  ;;  %v1986_v0 = vld [vmem:[%s1985_s6] sm:$0xff] }
 0x678   : > { %3173 = vmatpush1.bf16.msra.mxu0 %v3594_v45  ;;  %3205 = vmatpush1.bf16.msra.mxu1 %v3600_v48  ;;  %v1987_v48 = vld [vmem:[%s1985_s6 + $0x8] sm:$0xff] }
 0x679   : > { %3175 = vmatprep.subr.bf16.mxu0 %v3602_v49  ;;  %3207 = vmatprep.subr.bf16.mxu1 %v3609_v53  ;;  %v1989_v53 = vld [vmem:[%s1985_s6 + $0x18] sm:$0xff] }
 0x67c   : > { %3177 = vmatpush1.bf16.msra.mxu0 %v3623_v60  ;;  %3209 = vmatpush1.bf16.msra.mxu1 %v3627_v61 }
 0x67d   : > { %3179 = vmatprep.subr.bf16.mxu0 %v3629_v62  ;;  %3211 = vmatprep.subr.bf16.mxu1 %v3636_v4 }
 0x680   : > { %3181 = vmatpush1.bf16.msra.mxu0 %v3650_v11  ;;  %3213 = vmatpush1.bf16.msra.mxu1 %v3654_v12 }
 0x681   : > { %3183 = vmatprep.subr.bf16.mxu0 %v3656_v13  ;;  %3215 = vmatprep.subr.bf16.mxu1 %v3663_v17 }
 0x684   : > { %3185 = vmatpush1.bf16.msra.mxu0 %v3677_v25  ;;  %3217 = vmatpush1.bf16.msra.mxu1 %v3681_v26 }
 0x685   : > { %3187 = vmatprep.subr.bf16.mxu0 %v3683_v29  ;;  %3219 = vmatprep.subr.bf16.mxu1 %v3691_v34 }
 0x688   : > { %3189 = vmatpush1.bf16.msra.mxu0 %v3706_v43  ;;  %3221 = vmatpush1.bf16.msra.mxu1 %v3710_v44 }
 0x689   : > { %3191 = vmatprep.subr.bf16.mxu0 %v3712_v46  ;;  %3223 = vmatprep.subr.bf16.mxu1 %v3722_v52 }
 0x68c   : > { %3193 = vmatpush1.bf16.msra.mxu0 %v3736_v63  ;;  %3225 = vmatpush1.bf16.msra.mxu1 %v3741_v3 }
 0x68d   : > { %3195 = vmatprep.subr.bf16.mxu0 %v3743_v5  ;;  %3227 = vmatprep.subr.bf16.mxu1 %v3752_v8  ;;  %v2168_v8 = vpop.permute.xlu0 %2167 }
 0x690   : > { %3197 = vmatpush1.bf16.msra.mxu0 %v3764_v15  ;;  %3229 = vmatpush1.bf16.msra.mxu1 %v3769_v18 }
 0x746   : > { %v2056_v27 = vpop.f32.mrb[28].mxu0  ;;  %v2127_v37 = vpop.f32.mrb[28].mxu1 }
 0x747   : > { %v2132_v41 = vadd.f32 %v2056_v27, %v1986_v0  ;;  %v2134_v45 = vadd.f32 %v2127_v37, %v1988_v33  ;;  %v2058_v49 = vpop.f32.mrb[29].mxu0  ;;  %v2129_v60 = vpop.f32.mrb[29].mxu1 }
 0x748   : > { %v2133_v61 = vadd.f32 %v2058_v49, %v1987_v48  ;;  %v2135_v62 = vadd.f32 %v2129_v60, %v1989_v53 }
 0x749   : > { %v2685_v4 = vmul.f32 -1.442695, %v2132_v41  ;;  %v2372_v41 = vpop.permute.xlu1 %2371 }
 0x74a   : > { %v2686_v11 = vmul.f32 -1.442695, %v2133_v61  ;;  %v2687_v12 = vmul.f32 -1.442695, %v2135_v62 }
 0x74b   : > { %3370 = vpow2.f32 %v2685_v4 }
 0x74c   : > { %3372 = vpow2.f32 %v2686_v11 }
 0x74d   : > { %3374 = vpow2.f32 %v2687_v12 }
 0x74e   : > { %3376 = vtanh.f32 %v2134_v45 }
 0x755   : > { %v3371_v13 = vpop.eup %3370 }
 0x756   : > { %v3373_v17 = vpop.eup %3372  ;;  %v2139_v25 = vadd.f32 1.0, %v3371_v13 }
 0x757   : > { %v2145_v26 = vadd.f32 1.0, %v3373_v17  ;;  %v3375_v29 = vpop.eup %3374 }
 0x758   : > { %3378 = vrcp.f32 %v2139_v25  ;;  %v3377_v34 = vpop.eup %3376  ;;  %v2152_v52 = vadd.f32 1.0, %v3375_v29 }
 0x759   : > { %3380 = vrcp.f32 %v2145_v26 }
 0x75a   : > { %3382 = vrcp.f32 %v2152_v52 }
 0x762   : > { %v3379_v43 = vpop.eup %3378 }
 0x763   : > { %v3381_v44 = vpop.eup %3380  ;;  %v2156_v46 = vmul.f32 %v3379_v43, %v3377_v34 }
 0x764   : > { %v2155_v63 = vmul.f32 %v3381_v44, %v4150_v40  ;;  %v3383_v57 = vpop.eup %3382 }
 0x766   : > { %v2157_v3 = vadd.f32 %v2156_v46, %v2155_v63 }
 0x768   : > { %3384 = vtanh.f32 %v2157_v3  ;;  %v2164_v5 = vsub.f32 %v2157_v3, %v4150_v40 }
 0x76a   : > { %v2170_v15 = vmul.f32 %v2168_v8, %v2164_v5 }
 0x76c   : > { %v2171_v18 = vadd.f32 %v2170_v15, %v4150_v40 }
 0x772   : > { %v3385_v22 = vpop.eup %3384 }
 0x773   : > { %v2159_v7 = vmul.f32 %v3385_v22, %v3383_v57 }
 0x775   : > { %v2173_v9 = vsub.f32 %v2159_v7, %v4157_v58  ;;  %v2177_v2 = vmul.f32 %v2168_v8, %v2159_v7 }
 0x777   : > { %v2174_v23 = vmul.f32 %v2173_v9, %v2168_v8  ;;  %2179 = vst [vmem:[%s2178_s10] sm:$0xff] %v2177_v2 }
 0x779   : > { %v2175_v50 = vadd.f32 %v2174_v23, %v4157_v58 }
 0x77b   : > { %2259 = vmatmul.mubr.f32.vlgmr.msra.gmra.mrb[30].mxu0 %v2175_v50  ;;  %2330 = vmatmul.mubr.f32.vlgmr.msra.gmra.mrb[30].mxu1 %v2175_v50 }
 0x84e   : > { %v2260_v51 = vpop.f32.mrb[30].mxu0  ;;  %v2331_v54 = vpop.f32.mrb[30].mxu1 }
 0x84f   : > { %v2336_v55 = vadd.f32 %v2260_v51, %v2190_v28  ;;  %v2262_v24 = vpop.f32.mrb[31].mxu0  ;;  %v2333_v59 = vpop.f32.mrb[31].mxu1  ;;  %v2338_v19 = vadd.f32 %v2331_v54, %v2192_v47 }
 0x850   : > { %v2337_v1 = vadd.f32 %v2262_v24, %v2191_v56  ;;  %v2339_v14 = vadd.f32 %v2333_v59, %v2193_v36 }
 0x851   : > { %v2691_v6 = vmul.f32 -1.442695, %v2336_v55 }
 0x852   : > { %v2692_v10 = vmul.f32 -1.442695, %v2337_v1  ;;  %v2693_v38 = vmul.f32 -1.442695, %v2339_v14 }
 0x853   : > { %3386 = vpow2.f32 %v2691_v6 }
 0x854   : > { %3388 = vpow2.f32 %v2692_v10 }
 0x855   : > { %3390 = vpow2.f32 %v2693_v38 }
 0x856   : > { %3392 = vtanh.f32 %v2338_v19 }
 0x85d   : > { %v3387_v39 = vpop.eup %3386 }
 0x85e   : > { %v3389_v20 = vpop.eup %3388  ;;  %v2343_v21 = vadd.f32 1.0, %v3387_v39 }
 0x85f   : > { %v2349_v40 = vadd.f32 1.0, %v3389_v20  ;;  %v3391_v42 = vpop.eup %3390 }
 0x860   : > { %3394 = vrcp.f32 %v2343_v21  ;;  %v3393_v16 = vpop.eup %3392  ;;  %v2356_v35 = vadd.f32 1.0, %v3391_v42 }
 0x861   : > { %3396 = vrcp.f32 %v2349_v40 }
 0x862   : > { %3398 = vrcp.f32 %v2356_v35 }
 0x86a   : > { %v3395_v30 = vpop.eup %3394 }
 0x86b   : > { %v3397_v31 = vpop.eup %3396  ;;  %v2360_v32 = vmul.f32 %v3395_v30, %v3393_v16 }
 0x86c   : > { %v2359_v58 = vmul.f32 %v3397_v31, %v2171_v18  ;;  %v3399_v27 = vpop.eup %3398 }
 0x86e   : > { %v2361_v0 = vadd.f32 %v2360_v32, %v2359_v58 }
 0x870   : > { %3400 = vtanh.f32 %v2361_v0 }
 0x879   : > { %2391 = sbr.rel (!%p3506_p3) target bundleno = 2188 (0x88c), region = 48 }
 0x87a   : > { %v3401_v33 = vpop.eup %3400 }
 0x87b   : > { %v2363_v37 = vmul.f32 %v3401_v33, %v3399_v27 }
 0x87d   : > { %v2381_v45 = vmul.f32 %v2372_v41, %v2363_v37 }
 0x87f   : > { %2384 = vst [vmem:[%s2383_s9] sm:$0xff] %v2381_v45 }
 0x886   : > { %v2443_v48 = vld [vmem:[%s3872_s7] sm:$0xff]  ;;  %v2445_v49 = vld [vmem:[%s3872_s7 + $0x8] sm:$0xff]  ;;  %v2447_v53 = vld [vmem:[%s3872_s7 + $0x10] sm:$0xff] }
 0x887   : > { %v2449_v60 = vld [vmem:[%s3872_s7 + $0x18] sm:$0xff]  ;;  %v2451_v61 = vld [vmem:[%s3872_s7 + $0x20] sm:$0xff]  ;;  %v2453_v62 = vld [vmem:[%s3872_s7 + $0x28] sm:$0xff]  ;;  %2444 = vst [vmem:[%s2401_s12] sm:$0xff] %v2443_v48 }
 0x888   : > { %2446 = vst [vmem:[%s2401_s12 + $0x10] sm:$0xff] %v2445_v49  ;;  %2448 = vst [vmem:[%s2401_s12 + $0x20] sm:$0xff] %v2447_v53  ;;  %v2455_v4 = vld [vmem:[%s3872_s7 + $0x30] sm:$0xff]  ;;  %v2457_v11 = vld [vmem:[%s3872_s7 + $0x38] sm:$0xff] }
 0x889   : > { %2450 = vst [vmem:[%s2401_s12 + $0x30] sm:$0xff] %v2449_v60  ;;  %2452 = vst [vmem:[%s2401_s12 + $0x40] sm:$0xff] %v2451_v61 }
 0x88a   : > { %2454 = vst [vmem:[%s2401_s12 + $0x50] sm:$0xff] %v2453_v62  ;;  %2456 = vst [vmem:[%s2401_s12 + $0x60] sm:$0xff] %v2455_v4 }
 0x88b   : > { %2458 = vst [vmem:[%s2401_s12 + $0x70] sm:$0xff] %v2457_v11 }
 0x88c PF: > { %s15_s22 = sadd.s32 1, %s3440_s22   ;;  %s4246_s18 = smov %s3428_s19 }
 0x88d   : > { %p12_p9 = scmp.ge.s32.totalorder %s15_s22, 4   ;;  %s4247_s19 = smov %s3515_s28 }
 0x88e   : > { %s4248_s20 = smov %s3436_s21  ;;  %s4249_s21 = smov %s4251_s24 }
 0x88f   :  { %14 = sbr.rel (!%p12_p9) target bundleno = 3 (0x3), region = 137 }

// kernel: large_word_rnn_forward.6
= control target key start
LH: loop header
LB: loop body
LE: loop exit
PB: predicated region body
PF: predicated region fallthrough
CT: control target
= control target key end

     0   :  { %s3685_s18 = smov 0   ;;  %s3687_s19 = smov 0   ;;  %s4577_s0 = inlined_call_operand.vmem [shape: s32[8,1], index: 0, kind: input, shape index: {}]   ;;  %s4578_s1 = inlined_call_operand.vmem [shape: f32[8,8,256], index: 1, kind: input, shape index: {}]   ;;  %s4579_s2 = inlined_call_operand.vmem [shape: f32[2,256,512], index: 2, kind: input, shape index: {}]   ;;  %s4580_s3 = inlined_call_operand.vmem [shape: f32[2,128,512], index: 3, kind: input, shape index: {}]   ;;  %s4581_s4 = inlined_call_operand.vmem [shape: f32[2,1,512], index: 4, kind: input, shape index: {}]   ;;  %s4582_s5 = inlined_call_operand.vmem [shape: f32[8,8,256], index: 5, kind: output, shape index: {}]  }
   0x1   :  { %s3689_s20 = smov 0   ;;  %s3691_s21 = smov 0  }
   0x2   :  { %s3693_s22 = smov 0  }
   0x3 LB: > { %s2714_s23 = sadd.s32 4294967295, %s3651_s22   ;;  %s27_s24 = sadd.s32 1, %s3647_s21  ;;  %s3651_s22 = sphi %s3693_s22, %s15_s22   ;;  %s3647_s21 = sphi %s3691_s21, %s4589_s21   ;;  %s3643_s20 = sphi %s3689_s20, %s4588_s20   ;;  %s3639_s19 = sphi %s3687_s19, %s4587_s19   ;;  %s3635_s18 = sphi %s3685_s18, %s4586_s18  }
   0x4   : > { %p29_p0 = scmp.ge.s32.totalorder %s27_s24, 2  ;;  %s181_s25 = sadd.s32 1, %s3639_s19 }
   0x5   : > { %p191_p1 = scmp.ne.s32.totalorder %s3639_s19, %s3635_s18  ;;  %p192_p2 = scmp.eq.s32.totalorder %s2714_s23, 1 }
   0x6   : > { %s4591_s24 = smov (%p29_p0, %s27_s24), 0  ;;  %p2719_p4 = scmp.ge.s32.totalorder %s3651_s22, 1 }
   0x7   : > { %p3717_p3 = por %p192_p2, %p191_p1  ;;  %s177_s27 = ssub.s32 %s3647_s21, %s4591_s24 }
   0x8   : > { %p262_p5 = scmp.lt.s32.totalorder %s3651_s22, 3  ;;  %p179_p6 = scmp.eq.s32.totalorder %s177_s27, 0 }
   0xa   : > { %p263_p7 = pnand %p2719_p4, %p262_p5 }
   0xb   : > { %s3726_s28 = scalar_select %p179_p6, %s3639_s19, %s181_s25  }
   0xc   : > { %266 = sbr.rel (%p263_p7) target bundleno = 2248 (0x8c8), region = 40  ;;  %p326_p8 = scmp.lt.s32.totalorder (!%p263_p7), %s3643_s20, 1  ;;  %v353_v0 = vld [vmem:[%s4578_s1 + $0x8] sm:$0xff] (!%p263_p7)  ;;  %v3653_v1 = vmov (!%p263_p7), 0   ;;  %v3749_v3 = vld [vmem:[%s4577_s0] sm:$0xff] (!%p263_p7)  ;;  %v3654_v11 = vmov (!%p263_p7), 0.0  }
   0xd   : > { %582 = vmatprep.mubr.f32.mxu0 (!%p263_p7), %v353_v0  ;;  %695 = vmatprep.mubr.f32.mxu1 (!%p263_p7), %v353_v0  ;;  %s846_s6 = smul.u32 (!%p263_p7), 7, %s3643_s20  ;;  %s3737_s8 = ssub.s32 (!%p263_p7), 1, %s3643_s20 }
   0xe   : > { %3482 = vset.pattern.permute.xlu0 (!%p263_p7), %v3653_v1  ;;  %3483 = vset.pattern.permute.xlu1 (!%p263_p7), %v3653_v1  ;;  %s1052_s9 = smul.u32 (!%p263_p7), 6, %s3643_s20  ;;  %s2756_s17 = sshll.u32 (!%p263_p7), %s3737_s8, 2 }
   0xf   : > { %v1031_v2 = vstv (!%p263_p7), %s846_s6  ;;  %s1670_s23 = smul.u32 (!%p263_p7), 3, %s3643_s20  ;;  %s306_s14 = sand.u32 (!%p263_p7), 1, %s3635_s18  }
  0x10   : > { %vm1032_vm0 = vcmp.lt.s32.totalorder (!%p263_p7), %v1031_v2, %v3749_v3  ;;  %s3756_s16 = sadd.s32 (!%p263_p7), %s1052_s9, %s3737_s8  ;;  %s2081_s25 = smul.u32 (!%p263_p7), 6, %s3737_s8 }
  0x11   : > { %v2731_v12 = vsel (!%p263_p7), %vm1032_vm0, 1.0, %v3654_v11  ;;  %v1237_v13 = vstv (!%p263_p7), %s3756_s16  ;;  %s3792_s27 = sadd.s32 (!%p263_p7), %s2756_s17, %s1670_s23  ;;  %s2720_s15 = sshll.u32 (!%p263_p7), %s306_s14, 6 }
  0x12   : > { %1038 = vperm.xlu0 (!%p263_p7), %3482, %v2731_v12   ;;  %vm1238_vm1 = vcmp.lt.s32.totalorder (!%p263_p7), %v1237_v13, %v3749_v3  ;;  %v1855_v55 = vstv (!%p263_p7), %s3792_s27  ;;  %s3799_s29 = sadd.s32 (!%p263_p7), %s3643_s20, %s2081_s25  ;;  %s4211_s17 = scalar_lea.vmem (!%p263_p7), [#allocation5], %s2720_s15 }
  0x13   : > { %s3734_s7 = scalar_select %p326_p8, %s3643_s20, 1  ;;  %v2739_v28 = vsel %vm1238_vm1, 1.0, %v3654_v11  ;;  %vm1856_vm2 = vcmp.lt.s32.totalorder %v1855_v55, %v3749_v3  ;;  %v2266_v59 = vstv %s3799_s29 }
  0x14   : > { %v2763_v61 = vsel %vm1856_vm2, 1.0, %v3654_v11  ;;  %vm3808_vm3 = vcmp.lt.s32.totalorder %v2266_v59, %v3749_v3  ;;  %s1258_s18 = smul.u32 5, %s3643_s20 }
  0x15   : > { %s2790_s10 = sshll.u32 %s3734_s7, 10  ;;  %s2791_s30 = sshll.u32 %s3734_s7, 9 }
  0x16   : > { %s3744_s13 = scalar_lea.vmem %s4579_s2, %s2790_s10  ;;  %1244 = vperm.xlu0 %3482, %v2739_v28   ;;  %s3907_s10 = scalar_lea.vmem %s4580_s3, %s2791_s30 }
  0x17   : > { %v369_v4 = vld [vmem:[%s3744_s13 + $0x8] sm:$0xff]  ;;  %v371_v6 = vld [vmem:[%s3744_s13 + $0x18] sm:$0xff]  ;;  %v368_v9 = vld [vmem:[%s3744_s13] sm:$0xff]  ;;  %s1463_s25 = smul.u32 3, %s3737_s8  ;;  %s2748_s30 = sshll.u32 %s3643_s20, 2 }
  0x18   : > { %v373_v5 = vld [vmem:[%s3744_s13 + $0x28] sm:$0xff]  ;;  %v375_v8 = vld [vmem:[%s3744_s13 + $0x38] sm:$0xff]  ;;  %v372_v10 = vld [vmem:[%s3744_s13 + $0x20] sm:$0xff]  ;;  %s1875_s6 = smul.u32 5, %s3737_s8 }
  0x19   : > { %v2800_v7 = vpack.c.bf16 %v373_v5, %v369_v4  ;;  %v2864_v14 = vpack.c.bf16 %v375_v8, %v371_v6  ;;  %v2802_v15 = vpack.c.bf16 %v372_v10, %v368_v9  ;;  %v370_v16 = vld [vmem:[%s3744_s13 + $0x10] sm:$0xff]  ;;  %v377_v18 = vld [vmem:[%s3744_s13 + $0x48] sm:$0xff]  ;;  %v379_v21 = vld [vmem:[%s3744_s13 + $0x58] sm:$0xff]  ;;  %v2778_v10 = vsel %vm3808_vm3, 1.0, %v3654_v11  ;;  %s2286_s15 = smul.u32 7, %s3737_s8 }
  0x1a   : > { %v374_v17 = vld [vmem:[%s3744_s13 + $0x30] sm:$0xff]  ;;  %v381_v20 = vld [vmem:[%s3744_s13 + $0x68] sm:$0xff]  ;;  %v383_v22 = vld [vmem:[%s3744_s13 + $0x78] sm:$0xff]  ;;  %1862 = vperm.xlu0 %3482, %v2763_v61  }
  0x1b   : > { %2801 = vmatprep.subr.bf16.mxu0 %v2800_v7  ;;  %v2866_v19 = vpack.c.bf16 %v374_v17, %v370_v16  ;;  %2865 = vmatprep.subr.bf16.mxu1 %v2864_v14  ;;  %v2804_v23 = vpack.c.bf16 %v381_v20, %v377_v18  ;;  %v2868_v24 = vpack.c.bf16 %v383_v22, %v379_v21  ;;  %v376_v25 = vld [vmem:[%s3744_s13 + $0x40] sm:$0xff]  ;;  %v378_v27 = vld [vmem:[%s3744_s13 + $0x50] sm:$0xff]  ;;  %v385_v31 = vld [vmem:[%s3744_s13 + $0x88] sm:$0xff] }
  0x1c   : > { %2803 = vmatpush1.bf16.msra.mxu0 %v2802_v15  ;;  %v380_v26 = vld [vmem:[%s3744_s13 + $0x60] sm:$0xff]  ;;  %v382_v30 = vld [vmem:[%s3744_s13 + $0x70] sm:$0xff]  ;;  %v389_v32 = vld [vmem:[%s3744_s13 + $0xa8] sm:$0xff] }
  0x1d   : > { %2867 = vmatpush1.bf16.msra.mxu1 %v2866_v19  ;;  %v2806_v29 = vpack.c.bf16 %v380_v26, %v376_v25  ;;  %2805 = vmatprep.subr.bf16.mxu0 %v2804_v23  ;;  %v2870_v33 = vpack.c.bf16 %v382_v30, %v378_v27  ;;  %v2808_v34 = vpack.c.bf16 %v389_v32, %v385_v31  ;;  %v387_v35 = vld [vmem:[%s3744_s13 + $0x98] sm:$0xff]  ;;  %v384_v37 = vld [vmem:[%s3744_s13 + $0x80] sm:$0xff]  ;;  %v386_v40 = vld [vmem:[%s3744_s13 + $0x90] sm:$0xff] }
  0x1e   : > { %2869 = vmatprep.subr.bf16.mxu1 %v2868_v24  ;;  %v391_v36 = vld [vmem:[%s3744_s13 + $0xb8] sm:$0xff]  ;;  %v388_v39 = vld [vmem:[%s3744_s13 + $0xa0] sm:$0xff]  ;;  %v390_v41 = vld [vmem:[%s3744_s13 + $0xb0] sm:$0xff]  ;;  %2273 = vperm.xlu0 %3482, %v2778_v10  }
  0x1f   : > { %v2872_v38 = vpack.c.bf16 %v391_v36, %v387_v35  ;;  %v2810_v42 = vpack.c.bf16 %v388_v39, %v384_v37  ;;  %v393_v43 = vld [vmem:[%s3744_s13 + $0xc8] sm:$0xff]  ;;  %v395_v45 = vld [vmem:[%s3744_s13 + $0xd8] sm:$0xff]  ;;  %v2874_v46 = vpack.c.bf16 %v390_v41, %v386_v40  ;;  %v392_v49 = vld [vmem:[%s3744_s13 + $0xc0] sm:$0xff] }
  0x20   : > { %2807 = vmatpush1.bf16.msra.mxu0 %v2806_v29  ;;  %v397_v44 = vld [vmem:[%s3744_s13 + $0xe8] sm:$0xff]  ;;  %v399_v48 = vld [vmem:[%s3744_s13 + $0xf8] sm:$0xff]  ;;  %v396_v50 = vld [vmem:[%s3744_s13 + $0xe0] sm:$0xff] }
  0x21   : > { %2871 = vmatpush1.bf16.msra.mxu1 %v2870_v33  ;;  %2809 = vmatprep.subr.bf16.mxu0 %v2808_v34  ;;  %v2812_v47 = vpack.c.bf16 %v397_v44, %v393_v43  ;;  %v2876_v51 = vpack.c.bf16 %v399_v48, %v395_v45  ;;  %v394_v52 = vld [vmem:[%s3744_s13 + $0xd0] sm:$0xff]  ;;  %v401_v54 = vld [vmem:[%s3744_s13 + $0x108] sm:$0xff]  ;;  %v403_v57 = vld [vmem:[%s3744_s13 + $0x118] sm:$0xff]  ;;  %v2814_v60 = vpack.c.bf16 %v396_v50, %v392_v49 }
  0x22   : > { %2873 = vmatprep.subr.bf16.mxu1 %v2872_v38  ;;  %v398_v53 = vld [vmem:[%s3744_s13 + $0xf0] sm:$0xff]  ;;  %v405_v56 = vld [vmem:[%s3744_s13 + $0x128] sm:$0xff]  ;;  %v407_v58 = vld [vmem:[%s3744_s13 + $0x138] sm:$0xff] }
  0x23   : > { %v2878_v63 = vpack.c.bf16 %v398_v53, %v394_v52  ;;  %v2816_v0 = vpack.c.bf16 %v405_v56, %v401_v54  ;;  %v400_v1 = vld [vmem:[%s3744_s13 + $0x100] sm:$0xff]  ;;  %v402_v4 = vld [vmem:[%s3744_s13 + $0x110] sm:$0xff]  ;;  %v2880_v5 = vpack.c.bf16 %v407_v58, %v403_v57  ;;  %v409_v7 = vld [vmem:[%s3744_s13 + $0x148] sm:$0xff] }
  0x24   : > { %2811 = vmatpush1.bf16.msra.mxu0 %v2810_v42  ;;  %v404_v2 = vld [vmem:[%s3744_s13 + $0x120] sm:$0xff]  ;;  %v406_v6 = vld [vmem:[%s3744_s13 + $0x130] sm:$0xff]  ;;  %v413_v8 = vld [vmem:[%s3744_s13 + $0x168] sm:$0xff] }
  0x25   : > { %2875 = vmatpush1.bf16.msra.mxu1 %v2874_v46  ;;  %2813 = vmatprep.subr.bf16.mxu0 %v2812_v47  ;;  %v411_v3 = vld [vmem:[%s3744_s13 + $0x158] sm:$0xff]  ;;  %v2818_v12 = vpack.c.bf16 %v404_v2, %v400_v1  ;;  %v2882_v13 = vpack.c.bf16 %v406_v6, %v402_v4  ;;  %v2820_v14 = vpack.c.bf16 %v413_v8, %v409_v7  ;;  %v408_v15 = vld [vmem:[%s3744_s13 + $0x140] sm:$0xff]  ;;  %v410_v17 = vld [vmem:[%s3744_s13 + $0x150] sm:$0xff] }
  0x26   : > { %2877 = vmatprep.subr.bf16.mxu1 %v2876_v51  ;;  %v415_v9 = vld [vmem:[%s3744_s13 + $0x178] sm:$0xff]  ;;  %v412_v16 = vld [vmem:[%s3744_s13 + $0x160] sm:$0xff]  ;;  %v414_v19 = vld [vmem:[%s3744_s13 + $0x170] sm:$0xff] }
  0x27   : > { %v2884_v18 = vpack.c.bf16 %v415_v9, %v411_v3  ;;  %v417_v20 = vld [vmem:[%s3744_s13 + $0x188] sm:$0xff]  ;;  %v419_v22 = vld [vmem:[%s3744_s13 + $0x198] sm:$0xff]  ;;  %v2822_v24 = vpack.c.bf16 %v412_v16, %v408_v15  ;;  %v2886_v25 = vpack.c.bf16 %v414_v19, %v410_v17  ;;  %v416_v27 = vld [vmem:[%s3744_s13 + $0x180] sm:$0xff] }
  0x28   : > { %2815 = vmatpush1.bf16.msra.mxu0 %v2814_v60  ;;  %v421_v21 = vld [vmem:[%s3744_s13 + $0x1a8] sm:$0xff]  ;;  %v423_v23 = vld [vmem:[%s3744_s13 + $0x1b8] sm:$0xff]  ;;  %v420_v28 = vld [vmem:[%s3744_s13 + $0x1a0] sm:$0xff] }
  0x29   : > { %2879 = vmatpush1.bf16.msra.mxu1 %v2878_v63  ;;  %2817 = vmatprep.subr.bf16.mxu0 %v2816_v0  ;;  %v2824_v26 = vpack.c.bf16 %v421_v21, %v417_v20  ;;  %v418_v29 = vld [vmem:[%s3744_s13 + $0x190] sm:$0xff]  ;;  %v2888_v30 = vpack.c.bf16 %v423_v23, %v419_v22  ;;  %v425_v32 = vld [vmem:[%s3744_s13 + $0x1c8] sm:$0xff]  ;;  %v427_v34 = vld [vmem:[%s3744_s13 + $0x1d8] sm:$0xff]  ;;  %v2826_v36 = vpack.c.bf16 %v420_v28, %v416_v27 }
  0x2a   : > { %2881 = vmatprep.subr.bf16.mxu1 %v2880_v5  ;;  %v422_v31 = vld [vmem:[%s3744_s13 + $0x1b0] sm:$0xff]  ;;  %v429_v33 = vld [vmem:[%s3744_s13 + $0x1e8] sm:$0xff]  ;;  %v431_v35 = vld [vmem:[%s3744_s13 + $0x1f8] sm:$0xff] }
  0x2b   : > { %v2890_v37 = vpack.c.bf16 %v422_v31, %v418_v29  ;;  %v2828_v38 = vpack.c.bf16 %v429_v33, %v425_v32  ;;  %v424_v39 = vld [vmem:[%s3744_s13 + $0x1c0] sm:$0xff]  ;;  %v426_v41 = vld [vmem:[%s3744_s13 + $0x1d0] sm:$0xff]  ;;  %v2892_v42 = vpack.c.bf16 %v431_v35, %v427_v34  ;;  %v433_v44 = vld [vmem:[%s3744_s13 + $0x208] sm:$0xff] }
  0x2c   : > { %2819 = vmatpush1.bf16.msra.mxu0 %v2818_v12  ;;  %v428_v40 = vld [vmem:[%s3744_s13 + $0x1e0] sm:$0xff]  ;;  %v430_v43 = vld [vmem:[%s3744_s13 + $0x1f0] sm:$0xff]  ;;  %v437_v45 = vld [vmem:[%s3744_s13 + $0x228] sm:$0xff] }
  0x2d   : > { %2883 = vmatpush1.bf16.msra.mxu1 %v2882_v13  ;;  %2821 = vmatprep.subr.bf16.mxu0 %v2820_v14  ;;  %v435_v46 = vld [vmem:[%s3744_s13 + $0x218] sm:$0xff]  ;;  %v2830_v48 = vpack.c.bf16 %v428_v40, %v424_v39  ;;  %v2894_v49 = vpack.c.bf16 %v430_v43, %v426_v41  ;;  %v2832_v50 = vpack.c.bf16 %v437_v45, %v433_v44  ;;  %v432_v51 = vld [vmem:[%s3744_s13 + $0x200] sm:$0xff]  ;;  %v434_v53 = vld [vmem:[%s3744_s13 + $0x210] sm:$0xff] }
  0x2e   : > { %2885 = vmatprep.subr.bf16.mxu1 %v2884_v18  ;;  %v439_v47 = vld [vmem:[%s3744_s13 + $0x238] sm:$0xff]  ;;  %v436_v52 = vld [vmem:[%s3744_s13 + $0x220] sm:$0xff]  ;;  %v438_v55 = vld [vmem:[%s3744_s13 + $0x230] sm:$0xff] }
  0x2f   : > { %v2896_v54 = vpack.c.bf16 %v439_v47, %v435_v46  ;;  %v441_v56 = vld [vmem:[%s3744_s13 + $0x248] sm:$0xff]  ;;  %v443_v58 = vld [vmem:[%s3744_s13 + $0x258] sm:$0xff]  ;;  %v2834_v60 = vpack.c.bf16 %v436_v52, %v432_v51  ;;  %v2898_v61 = vpack.c.bf16 %v438_v55, %v434_v53  ;;  %v440_v63 = vld [vmem:[%s3744_s13 + $0x240] sm:$0xff] }
  0x30   : > { %2823 = vmatpush1.bf16.msra.mxu0 %v2822_v24  ;;  %v445_v57 = vld [vmem:[%s3744_s13 + $0x268] sm:$0xff]  ;;  %v447_v59 = vld [vmem:[%s3744_s13 + $0x278] sm:$0xff]  ;;  %v444_v0 = vld [vmem:[%s3744_s13 + $0x260] sm:$0xff] }
  0x31   : > { %2887 = vmatpush1.bf16.msra.mxu1 %v2886_v25  ;;  %2825 = vmatprep.subr.bf16.mxu0 %v2824_v26  ;;  %v2836_v62 = vpack.c.bf16 %v445_v57, %v441_v56  ;;  %v442_v1 = vld [vmem:[%s3744_s13 + $0x250] sm:$0xff]  ;;  %v2900_v2 = vpack.c.bf16 %v447_v59, %v443_v58  ;;  %v449_v5 = vld [vmem:[%s3744_s13 + $0x288] sm:$0xff]  ;;  %v451_v7 = vld [vmem:[%s3744_s13 + $0x298] sm:$0xff]  ;;  %v2838_v3 = vpack.c.bf16 %v444_v0, %v440_v63 }
  0x32   : > { %2889 = vmatprep.subr.bf16.mxu1 %v2888_v30  ;;  %v446_v4 = vld [vmem:[%s3744_s13 + $0x270] sm:$0xff]  ;;  %v453_v6 = vld [vmem:[%s3744_s13 + $0x2a8] sm:$0xff]  ;;  %v455_v8 = vld [vmem:[%s3744_s13 + $0x2b8] sm:$0xff] }
  0x33   : > { %v2902_v9 = vpack.c.bf16 %v446_v4, %v442_v1  ;;  %v2840_v10 = vpack.c.bf16 %v453_v6, %v449_v5  ;;  %v448_v12 = vld [vmem:[%s3744_s13 + $0x280] sm:$0xff]  ;;  %v450_v14 = vld [vmem:[%s3744_s13 + $0x290] sm:$0xff]  ;;  %v2904_v15 = vpack.c.bf16 %v455_v8, %v451_v7  ;;  %v457_v17 = vld [vmem:[%s3744_s13 + $0x2c8] sm:$0xff] }
  0x34   : > { %2827 = vmatpush1.bf16.msra.mxu0 %v2826_v36  ;;  %v452_v13 = vld [vmem:[%s3744_s13 + $0x2a0] sm:$0xff]  ;;  %v454_v16 = vld [vmem:[%s3744_s13 + $0x2b0] sm:$0xff]  ;;  %v461_v18 = vld [vmem:[%s3744_s13 + $0x2e8] sm:$0xff] }
  0x35   : > { %2891 = vmatpush1.bf16.msra.mxu1 %v2890_v37  ;;  %2829 = vmatprep.subr.bf16.mxu0 %v2828_v38  ;;  %v459_v19 = vld [vmem:[%s3744_s13 + $0x2d8] sm:$0xff]  ;;  %v2842_v21 = vpack.c.bf16 %v452_v13, %v448_v12  ;;  %v2906_v22 = vpack.c.bf16 %v454_v16, %v450_v14  ;;  %v2844_v23 = vpack.c.bf16 %v461_v18, %v457_v17  ;;  %v456_v24 = vld [vmem:[%s3744_s13 + $0x2c0] sm:$0xff]  ;;  %v458_v26 = vld [vmem:[%s3744_s13 + $0x2d0] sm:$0xff] }
  0x36   : > { %2893 = vmatprep.subr.bf16.mxu1 %v2892_v42  ;;  %v463_v20 = vld [vmem:[%s3744_s13 + $0x2f8] sm:$0xff]  ;;  %v460_v25 = vld [vmem:[%s3744_s13 + $0x2e0] sm:$0xff]  ;;  %v462_v28 = vld [vmem:[%s3744_s13 + $0x2f0] sm:$0xff] }
  0x37   : > { %v2908_v27 = vpack.c.bf16 %v463_v20, %v459_v19  ;;  %v465_v29 = vld [vmem:[%s3744_s13 + $0x308] sm:$0xff]  ;;  %v467_v31 = vld [vmem:[%s3744_s13 + $0x318] sm:$0xff]  ;;  %v2846_v33 = vpack.c.bf16 %v460_v25, %v456_v24  ;;  %v2910_v34 = vpack.c.bf16 %v462_v28, %v458_v26  ;;  %v464_v36 = vld [vmem:[%s3744_s13 + $0x300] sm:$0xff] }
  0x38   : > { %2831 = vmatpush1.bf16.msra.mxu0 %v2830_v48  ;;  %v469_v30 = vld [vmem:[%s3744_s13 + $0x328] sm:$0xff]  ;;  %v471_v32 = vld [vmem:[%s3744_s13 + $0x338] sm:$0xff]  ;;  %v468_v37 = vld [vmem:[%s3744_s13 + $0x320] sm:$0xff] }
  0x39   : > { %2895 = vmatpush1.bf16.msra.mxu1 %v2894_v49  ;;  %2833 = vmatprep.subr.bf16.mxu0 %v2832_v50  ;;  %v2848_v35 = vpack.c.bf16 %v469_v30, %v465_v29  ;;  %v466_v38 = vld [vmem:[%s3744_s13 + $0x310] sm:$0xff]  ;;  %v2912_v39 = vpack.c.bf16 %v471_v32, %v467_v31  ;;  %v473_v41 = vld [vmem:[%s3744_s13 + $0x348] sm:$0xff]  ;;  %v475_v43 = vld [vmem:[%s3744_s13 + $0x358] sm:$0xff]  ;;  %v2850_v45 = vpack.c.bf16 %v468_v37, %v464_v36 }
  0x3a   : > { %2897 = vmatprep.subr.bf16.mxu1 %v2896_v54  ;;  %v470_v40 = vld [vmem:[%s3744_s13 + $0x330] sm:$0xff]  ;;  %v477_v42 = vld [vmem:[%s3744_s13 + $0x368] sm:$0xff]  ;;  %v479_v44 = vld [vmem:[%s3744_s13 + $0x378] sm:$0xff] }
  0x3b   : > { %v2914_v46 = vpack.c.bf16 %v470_v40, %v466_v38  ;;  %v2852_v47 = vpack.c.bf16 %v477_v42, %v473_v41  ;;  %v472_v48 = vld [vmem:[%s3744_s13 + $0x340] sm:$0xff]  ;;  %v474_v50 = vld [vmem:[%s3744_s13 + $0x350] sm:$0xff]  ;;  %v2916_v51 = vpack.c.bf16 %v479_v44, %v475_v43  ;;  %v481_v53 = vld [vmem:[%s3744_s13 + $0x388] sm:$0xff] }
  0x3c   : > { %2835 = vmatpush1.bf16.msra.mxu0 %v2834_v60  ;;  %v476_v49 = vld [vmem:[%s3744_s13 + $0x360] sm:$0xff]  ;;  %v478_v52 = vld [vmem:[%s3744_s13 + $0x370] sm:$0xff]  ;;  %v485_v54 = vld [vmem:[%s3744_s13 + $0x3a8] sm:$0xff] }
  0x3d   : > { %2899 = vmatpush1.bf16.msra.mxu1 %v2898_v61  ;;  %2837 = vmatprep.subr.bf16.mxu0 %v2836_v62  ;;  %v483_v55 = vld [vmem:[%s3744_s13 + $0x398] sm:$0xff]  ;;  %v2854_v57 = vpack.c.bf16 %v476_v49, %v472_v48  ;;  %v2918_v58 = vpack.c.bf16 %v478_v52, %v474_v50  ;;  %v2856_v59 = vpack.c.bf16 %v485_v54, %v481_v53  ;;  %v480_v60 = vld [vmem:[%s3744_s13 + $0x380] sm:$0xff]  ;;  %v482_v62 = vld [vmem:[%s3744_s13 + $0x390] sm:$0xff] }
  0x3e   : > { %2901 = vmatprep.subr.bf16.mxu1 %v2900_v2  ;;  %v487_v56 = vld [vmem:[%s3744_s13 + $0x3b8] sm:$0xff]  ;;  %v484_v61 = vld [vmem:[%s3744_s13 + $0x3a0] sm:$0xff]  ;;  %v486_v0 = vld [vmem:[%s3744_s13 + $0x3b0] sm:$0xff] }
  0x3f   : > { %v2920_v63 = vpack.c.bf16 %v487_v56, %v483_v55  ;;  %v489_v1 = vld [vmem:[%s3744_s13 + $0x3c8] sm:$0xff]  ;;  %v491_v4 = vld [vmem:[%s3744_s13 + $0x3d8] sm:$0xff]  ;;  %v2858_v6 = vpack.c.bf16 %v484_v61, %v480_v60  ;;  %v2922_v7 = vpack.c.bf16 %v486_v0, %v482_v62  ;;  %v494_v13 = vld [vmem:[%s3744_s13 + $0x3f0] sm:$0xff] }
  0x40   : > { %2839 = vmatpush1.bf16.msra.mxu0 %v2838_v3  ;;  %v493_v2 = vld [vmem:[%s3744_s13 + $0x3e8] sm:$0xff]  ;;  %v495_v5 = vld [vmem:[%s3744_s13 + $0x3f8] sm:$0xff]  ;;  %v488_v3 = vld [vmem:[%s3744_s13 + $0x3c0] sm:$0xff] }
  0x41   : > { %2903 = vmatpush1.bf16.msra.mxu1 %v2902_v9  ;;  %2841 = vmatprep.subr.bf16.mxu0 %v2840_v10  ;;  %v2860_v8 = vpack.c.bf16 %v493_v2, %v489_v1  ;;  %v492_v9 = vld [vmem:[%s3744_s13 + $0x3e0] sm:$0xff]  ;;  %v490_v10 = vld [vmem:[%s3744_s13 + $0x3d0] sm:$0xff]  ;;  %v2924_v12 = vpack.c.bf16 %v495_v5, %v491_v4  ;;  %v777_v14 = vld [vmem:[%s3907_s10 + $0x8] sm:$0xff] }
  0x42   : > { %2905 = vmatprep.subr.bf16.mxu1 %v2904_v15  ;;  %v781_v15 = vld [vmem:[%s3907_s10 + $0x28] sm:$0xff]  ;;  %v779_v16 = vld [vmem:[%s3907_s10 + $0x18] sm:$0xff]  ;;  %v2862_v18 = vpack.c.bf16 %v492_v9, %v488_v3  ;;  %v2926_v19 = vpack.c.bf16 %v494_v13, %v490_v10  ;;  %v778_v24 = vld [vmem:[%s3907_s10 + $0x10] sm:$0xff] }
  0x43   : > { %v783_v17 = vld [vmem:[%s3907_s10 + $0x38] sm:$0xff]  ;;  %v3917_v20 = vpack.c.bf16 %v781_v15, %v777_v14  ;;  %v782_v25 = vld [vmem:[%s3907_s10 + $0x30] sm:$0xff]  ;;  %v785_v26 = vld [vmem:[%s3907_s10 + $0x48] sm:$0xff] }
  0x44   : > { %2843 = vmatpush1.bf16.msra.mxu0 %v2842_v21  ;;  %v776_v21 = vld [vmem:[%s3907_s10] sm:$0xff]  ;;  %v787_v29 = vld [vmem:[%s3907_s10 + $0x58] sm:$0xff]  ;;  %v786_v37 = vld [vmem:[%s3907_s10 + $0x50] sm:$0xff] }
  0x45   : > { %2907 = vmatpush1.bf16.msra.mxu1 %v2906_v22  ;;  %2845 = vmatprep.subr.bf16.mxu0 %v2844_v23  ;;  %v780_v22 = vld [vmem:[%s3907_s10 + $0x20] sm:$0xff]  ;;  %v3921_v23 = vpack.c.bf16 %v783_v17, %v779_v16  ;;  %v791_v30 = vld [vmem:[%s3907_s10 + $0x78] sm:$0xff]  ;;  %v793_v40 = vld [vmem:[%s3907_s10 + $0x88] sm:$0xff] }
  0x46   : > { %2909 = vmatprep.subr.bf16.mxu1 %v2908_v27  ;;  %v789_v27 = vld [vmem:[%s3907_s10 + $0x68] sm:$0xff]  ;;  %v352_v28 = vld [vmem:[%s4578_s1] sm:$0xff]  ;;  %v355_v31 = vld [vmem:[%s4578_s1 + $0x18] sm:$0xff]  ;;  %v3936_v32 = vpack.c.bf16 %v780_v22, %v776_v21  ;;  %v3946_v38 = vpack.c.bf16 %v791_v30, %v787_v29 }
  0x47   : > { %v788_v36 = vld [vmem:[%s3907_s10 + $0x60] sm:$0xff]  ;;  %v797_v41 = vld [vmem:[%s3907_s10 + $0xa8] sm:$0xff]  ;;  %v354_v42 = vld [vmem:[%s4578_s1 + $0x10] sm:$0xff] }
  0x48   : > { %2847 = vmatpush1.bf16.msra.mxu0 %v2846_v33  ;;  %v3939_v33 = vpack.c.bf16 %v782_v25, %v778_v24  ;;  %v795_v43 = vld [vmem:[%s3907_s10 + $0x98] sm:$0xff]  ;;  %v3966_v48 = vpack.c.bf16 %v797_v41, %v793_v40  ;;  %v792_v49 = vld [vmem:[%s3907_s10 + $0x80] sm:$0xff]  ;;  %v798_v53 = vld [vmem:[%s3907_s10 + $0xb0] sm:$0xff] }
  0x49   : > { %2911 = vmatpush1.bf16.msra.mxu1 %v2910_v34  ;;  %2849 = vmatprep.subr.bf16.mxu0 %v2848_v35  ;;  %v3941_v34 = vpack.c.bf16 %v789_v27, %v785_v26  ;;  %v784_v35 = vld [vmem:[%s3907_s10 + $0x40] sm:$0xff]  ;;  %v799_v44 = vld [vmem:[%s3907_s10 + $0xb8] sm:$0xff]  ;;  %v801_v54 = vld [vmem:[%s3907_s10 + $0xc8] sm:$0xff] }
  0x4a   : > { %2913 = vmatprep.subr.bf16.mxu1 %v2912_v39  ;;  %v790_v39 = vld [vmem:[%s3907_s10 + $0x70] sm:$0xff]  ;;  %v796_v50 = vld [vmem:[%s3907_s10 + $0xa0] sm:$0xff]  ;;  %v3972_v52 = vpack.c.bf16 %v799_v44, %v795_v43  ;;  %v805_v55 = vld [vmem:[%s3907_s10 + $0xe8] sm:$0xff] }
  0x4b   : > { %v356_v56 = vld [vmem:[%s4578_s1 + $0x20] sm:$0xff]  ;;  %v3986_v60 = vpack.c.bf16 %v796_v50, %v792_v49  ;;  %v3992_v62 = vpack.c.bf16 %v805_v55, %v801_v54  ;;  %v802_v1 = vld [vmem:[%s3907_s10 + $0xd0] sm:$0xff]  ;;  %v809_v5 = vld [vmem:[%s3907_s10 + $0x108] sm:$0xff] }
  0x4c   : > { %2851 = vmatpush1.bf16.msra.mxu0 %v2850_v45  ;;  %v357_v45 = vld [vmem:[%s4578_s1 + $0x28] sm:$0xff]  ;;  %v804_v0 = vld [vmem:[%s3907_s10 + $0xe0] sm:$0xff]  ;;  %v806_v4 = vld [vmem:[%s3907_s10 + $0xf0] sm:$0xff] }
  0x4d   : > { %2915 = vmatpush1.bf16.msra.mxu1 %v2914_v46  ;;  %2853 = vmatprep.subr.bf16.mxu0 %v2852_v47  ;;  %v3960_v46 = vpack.c.bf16 %v788_v36, %v784_v35  ;;  %v3964_v47 = vpack.c.bf16 %v790_v39, %v786_v37  ;;  %v815_v3 = vld [vmem:[%s3907_s10 + $0x138] sm:$0xff]  ;;  %v361_v9 = vld [vmem:[%s4578_s1 + $0x48] sm:$0xff]  ;;  %v808_v14 = vld [vmem:[%s3907_s10 + $0x100] sm:$0xff] }
  0x4e   : > { %2917 = vmatprep.subr.bf16.mxu1 %v2916_v51  ;;  %v794_v51 = vld [vmem:[%s3907_s10 + $0x90] sm:$0xff]  ;;  %v812_v15 = vld [vmem:[%s3907_s10 + $0x120] sm:$0xff]  ;;  %v821_v21 = vld [vmem:[%s3907_s10 + $0x168] sm:$0xff] }
  0x4f   : > { %v3990_v61 = vpack.c.bf16 %v798_v53, %v794_v51  ;;  %v810_v16 = vld [vmem:[%s3907_s10 + $0x110] sm:$0xff]  ;;  %v360_v22 = vld [vmem:[%s4578_s1 + $0x40] sm:$0xff]  ;;  %v819_v24 = vld [vmem:[%s3907_s10 + $0x158] sm:$0xff]  ;;  %v4038_v27 = vpack.c.bf16 %v812_v15, %v808_v14 }
  0x50   : > { %2855 = vmatpush1.bf16.msra.mxu0 %v2854_v57  ;;  %v803_v57 = vld [vmem:[%s3907_s10 + $0xd8] sm:$0xff]  ;;  %v816_v30 = vld [vmem:[%s3907_s10 + $0x140] sm:$0xff]  ;;  %v818_v35 = vld [vmem:[%s3907_s10 + $0x150] sm:$0xff] }
  0x51   : > { %2919 = vmatpush1.bf16.msra.mxu1 %v2918_v58  ;;  %2857 = vmatprep.subr.bf16.mxu0 %v2856_v59  ;;  %v807_v58 = vld [vmem:[%s3907_s10 + $0xf8] sm:$0xff]  ;;  %v822_v37 = vld [vmem:[%s3907_s10 + $0x170] sm:$0xff]  ;;  %v825_v39 = vld [vmem:[%s3907_s10 + $0x188] sm:$0xff] }
  0x52   : > { %2921 = vmatprep.subr.bf16.mxu1 %v2920_v63  ;;  %v359_v59 = vld [vmem:[%s4578_s1 + $0x38] sm:$0xff]  ;;  %v800_v63 = vld [vmem:[%s3907_s10 + $0xc0] sm:$0xff]  ;;  %v3998_v2 = vpack.c.bf16 %v807_v58, %v803_v57  ;;  %v829_v40 = vld [vmem:[%s3907_s10 + $0x1a8] sm:$0xff]  ;;  %v4068_v49 = vpack.c.bf16 %v822_v37, %v818_v35 }
  0x53   : > { %v4012_v10 = vpack.c.bf16 %v804_v0, %v800_v63  ;;  %v823_v25 = vld [vmem:[%s3907_s10 + $0x178] sm:$0xff]  ;;  %v362_v41 = vld [vmem:[%s4578_s1 + $0x50] sm:$0xff]  ;;  %v365_v44 = vld [vmem:[%s4578_s1 + $0x68] sm:$0xff]  ;;  %v4070_v50 = vpack.c.bf16 %v829_v40, %v825_v39 }
  0x54   : > { %2859 = vmatpush1.bf16.msra.mxu0 %v2858_v6  ;;  %v813_v6 = vld [vmem:[%s3907_s10 + $0x128] sm:$0xff]  ;;  %v363_v26 = vld [vmem:[%s4578_s1 + $0x58] sm:$0xff]  ;;  %v4050_v36 = vpack.c.bf16 %v823_v25, %v819_v24  ;;  %v824_v51 = vld [vmem:[%s3907_s10 + $0x180] sm:$0xff] }
  0x55   : > { %2923 = vmatpush1.bf16.msra.mxu1 %v2922_v7  ;;  %2861 = vmatprep.subr.bf16.mxu0 %v2860_v8  ;;  %v358_v7 = vld [vmem:[%s4578_s1 + $0x30] sm:$0xff]  ;;  %v811_v8 = vld [vmem:[%s3907_s10 + $0x118] sm:$0xff]  ;;  %v4018_v13 = vpack.c.bf16 %v813_v6, %v809_v5  ;;  %v828_v53 = vld [vmem:[%s3907_s10 + $0x1a0] sm:$0xff] }
  0x56   : > { %2925 = vmatprep.subr.bf16.mxu1 %v2924_v12  ;;  %v4016_v12 = vpack.c.bf16 %v806_v4, %v802_v1  ;;  %v4024_v17 = vpack.c.bf16 %v815_v3, %v811_v8  ;;  %v831_v43 = vld [vmem:[%s3907_s10 + $0x1b8] sm:$0xff]  ;;  %v826_v54 = vld [vmem:[%s3907_s10 + $0x190] sm:$0xff]  ;;  %v833_v57 = vld [vmem:[%s3907_s10 + $0x1c8] sm:$0xff]  ;;  %v4090_v4 = vpack.c.bf16 %v828_v53, %v824_v51 }
  0x57   : > { %v837_v58 = vld [vmem:[%s3907_s10 + $0x1e8] sm:$0xff]  ;;  %v835_v63 = vld [vmem:[%s3907_s10 + $0x1d8] sm:$0xff]  ;;  %v836_v8 = vld [vmem:[%s3907_s10 + $0x1e0] sm:$0xff] }
  0x58   : > { %2863 = vmatpush1.bf16.msra.mxu0 %v2862_v18  ;;  %v814_v18 = vld [vmem:[%s3907_s10 + $0x130] sm:$0xff]  ;;  %v839_v0 = vld [vmem:[%s3907_s10 + $0x1f8] sm:$0xff]  ;;  %v4096_v6 = vpack.c.bf16 %v837_v58, %v833_v57 }
  0x59   : > { %2927 = vmatpush1.bf16.msra.mxu1 %v2926_v19  ;;  %2929 = vmatprep.subr.bf16.mxu0 %v3917_v20  ;;  %v817_v19 = vld [vmem:[%s3907_s10 + $0x148] sm:$0xff]  ;;  %v367_v1 = vld [vmem:[%s4578_s1 + $0x78] sm:$0xff]  ;;  %v4101_v3 = vpack.c.bf16 %v839_v0, %v835_v63  ;;  %v838_v14 = vld [vmem:[%s3907_s10 + $0x1f0] sm:$0xff] }
  0x5a   : > { %2961 = vmatprep.subr.bf16.mxu1 %v3921_v23  ;;  %v4044_v29 = vpack.c.bf16 %v821_v21, %v817_v19  ;;  %v366_v15 = vld [vmem:[%s4578_s1 + $0x70] sm:$0xff]  ;;  %v498_v19 = vlaneseq }
  0x5b   : > { %583 = vmatmul.mubr.f32.vlgmr.msra.gmra.mrb[0].mxu0 %v352_v28 }
  0x5c   : > { %696 = vmatmul.mubr.f32.vlgmr.msra.gmra.mrb[0].mxu1 %v352_v28  ;;  %588 = vmatprep.mubr.f32.mxu0 %v355_v31  ;;  %v4042_v28 = vpack.c.bf16 %v814_v18, %v810_v16  ;;  %v499_v21 = vshrl.u32 %v498_v19, 7 }
  0x5d   : > { %701 = vmatprep.mubr.f32.mxu1 %v355_v31  ;;  %2931 = vmatpush1.bf16.msra.mxu0 %v3936_v32  ;;  %v820_v31 = vld [vmem:[%s3907_s10 + $0x160] sm:$0xff] }
  0x5e   : > { %2963 = vmatpush1.bf16.msra.mxu1 %v3939_v33  ;;  %2933 = vmatprep.subr.bf16.mxu0 %v3941_v34  ;;  %v508_v25 = vsub.s32 2, %v499_v21 }
  0x5f   : > { %589 = vmatmul.mubr.f32.gmra.mrb[2].mxu0 %v354_v42  ;;  %2965 = vmatprep.subr.bf16.mxu1 %v3946_v38 }
  0x60   : > { %702 = vmatmul.mubr.f32.gmra.mrb[2].mxu1 %v354_v42  ;;  %594 = vmatprep.mubr.f32.mxu0 %v357_v45  ;;  %v827_v42 = vld [vmem:[%s3907_s10 + $0x198] sm:$0xff] }
  0x61   : > { %707 = vmatprep.mubr.f32.mxu1 %v357_v45  ;;  %2935 = vmatpush1.bf16.msra.mxu0 %v3960_v46  ;;  %v4064_v45 = vpack.c.bf16 %v820_v31, %v816_v30  ;;  %v4076_v55 = vpack.c.bf16 %v831_v43, %v827_v42  ;;  %v512_v30 = vsub.s32 3, %v499_v21 }
  0x62   : > { %2967 = vmatpush1.bf16.msra.mxu1 %v3964_v47  ;;  %2937 = vmatprep.subr.bf16.mxu0 %v3966_v48 }
  0x63   : > { %595 = vmatmul.mubr.f32.gmra.mrb[4].mxu0 %v356_v56  ;;  %2969 = vmatprep.subr.bf16.mxu1 %v3972_v52 }
  0x64   : > { %708 = vmatmul.mubr.f32.gmra.mrb[4].mxu1 %v356_v56  ;;  %600 = vmatprep.mubr.f32.mxu0 %v359_v59  ;;  %v830_v56 = vld [vmem:[%s3907_s10 + $0x1b0] sm:$0xff] }
  0x65   : > { %713 = vmatprep.mubr.f32.mxu1 %v359_v59  ;;  %2939 = vmatpush1.bf16.msra.mxu0 %v3986_v60  ;;  %v364_v59 = vld [vmem:[%s4578_s1 + $0x60] sm:$0xff]  ;;  %v4094_v5 = vpack.c.bf16 %v830_v56, %v826_v54 }
  0x66   : > { %2971 = vmatpush1.bf16.msra.mxu1 %v3990_v61  ;;  %2941 = vmatprep.subr.bf16.mxu0 %v3992_v62 }
  0x67   : > { %601 = vmatmul.mubr.f32.gmra.mrb[6].mxu0 %v358_v7  ;;  %2973 = vmatprep.subr.bf16.mxu1 %v3998_v2 }
  0x68   : > { %714 = vmatmul.mubr.f32.gmra.mrb[6].mxu1 %v358_v7  ;;  %606 = vmatprep.mubr.f32.mxu0 %v361_v9  ;;  %v832_v7 = vld [vmem:[%s3907_s10 + $0x1c0] sm:$0xff] }
  0x69   : > { %719 = vmatprep.mubr.f32.mxu1 %v361_v9  ;;  %2943 = vmatpush1.bf16.msra.mxu0 %v4012_v10  ;;  %v834_v9 = vld [vmem:[%s3907_s10 + $0x1d0] sm:$0xff]  ;;  %v4109_v16 = vpack.c.bf16 %v836_v8, %v832_v7  ;;  %s2725_s10 = sshll.u32 %s3734_s7, 2  ;;  %s851_s7 = smul.u32 56, %s3643_s20 }
  0x6a   : > { %2975 = vmatpush1.bf16.msra.mxu1 %v4016_v12  ;;  %2945 = vmatprep.subr.bf16.mxu0 %v4018_v13  ;;  %v4113_v18 = vpack.c.bf16 %v838_v14, %v834_v9  ;;  %s339_s9 = scalar_lea.vmem %s4581_s4, %s2725_s10  ;;  %s2740_s10 = sshll.u32 %s3737_s8, 1 }
  0x6b   : > { %607 = vmatmul.mubr.f32.gmra.mrb[8].mxu0 %v360_v22  ;;  %2977 = vmatprep.subr.bf16.mxu1 %v4024_v17  ;;  %v496_v24 = vld [vmem:[%s339_s9] sm:$0xf]  ;;  %s852_s11 = sshra.s32 %s851_s7, 3  ;;  %s1050_s23 = scalar_lea.vmem %s4211_s17, %s851_s7 [#allocation5] }
  0x6c   : > { %720 = vmatmul.mubr.f32.gmra.mrb[8].mxu1 %v360_v22  ;;  %612 = vmatprep.mubr.f32.mxu0 %v363_v26  ;;  %v500_v22 = vsub.s32 0, %v499_v21  ;;  %v4164_v35 = vrot.slane %v496_v24, %v508_v25  ;;  %v4168_v39 = vrot.slane %v496_v24, %v512_v30  ;;  %s2792_s12 = sshll.u32 %s852_s11, 5  ;;  %s2764_s9 = sshll.u32 %s3643_s20, 1 }
  0x6d   : > { %725 = vmatprep.mubr.f32.mxu1 %v363_v26  ;;  %2947 = vmatpush1.bf16.msra.mxu0 %v4038_v27  ;;  %v504_v26 = vsub.s32 1, %v499_v21  ;;  %s856_s13 = scalar_lea.vmem [#allocation4], %s2792_s12  ;;  %s4262_s7 = sadd.s32 %s2740_s10, %s1258_s18 }
  0x6e   : > { %2979 = vmatpush1.bf16.msra.mxu1 %v4042_v28  ;;  %2949 = vmatprep.subr.bf16.mxu0 %v4044_v29  ;;  %v4162_v31 = vrot.slane %v496_v24, %v500_v22  ;;  %s4264_s11 = sadd.s32 %s2748_s30, %s1463_s25  ;;  %s4271_s14 = sadd.s32 %s2764_s9, %s1875_s6 }
  0x6f   : > { %613 = vmatmul.mubr.f32.gmra.mrb[10].mxu0 %v362_v41  ;;  %2981 = vmatprep.subr.bf16.mxu1 %v4050_v36  ;;  %v4166_v37 = vrot.slane %v496_v24, %v504_v26 }
  0x70   : > { %726 = vmatmul.mubr.f32.gmra.mrb[10].mxu1 %v362_v41  ;;  %618 = vmatprep.mubr.f32.mxu0 %v365_v44 }
  0x71   : > { %731 = vmatprep.mubr.f32.mxu1 %v365_v44  ;;  %2951 = vmatpush1.bf16.msra.mxu0 %v4064_v45 }
  0x72   : > { %2983 = vmatpush1.bf16.msra.mxu1 %v4068_v49  ;;  %2953 = vmatprep.subr.bf16.mxu0 %v4070_v50 }
  0x73   : > { %619 = vmatmul.mubr.f32.gmra.mrb[12].mxu0 %v364_v59  ;;  %2985 = vmatprep.subr.bf16.mxu1 %v4076_v55 }
  0x74   : > { %732 = vmatmul.mubr.f32.gmra.mrb[12].mxu1 %v364_v59  ;;  %624 = vmatprep.mubr.f32.mxu0 %v367_v1 }
  0x75   : > { %737 = vmatprep.mubr.f32.mxu1 %v367_v1  ;;  %2955 = vmatpush1.bf16.msra.mxu0 %v4090_v4 }
  0x76   : > { %2987 = vmatpush1.bf16.msra.mxu1 %v4094_v5  ;;  %2957 = vmatprep.subr.bf16.mxu0 %v4096_v6 }
  0x77   : > { %625 = vmatmul.mubr.f32.gmra.mrb[14].mxu0 %v366_v15  ;;  %2989 = vmatprep.subr.bf16.mxu1 %v4101_v3 }
  0x78   : > { %738 = vmatmul.mubr.f32.gmra.mrb[14].mxu1 %v366_v15  ;;  %925 = vmatprep.mubr.f32.mxu0 %v3654_v11 }
  0x79   : > { %2959 = vmatpush1.bf16.msra.mxu0 %v4109_v16  ;;  %996 = vmatprep.mubr.f32.mxu1 %v3654_v11 }
  0x7a   : > { %2991 = vmatpush1.bf16.msra.mxu1 %v4113_v18  ;;  %2993 = vmatprep.subr.bf16.mxu0 %v3917_v20 }
  0x7b   : > { %3025 = vmatprep.subr.bf16.mxu1 %v3921_v23 }
  0x7c   : > { %926 = vmatmul.mubr.f32.vlgmr.msra.gmra.mrb[16].mxu0 %v3654_v11 }
  0x7d   : > { %997 = vmatmul.mubr.f32.vlgmr.msra.gmra.mrb[16].mxu1 %v3654_v11  ;;  %2995 = vmatpush1.bf16.msra.mxu0 %v3936_v32 }
  0x7e   : > { %3027 = vmatpush1.bf16.msra.mxu1 %v3939_v33  ;;  %2997 = vmatprep.subr.bf16.mxu0 %v3941_v34 }
  0x7f   : > { %3029 = vmatprep.subr.bf16.mxu1 %v3946_v38  ;;  %1131 = vmatprep.mubr.f32.mxu0 %v3654_v11 }
  0x80   : > { %1202 = vmatprep.mubr.f32.mxu1 %v3654_v11 }
  0x81   : > { %2999 = vmatpush1.bf16.msra.mxu0 %v3960_v46 }
  0x82   : > { %3031 = vmatpush1.bf16.msra.mxu1 %v3964_v47  ;;  %3001 = vmatprep.subr.bf16.mxu0 %v3966_v48 }
  0x83   : > { %3033 = vmatprep.subr.bf16.mxu1 %v3972_v52 }
  0x85   : > { %3003 = vmatpush1.bf16.msra.mxu0 %v3986_v60 }
  0x86   : > { %3035 = vmatpush1.bf16.msra.mxu1 %v3990_v61  ;;  %3005 = vmatprep.subr.bf16.mxu0 %v3992_v62 }
  0x87   : > { %3037 = vmatprep.subr.bf16.mxu1 %v3998_v2 }
  0x89   : > { %3007 = vmatpush1.bf16.msra.mxu0 %v4012_v10 }
  0x8a   : > { %3039 = vmatpush1.bf16.msra.mxu1 %v4016_v12  ;;  %3009 = vmatprep.subr.bf16.mxu0 %v4018_v13 }
  0x8b   : > { %3041 = vmatprep.subr.bf16.mxu1 %v4024_v17 }
  0x8d   : > { %3011 = vmatpush1.bf16.msra.mxu0 %v4038_v27 }
  0x8e   : > { %3043 = vmatpush1.bf16.msra.mxu1 %v4042_v28  ;;  %3013 = vmatprep.subr.bf16.mxu0 %v4044_v29 }
  0x8f   : > { %3045 = vmatprep.subr.bf16.mxu1 %v4050_v36 }
  0x91   : > { %3015 = vmatpush1.bf16.msra.mxu0 %v4064_v45 }
  0x92   : > { %3047 = vmatpush1.bf16.msra.mxu1 %v4068_v49  ;;  %3017 = vmatprep.subr.bf16.mxu0 %v4070_v50 }
  0x93   : > { %3049 = vmatprep.subr.bf16.mxu1 %v4076_v55 }
  0x95   : > { %3019 = vmatpush1.bf16.msra.mxu0 %v4090_v4 }
  0x96   : > { %3051 = vmatpush1.bf16.msra.mxu1 %v4094_v5  ;;  %3021 = vmatprep.subr.bf16.mxu0 %v4096_v6 }
  0x97   : > { %3053 = vmatprep.subr.bf16.mxu1 %v4101_v3 }
  0x99   : > { %3023 = vmatpush1.bf16.msra.mxu0 %v4109_v16 }
  0x9a   : > { %3055 = vmatpush1.bf16.msra.mxu1 %v4113_v18  ;;  %3057 = vmatprep.subr.bf16.mxu0 %v3917_v20 }
  0x9b   : > { %3089 = vmatprep.subr.bf16.mxu1 %v3921_v23 }
 0x12e   : > { %v584_v40 = vpop.f32.mrb[0].mxu0 }
 0x12f   : > { %v585_v41 = vadd.f32 %v584_v40, %v4162_v31  ;;  %v697_v42 = vpop.f32.mrb[0].mxu1  ;;  %v586_v43 = vpop.f32.mrb[1].mxu0 }
 0x130   : > { %v698_v44 = vadd.f32 %v697_v42, %v4164_v35  ;;  %v587_v51 = vadd.f32 %v586_v43, %v4166_v37  ;;  %v699_v53 = vpop.f32.mrb[1].mxu1 }
 0x131   : > { %744 = vst [vmem:[#allocation4] sm:$0xff] %v585_v41  ;;  %v700_v54 = vadd.f32 %v699_v53, %v4168_v39 }
 0x132   : > { %746 = vst [vmem:[#allocation4 + $0x10] sm:$0xff] %v698_v44  ;;  %745 = vst [vmem:[#allocation4 + $0x8] sm:$0xff] %v587_v51  ;;  %v590_v56 = vpop.f32.mrb[2].mxu0 }
 0x133   : > { %747 = vst [vmem:[#allocation4 + $0x18] sm:$0xff] %v700_v54  ;;  %v591_v57 = vadd.f32 %v590_v56, %v4162_v31  ;;  %v703_v58 = vpop.f32.mrb[2].mxu1  ;;  %v592_v59 = vpop.f32.mrb[3].mxu0 }
 0x134   : > { %v704_v63 = vadd.f32 %v703_v58, %v4164_v35  ;;  %v593_v0 = vadd.f32 %v592_v59, %v4166_v37  ;;  %v705_v1 = vpop.f32.mrb[3].mxu1 }
 0x135   : > { %748 = vst [vmem:[#allocation4 + $0x20] sm:$0xff] %v591_v57  ;;  %v706_v7 = vadd.f32 %v705_v1, %v4168_v39 }
 0x136   : > { %750 = vst [vmem:[#allocation4 + $0x30] sm:$0xff] %v704_v63  ;;  %749 = vst [vmem:[#allocation4 + $0x28] sm:$0xff] %v593_v0  ;;  %v596_v8 = vpop.f32.mrb[4].mxu0 }
 0x137   : > { %751 = vst [vmem:[#allocation4 + $0x38] sm:$0xff] %v706_v7  ;;  %v597_v9 = vadd.f32 %v596_v8, %v4162_v31  ;;  %v709_v14 = vpop.f32.mrb[4].mxu1  ;;  %v598_v15 = vpop.f32.mrb[5].mxu0 }
 0x138   : > { %v710_v19 = vadd.f32 %v709_v14, %v4164_v35  ;;  %v599_v21 = vadd.f32 %v598_v15, %v4166_v37  ;;  %v711_v22 = vpop.f32.mrb[5].mxu1 }
 0x139   : > { %752 = vst [vmem:[#allocation4 + $0x40] sm:$0xff] %v597_v9  ;;  %v712_v24 = vadd.f32 %v711_v22, %v4168_v39 }
 0x13a   : > { %754 = vst [vmem:[#allocation4 + $0x50] sm:$0xff] %v710_v19  ;;  %753 = vst [vmem:[#allocation4 + $0x48] sm:$0xff] %v599_v21  ;;  %v602_v25 = vpop.f32.mrb[6].mxu0 }
 0x13b   : > { %755 = vst [vmem:[#allocation4 + $0x58] sm:$0xff] %v712_v24  ;;  %v603_v26 = vadd.f32 %v602_v25, %v4162_v31  ;;  %v715_v30 = vpop.f32.mrb[6].mxu1  ;;  %v604_v40 = vpop.f32.mrb[7].mxu0 }
 0x13c   : > { %v716_v41 = vadd.f32 %v715_v30, %v4164_v35  ;;  %v605_v42 = vadd.f32 %v604_v40, %v4166_v37  ;;  %v717_v43 = vpop.f32.mrb[7].mxu1 }
 0x13d   : > { %756 = vst [vmem:[#allocation4 + $0x60] sm:$0xff] %v603_v26  ;;  %v718_v44 = vadd.f32 %v717_v43, %v4168_v39 }
 0x13e   : > { %758 = vst [vmem:[#allocation4 + $0x70] sm:$0xff] %v716_v41  ;;  %757 = vst [vmem:[#allocation4 + $0x68] sm:$0xff] %v605_v42  ;;  %v608_v51 = vpop.f32.mrb[8].mxu0 }
 0x13f   : > { %759 = vst [vmem:[#allocation4 + $0x78] sm:$0xff] %v718_v44  ;;  %v609_v53 = vadd.f32 %v608_v51, %v4162_v31  ;;  %v721_v54 = vpop.f32.mrb[8].mxu1  ;;  %v610_v56 = vpop.f32.mrb[9].mxu0 }
 0x140   : > { %v722_v57 = vadd.f32 %v721_v54, %v4164_v35  ;;  %v611_v58 = vadd.f32 %v610_v56, %v4166_v37  ;;  %v723_v59 = vpop.f32.mrb[9].mxu1 }
 0x141   : > { %760 = vst [vmem:[#allocation4 + $0x80] sm:$0xff] %v609_v53  ;;  %v724_v63 = vadd.f32 %v723_v59, %v4168_v39 }
 0x142   : > { %762 = vst [vmem:[#allocation4 + $0x90] sm:$0xff] %v722_v57  ;;  %761 = vst [vmem:[#allocation4 + $0x88] sm:$0xff] %v611_v58  ;;  %v614_v0 = vpop.f32.mrb[10].mxu0 }
 0x143   : > { %763 = vst [vmem:[#allocation4 + $0x98] sm:$0xff] %v724_v63  ;;  %v615_v1 = vadd.f32 %v614_v0, %v4162_v31  ;;  %v727_v7 = vpop.f32.mrb[10].mxu1  ;;  %v616_v8 = vpop.f32.mrb[11].mxu0 }
 0x144   : > { %v728_v9 = vadd.f32 %v727_v7, %v4164_v35  ;;  %v617_v14 = vadd.f32 %v616_v8, %v4166_v37  ;;  %v729_v15 = vpop.f32.mrb[11].mxu1 }
 0x145   : > { %764 = vst [vmem:[#allocation4 + $0xa0] sm:$0xff] %v615_v1  ;;  %v730_v19 = vadd.f32 %v729_v15, %v4168_v39 }
 0x146   : > { %766 = vst [vmem:[#allocation4 + $0xb0] sm:$0xff] %v728_v9  ;;  %765 = vst [vmem:[#allocation4 + $0xa8] sm:$0xff] %v617_v14  ;;  %v620_v21 = vpop.f32.mrb[12].mxu0 }
 0x147   : > { %767 = vst [vmem:[#allocation4 + $0xb8] sm:$0xff] %v730_v19  ;;  %v621_v22 = vadd.f32 %v620_v21, %v4162_v31  ;;  %v733_v24 = vpop.f32.mrb[12].mxu1  ;;  %v622_v25 = vpop.f32.mrb[13].mxu0 }
 0x148   : > { %v734_v26 = vadd.f32 %v733_v24, %v4164_v35  ;;  %v623_v30 = vadd.f32 %v622_v25, %v4166_v37  ;;  %v735_v40 = vpop.f32.mrb[13].mxu1 }
 0x149   : > { %768 = vst [vmem:[#allocation4 + $0xc0] sm:$0xff] %v621_v22  ;;  %v736_v41 = vadd.f32 %v735_v40, %v4168_v39 }
 0x14a   : > { %770 = vst [vmem:[#allocation4 + $0xd0] sm:$0xff] %v734_v26  ;;  %769 = vst [vmem:[#allocation4 + $0xc8] sm:$0xff] %v623_v30  ;;  %v626_v42 = vpop.f32.mrb[14].mxu0 }
 0x14b   : > { %771 = vst [vmem:[#allocation4 + $0xd8] sm:$0xff] %v736_v41  ;;  %v627_v43 = vadd.f32 %v626_v42, %v4162_v31  ;;  %v739_v44 = vpop.f32.mrb[14].mxu1  ;;  %v628_v51 = vpop.f32.mrb[15].mxu0 }
 0x14c   : > { %v740_v53 = vadd.f32 %v739_v44, %v4164_v35  ;;  %v629_v54 = vadd.f32 %v628_v51, %v4166_v37  ;;  %v741_v56 = vpop.f32.mrb[15].mxu1 }
 0x14d   : > { %772 = vst [vmem:[#allocation4 + $0xe0] sm:$0xff] %v627_v43  ;;  %v742_v57 = vadd.f32 %v741_v56, %v4168_v39 }
 0x14e   : > { %774 = vst [vmem:[#allocation4 + $0xf0] sm:$0xff] %v740_v53  ;;  %773 = vst [vmem:[#allocation4 + $0xe8] sm:$0xff] %v629_v54 }
 0x14f   : > { %775 = vst [vmem:[#allocation4 + $0xf8] sm:$0xff] %v742_v57  ;;  %v927_v58 = vpop.f32.mrb[16].mxu0  ;;  %v4209_v57 = vpop.permute.xlu0 %1038 }
 0x150   : > { %v929_v59 = vpop.f32.mrb[17].mxu0  ;;  %v998_v63 = vpop.f32.mrb[16].mxu1 }
 0x151   : > { %v1000_v31 = vpop.f32.mrb[17].mxu1 }
 0x156   : > { %v857_v0 = vld [vmem:[%s856_s13] sm:$0xff]  ;;  %v858_v1 = vld [vmem:[%s856_s13 + $0x8] sm:$0xff]  ;;  %v860_v9 = vld [vmem:[%s856_s13 + $0x18] sm:$0xff] }
 0x157   : > { %v1003_v35 = vadd.f32 %v927_v58, %v857_v0  ;;  %v1004_v7 = vadd.f32 %v929_v59, %v858_v1  ;;  %v1006_v39 = vadd.f32 %v1000_v31, %v860_v9  ;;  %v859_v14 = vld [vmem:[%s856_s13 + $0x10] sm:$0xff]  ;;  %v1443_v59 = vstv %s4262_s7  ;;  %v3612_v31 = vld [vmem:[%s4577_s0] sm:$0xff] }
 0x158   : > { %v1005_v19 = vadd.f32 %v998_v63, %v859_v14  ;;  %v1649_v63 = vstv %s4264_s11  ;;  %vm1444_vm4 = vcmp.lt.s32.totalorder %v1443_v59, %v3612_v31  ;;  %v2061_v1 = vstv %s4271_s14 }
 0x159   : > { %v2728_v37 = vmul.f32 -1.442695, %v1003_v35  ;;  %v2729_v8 = vmul.f32 -1.442695, %v1004_v7  ;;  %v2730_v15 = vmul.f32 -1.442695, %v1006_v39  ;;  %vm1650_vm5 = vcmp.lt.s32.totalorder %v1649_v63, %v3612_v31 }
 0x15a   : > { %v2747_v0 = vsel %vm1444_vm4, 1.0, %v3654_v11  ;;  %v2755_v35 = vsel %vm1650_vm5, 1.0, %v3654_v11  ;;  %vm2062_vm6 = vcmp.lt.s32.totalorder %v2061_v1, %v3612_v31  ;;  %v2470_v7 = vstv %s2286_s15 }
 0x15b   : > { %3484 = vpow2.f32 %v2728_v37  ;;  %1450 = vperm.xlu1 %3483, %v2747_v0   ;;  %v2771_v37 = vsel %vm2062_vm6, 1.0, %v3654_v11  ;;  %vm2471_vm7 = vcmp.lt.s32.totalorder %v2470_v7, %v3612_v31 }
 0x15c   : > { %3486 = vpow2.f32 %v2729_v8  ;;  %v2784_v8 = vsel %vm2471_vm7, 1.0, %v3654_v11 }
 0x15d   : > { %3488 = vpow2.f32 %v2730_v15 }
 0x15e   : > { %3490 = vtanh.f32 %v1005_v19 }
 0x15f   : > { %1656 = vperm.xlu1 %3483, %v2755_v35  }
 0x163   : > { %2068 = vperm.xlu1 %3483, %v2771_v37  }
 0x165   : > { %v3485_v21 = vpop.eup %3484 }
 0x166   : > { %v3487_v22 = vpop.eup %3486  ;;  %v1010_v24 = vadd.f32 1.0, %v3485_v21 }
 0x167   : > { %v1016_v25 = vadd.f32 1.0, %v3487_v22  ;;  %v3489_v26 = vpop.eup %3488  ;;  %2477 = vperm.xlu1 %3483, %v2784_v8  }
 0x168   : > { %3492 = vrcp.f32 %v1010_v24  ;;  %v3491_v30 = vpop.eup %3490  ;;  %v1023_v42 = vadd.f32 1.0, %v3489_v26 }
 0x169   : > { %3494 = vrcp.f32 %v1016_v25 }
 0x16a   : > { %3496 = vrcp.f32 %v1023_v42 }
 0x172   : > { %v3493_v40 = vpop.eup %3492 }
 0x173   : > { %v3495_v41 = vpop.eup %3494  ;;  %v1027_v43 = vmul.f32 %v3493_v40, %v3491_v30 }
 0x174   : > { %v1026_v44 = vmul.f32 0.0, %v3495_v41  ;;  %v3497_v53 = vpop.eup %3496 }
 0x176   : > { %v4205_v51 = vadd.f32 %v1027_v43, %v1026_v44 }
 0x178   : > { %3498 = vtanh.f32 %v4205_v51  ;;  %v1041_v0 = vmul.f32 %v4209_v57, %v4205_v51 }
 0x182   : > { %v3499_v54 = vpop.eup %3498 }
 0x183   : > { %v1030_v56 = vmul.f32 %v3499_v54, %v3497_v53 }
 0x185   : > { %v4217_v58 = vmul.f32 %v4209_v57, %v1030_v56 }
 0x187   : > { %1051 = vst [vmem:[%s1050_s23] sm:$0xff] %v4217_v58  ;;  %1132 = vmatmul.mubr.f32.vlgmr.msra.gmra.mrb[18].mxu0 %v4217_v58  ;;  %1203 = vmatmul.mubr.f32.vlgmr.msra.gmra.mrb[18].mxu1 %v4217_v58  ;;  %s2733_s23 = sshll.u32 %s3756_s16, 3  ;;  %s2741_s16 = sshll.u32 %s4262_s7, 3 }
 0x188   : > { %3059 = vmatpush1.bf16.msra.mxu0 %v3936_v32  ;;  %3091 = vmatpush1.bf16.msra.mxu1 %v3939_v33  ;;  %s1058_s18 = sshra.s32 %s2733_s23, 3  ;;  %s1255_s30 = scalar_lea.vmem %s4211_s17, %s2733_s23 [#allocation5] }
 0x189   : > { %3061 = vmatprep.subr.bf16.mxu0 %v3941_v34  ;;  %3093 = vmatprep.subr.bf16.mxu1 %v3946_v38  ;;  %s2793_s25 = sshll.u32 %s1058_s18, 5  ;;  %s1264_s6 = sshra.s32 %s2741_s16, 3 }
 0x18a   : > { %1337 = vmatprep.mubr.f32.mxu0 %v3654_v11  ;;  %1408 = vmatprep.mubr.f32.mxu1 %v3654_v11  ;;  %s1062_s10 = scalar_lea.vmem [#allocation4], %s2793_s25  ;;  %s2794_s9 = sshll.u32 %s1264_s6, 5 }
 0x18b   : > { %v1063_v9 = vld [vmem:[%s1062_s10] sm:$0xff]  ;;  %v1065_v14 = vld [vmem:[%s1062_s10 + $0x10] sm:$0xff]  ;;  %v1064_v22 = vld [vmem:[%s1062_s10 + $0x8] sm:$0xff]  ;;  %s1268_s12 = scalar_lea.vmem [#allocation4], %s2794_s9  ;;  %s1461_s13 = scalar_lea.vmem %s4211_s17, %s2741_s16 [#allocation5] }
 0x18c   : > { %3063 = vmatpush1.bf16.msra.mxu0 %v3960_v46  ;;  %3095 = vmatpush1.bf16.msra.mxu1 %v3964_v47  ;;  %v1066_v25 = vld [vmem:[%s1062_s10 + $0x18] sm:$0xff]  ;;  %s2749_s7 = sshll.u32 %s4264_s11, 3  ;;  %s2757_s11 = sshll.u32 %s3792_s27, 3 }
 0x18d   : > { %3065 = vmatprep.subr.bf16.mxu0 %v3966_v48  ;;  %3097 = vmatprep.subr.bf16.mxu1 %v3972_v52  ;;  %s1470_s15 = sshra.s32 %s2749_s7, 3  ;;  %s1667_s25 = scalar_lea.vmem %s4211_s17, %s2749_s7 [#allocation5] }
 0x18e   : > { %s2795_s23 = sshll.u32 %s1470_s15, 5  ;;  %s1676_s10 = sshra.s32 %s2757_s11, 3 }
 0x18f   : > { %s1474_s18 = scalar_lea.vmem [#allocation4], %s2795_s23  ;;  %s1873_s6 = scalar_lea.vmem %s4211_s17, %s2757_s11 [#allocation5] }
 0x190   : > { %3067 = vmatpush1.bf16.msra.mxu0 %v3986_v60  ;;  %3099 = vmatpush1.bf16.msra.mxu1 %v3990_v61  ;;  %s2765_s27 = sshll.u32 %s4271_s14, 3  ;;  %s2772_s14 = sshll.u32 %s3799_s29, 3 }
 0x191   : > { %3069 = vmatprep.subr.bf16.mxu0 %v3992_v62  ;;  %3101 = vmatprep.subr.bf16.mxu1 %v3998_v2  ;;  %s1882_s9 = sshra.s32 %s2765_s27, 3  ;;  %s2079_s7 = scalar_lea.vmem %s4211_s17, %s2765_s27 [#allocation5] }
 0x192   : > { %s2087_s15 = sshra.s32 %s2772_s14, 3  ;;  %s2290_s11 = smul.u32 56, %s3737_s8 }
 0x193   : > { %s2798_s23 = sshll.u32 %s2087_s15, 5 }
 0x194   : > { %3071 = vmatpush1.bf16.msra.mxu0 %v4012_v10  ;;  %3103 = vmatpush1.bf16.msra.mxu1 %v4016_v12  ;;  %s2489_s29 = scalar_lea.vmem %s4211_s17, %s2290_s11 [#allocation5] }
 0x195   : > { %3073 = vmatprep.subr.bf16.mxu0 %v4018_v13  ;;  %3105 = vmatprep.subr.bf16.mxu1 %v4024_v17 }
 0x198   : > { %3075 = vmatpush1.bf16.msra.mxu0 %v4038_v27  ;;  %3107 = vmatpush1.bf16.msra.mxu1 %v4042_v28 }
 0x199   : > { %3077 = vmatprep.subr.bf16.mxu0 %v4044_v29  ;;  %3109 = vmatprep.subr.bf16.mxu1 %v4050_v36 }
 0x19c   : > { %3079 = vmatpush1.bf16.msra.mxu0 %v4064_v45  ;;  %3111 = vmatpush1.bf16.msra.mxu1 %v4068_v49 }
 0x19d   : > { %3081 = vmatprep.subr.bf16.mxu0 %v4070_v50  ;;  %3113 = vmatprep.subr.bf16.mxu1 %v4076_v55 }
 0x1a0   : > { %3083 = vmatpush1.bf16.msra.mxu0 %v4090_v4  ;;  %3115 = vmatpush1.bf16.msra.mxu1 %v4094_v5 }
 0x1a1   : > { %3085 = vmatprep.subr.bf16.mxu0 %v4096_v6  ;;  %3117 = vmatprep.subr.bf16.mxu1 %v4101_v3 }
 0x1a4   : > { %3087 = vmatpush1.bf16.msra.mxu0 %v4109_v16  ;;  %3119 = vmatpush1.bf16.msra.mxu1 %v4113_v18 }
 0x1a5   : > { %3121 = vmatprep.subr.bf16.mxu0 %v3917_v20  ;;  %3153 = vmatprep.subr.bf16.mxu1 %v3921_v23 }
 0x25a   : > { %v1133_v39 = vpop.f32.mrb[18].mxu0  ;;  %v1204_v15 = vpop.f32.mrb[18].mxu1 }
 0x25b   : > { %v1209_v19 = vadd.f32 %v1133_v39, %v1063_v9  ;;  %v1211_v21 = vadd.f32 %v1204_v15, %v1065_v14  ;;  %v1135_v24 = vpop.f32.mrb[19].mxu0  ;;  %v1206_v26 = vpop.f32.mrb[19].mxu1 }
 0x25c   : > { %v1210_v30 = vadd.f32 %v1135_v24, %v1064_v22  ;;  %v1212_v40 = vadd.f32 %v1206_v26, %v1066_v25  ;;  %v1245_v39 = vpop.permute.xlu0 %1244 }
 0x25d   : > { %v2736_v41 = vmul.f32 -1.442695, %v1209_v19 }
 0x25e   : > { %v2737_v42 = vmul.f32 -1.442695, %v1210_v30  ;;  %v2738_v43 = vmul.f32 -1.442695, %v1212_v40 }
 0x25f   : > { %3500 = vpow2.f32 %v2736_v41  ;;  %v1270_v41 = vld [vmem:[%s1268_s12 + $0x8] sm:$0xff] }
 0x260   : > { %3502 = vpow2.f32 %v2737_v42 }
 0x261   : > { %3504 = vpow2.f32 %v2738_v43 }
 0x262   : > { %3506 = vtanh.f32 %v1211_v21 }
 0x269   : > { %v3501_v44 = vpop.eup %3500 }
 0x26a   : > { %v3503_v53 = vpop.eup %3502  ;;  %v1216_v54 = vadd.f32 1.0, %v3501_v44 }
 0x26b   : > { %v1222_v56 = vadd.f32 1.0, %v3503_v53  ;;  %v3505_v59 = vpop.eup %3504 }
 0x26c   : > { %3508 = vrcp.f32 %v1216_v54  ;;  %v3507_v63 = vpop.eup %3506  ;;  %v1229_v7 = vadd.f32 1.0, %v3505_v59 }
 0x26d   : > { %3510 = vrcp.f32 %v1222_v56  ;;  %v1272_v56 = vld [vmem:[%s1268_s12 + $0x18] sm:$0xff] }
 0x26e   : > { %3512 = vrcp.f32 %v1229_v7 }
 0x276   : > { %v3509_v31 = vpop.eup %3508 }
 0x277   : > { %v3511_v1 = vpop.eup %3510  ;;  %v1233_v35 = vmul.f32 %v3509_v31, %v3507_v63  ;;  %v1271_v63 = vld [vmem:[%s1268_s12 + $0x10] sm:$0xff] }
 0x278   : > { %v1232_v37 = vmul.f32 %v3511_v1, %v1041_v0  ;;  %v3513_v19 = vpop.eup %3512 }
 0x27a   : > { %v1234_v8 = vadd.f32 %v1233_v35, %v1232_v37 }
 0x27c   : > { %3514 = vtanh.f32 %v1234_v8  ;;  %v1241_v9 = vsub.f32 %v1234_v8, %v1041_v0 }
 0x27e   : > { %v1247_v14 = vmul.f32 %v1245_v39, %v1241_v9 }
 0x280   : > { %v4284_v15 = vadd.f32 %v1247_v14, %v1041_v0 }
 0x286   : > { %v3515_v21 = vpop.eup %3514 }
 0x287   : > { %v1236_v22 = vmul.f32 %v3515_v21, %v3513_v19 }
 0x289   : > { %v1250_v24 = vsub.f32 %v1236_v22, %v4217_v58  ;;  %v1254_v51 = vmul.f32 %v1245_v39, %v1236_v22 }
 0x28b   : > { %v1251_v57 = vmul.f32 %v1250_v24, %v1245_v39  ;;  %1256 = vst [vmem:[%s1255_s30] sm:$0xff] %v1254_v51  ;;  %v1451_v51 = vpop.permute.xlu1 %1450  ;;  %s2796_s30 = sshll.u32 %s1676_s10, 5  ;;  %s2291_s10 = sshra.s32 %s2290_s11, 3 }
 0x28c   : > { %s1680_s16 = scalar_lea.vmem [#allocation4], %s2796_s30  ;;  %s2799_s30 = sshll.u32 %s2291_s10, 5 }
 0x28d   : > { %v4291_v25 = vadd.f32 %v1251_v57, %v4217_v58  ;;  %v1269_v58 = vld [vmem:[%s1268_s12] sm:$0xff]  ;;  %s2797_s12 = sshll.u32 %s1882_s9, 5 }
 0x28f   : > { %1338 = vmatmul.mubr.f32.vlgmr.msra.gmra.mrb[20].mxu0 %v4291_v25  ;;  %1409 = vmatmul.mubr.f32.vlgmr.msra.gmra.mrb[20].mxu1 %v4291_v25 }
 0x290   : > { %3123 = vmatpush1.bf16.msra.mxu0 %v3936_v32  ;;  %3155 = vmatpush1.bf16.msra.mxu1 %v3939_v33 }
 0x291   : > { %3125 = vmatprep.subr.bf16.mxu0 %v3941_v34  ;;  %3157 = vmatprep.subr.bf16.mxu1 %v3946_v38 }
 0x292   : > { %1543 = vmatprep.mubr.f32.mxu0 %v3654_v11  ;;  %1614 = vmatprep.mubr.f32.mxu1 %v3654_v11 }
 0x294   : > { %3127 = vmatpush1.bf16.msra.mxu0 %v3960_v46  ;;  %3159 = vmatpush1.bf16.msra.mxu1 %v3964_v47 }
 0x295   : > { %3129 = vmatprep.subr.bf16.mxu0 %v3966_v48  ;;  %3161 = vmatprep.subr.bf16.mxu1 %v3972_v52 }
 0x298   : > { %3131 = vmatpush1.bf16.msra.mxu0 %v3986_v60  ;;  %3163 = vmatpush1.bf16.msra.mxu1 %v3990_v61 }
 0x299   : > { %3133 = vmatprep.subr.bf16.mxu0 %v3992_v62  ;;  %3165 = vmatprep.subr.bf16.mxu1 %v3998_v2 }
 0x29c   : > { %3135 = vmatpush1.bf16.msra.mxu0 %v4012_v10  ;;  %3167 = vmatpush1.bf16.msra.mxu1 %v4016_v12 }
 0x29d   : > { %3137 = vmatprep.subr.bf16.mxu0 %v4018_v13  ;;  %3169 = vmatprep.subr.bf16.mxu1 %v4024_v17 }
 0x2a0   : > { %3139 = vmatpush1.bf16.msra.mxu0 %v4038_v27  ;;  %3171 = vmatpush1.bf16.msra.mxu1 %v4042_v28 }
 0x2a1   : > { %3141 = vmatprep.subr.bf16.mxu0 %v4044_v29  ;;  %3173 = vmatprep.subr.bf16.mxu1 %v4050_v36 }
 0x2a4   : > { %3143 = vmatpush1.bf16.msra.mxu0 %v4064_v45  ;;  %3175 = vmatpush1.bf16.msra.mxu1 %v4068_v49 }
 0x2a5   : > { %3145 = vmatprep.subr.bf16.mxu0 %v4070_v50  ;;  %3177 = vmatprep.subr.bf16.mxu1 %v4076_v55 }
 0x2a8   : > { %3147 = vmatpush1.bf16.msra.mxu0 %v4090_v4  ;;  %3179 = vmatpush1.bf16.msra.mxu1 %v4094_v5 }
 0x2a9   : > { %3149 = vmatprep.subr.bf16.mxu0 %v4096_v6  ;;  %3181 = vmatprep.subr.bf16.mxu1 %v4101_v3 }
 0x2ac   : > { %3151 = vmatpush1.bf16.msra.mxu0 %v4109_v16  ;;  %3183 = vmatpush1.bf16.msra.mxu1 %v4113_v18 }
 0x2ad   : > { %3185 = vmatprep.subr.bf16.mxu0 %v3917_v20  ;;  %3217 = vmatprep.subr.bf16.mxu1 %v3921_v23 }
 0x362   : > { %v1339_v26 = vpop.f32.mrb[20].mxu0  ;;  %v1410_v30 = vpop.f32.mrb[20].mxu1 }
 0x363   : > { %v1415_v40 = vadd.f32 %v1339_v26, %v1269_v58  ;;  %v1341_v42 = vpop.f32.mrb[21].mxu0  ;;  %v1412_v43 = vpop.f32.mrb[21].mxu1  ;;  %v1417_v0 = vadd.f32 %v1410_v30, %v1271_v63 }
 0x364   : > { %v1416_v44 = vadd.f32 %v1341_v42, %v1270_v41  ;;  %v1418_v59 = vadd.f32 %v1412_v43, %v1272_v56 }
 0x365   : > { %v2744_v53 = vmul.f32 -1.442695, %v1415_v40 }
 0x366   : > { %v2745_v54 = vmul.f32 -1.442695, %v1416_v44  ;;  %v2746_v31 = vmul.f32 -1.442695, %v1418_v59  ;;  %v1476_v59 = vld [vmem:[%s1474_s18 + $0x8] sm:$0xff] }
 0x367   : > { %3516 = vpow2.f32 %v2744_v53 }
 0x368   : > { %3518 = vpow2.f32 %v2745_v54 }
 0x369   : > { %3520 = vpow2.f32 %v2746_v31 }
 0x36a   : > { %3522 = vtanh.f32 %v1417_v0 }
 0x371   : > { %v3517_v1 = vpop.eup %3516 }
 0x372   : > { %v3519_v35 = vpop.eup %3518  ;;  %v1422_v7 = vadd.f32 1.0, %v3517_v1 }
 0x373   : > { %v1428_v37 = vadd.f32 1.0, %v3519_v35  ;;  %v3521_v8 = vpop.eup %3520 }
 0x374   : > { %3524 = vrcp.f32 %v1422_v7  ;;  %v3523_v9 = vpop.eup %3522  ;;  %v1435_v19 = vadd.f32 1.0, %v3521_v8  ;;  %v1478_v7 = vld [vmem:[%s1474_s18 + $0x18] sm:$0xff]  ;;  %v1477_v8 = vld [vmem:[%s1474_s18 + $0x10] sm:$0xff] }
 0x375   : > { %3526 = vrcp.f32 %v1428_v37 }
 0x376   : > { %3528 = vrcp.f32 %v1435_v19 }
 0x37e   : > { %v3525_v39 = vpop.eup %3524 }
 0x37f   : > { %v3527_v14 = vpop.eup %3526  ;;  %v1439_v21 = vmul.f32 %v3525_v39, %v3523_v9 }
 0x380   : > { %v1438_v22 = vmul.f32 %v3527_v14, %v4284_v15  ;;  %v3529_v30 = vpop.eup %3528 }
 0x382   : > { %v1440_v24 = vadd.f32 %v1439_v21, %v1438_v22 }
 0x384   : > { %3530 = vtanh.f32 %v1440_v24  ;;  %v1447_v57 = vsub.f32 %v1440_v24, %v4284_v15 }
 0x386   : > { %v1453_v58 = vmul.f32 %v1451_v51, %v1447_v57 }
 0x388   : > { %v4335_v26 = vadd.f32 %v1453_v58, %v4284_v15  ;;  %v1475_v15 = vld [vmem:[%s1474_s18] sm:$0xff]  ;;  %s2091_s18 = scalar_lea.vmem [#allocation4], %s2798_s23 }
 0x38e   : > { %v3531_v40 = vpop.eup %3530 }
 0x38f   : > { %v1442_v41 = vmul.f32 %v3531_v40, %v3529_v30 }
 0x391   : > { %v1456_v42 = vsub.f32 %v1442_v41, %v4291_v25  ;;  %v1460_v43 = vmul.f32 %v1451_v51, %v1442_v41 }
 0x393   : > { %v1457_v44 = vmul.f32 %v1456_v42, %v1451_v51  ;;  %1462 = vst [vmem:[%s1461_s13] sm:$0xff] %v1460_v43  ;;  %s1886_s13 = scalar_lea.vmem [#allocation4], %s2797_s12 }
 0x395   : > { %v4342_v53 = vadd.f32 %v1457_v44, %v4291_v25  ;;  %v1657_v44 = vpop.permute.xlu1 %1656 }
 0x397   : > { %1544 = vmatmul.mubr.f32.vlgmr.msra.gmra.mrb[22].mxu0 %v4342_v53  ;;  %1615 = vmatmul.mubr.f32.vlgmr.msra.gmra.mrb[22].mxu1 %v4342_v53 }
 0x398   : > { %3187 = vmatpush1.bf16.msra.mxu0 %v3936_v32  ;;  %3219 = vmatpush1.bf16.msra.mxu1 %v3939_v33 }
 0x399   : > { %3189 = vmatprep.subr.bf16.mxu0 %v3941_v34  ;;  %3221 = vmatprep.subr.bf16.mxu1 %v3946_v38 }
 0x39a   : > { %1749 = vmatprep.mubr.f32.mxu0 %v3654_v11  ;;  %1820 = vmatprep.mubr.f32.mxu1 %v3654_v11 }
 0x39c   : > { %3191 = vmatpush1.bf16.msra.mxu0 %v3960_v46  ;;  %3223 = vmatpush1.bf16.msra.mxu1 %v3964_v47 }
 0x39d   : > { %3193 = vmatprep.subr.bf16.mxu0 %v3966_v48  ;;  %3225 = vmatprep.subr.bf16.mxu1 %v3972_v52 }
 0x3a0   : > { %3195 = vmatpush1.bf16.msra.mxu0 %v3986_v60  ;;  %3227 = vmatpush1.bf16.msra.mxu1 %v3990_v61 }
 0x3a1   : > { %3197 = vmatprep.subr.bf16.mxu0 %v3992_v62  ;;  %3229 = vmatprep.subr.bf16.mxu1 %v3998_v2 }
 0x3a4   : > { %3199 = vmatpush1.bf16.msra.mxu0 %v4012_v10  ;;  %3231 = vmatpush1.bf16.msra.mxu1 %v4016_v12 }
 0x3a5   : > { %3201 = vmatprep.subr.bf16.mxu0 %v4018_v13  ;;  %3233 = vmatprep.subr.bf16.mxu1 %v4024_v17 }
 0x3a8   : > { %3203 = vmatpush1.bf16.msra.mxu0 %v4038_v27  ;;  %3235 = vmatpush1.bf16.msra.mxu1 %v4042_v28 }
 0x3a9   : > { %3205 = vmatprep.subr.bf16.mxu0 %v4044_v29  ;;  %3237 = vmatprep.subr.bf16.mxu1 %v4050_v36 }
 0x3ac   : > { %3207 = vmatpush1.bf16.msra.mxu0 %v4064_v45  ;;  %3239 = vmatpush1.bf16.msra.mxu1 %v4068_v49 }
 0x3ad   : > { %3209 = vmatprep.subr.bf16.mxu0 %v4070_v50  ;;  %3241 = vmatprep.subr.bf16.mxu1 %v4076_v55 }
 0x3b0   : > { %3211 = vmatpush1.bf16.msra.mxu0 %v4090_v4  ;;  %3243 = vmatpush1.bf16.msra.mxu1 %v4094_v5 }
 0x3b1   : > { %3213 = vmatprep.subr.bf16.mxu0 %v4096_v6  ;;  %3245 = vmatprep.subr.bf16.mxu1 %v4101_v3 }
 0x3b4   : > { %3215 = vmatpush1.bf16.msra.mxu0 %v4109_v16  ;;  %3247 = vmatpush1.bf16.msra.mxu1 %v4113_v18 }
 0x3b5   : > { %3249 = vmatprep.subr.bf16.mxu0 %v3917_v20  ;;  %3281 = vmatprep.subr.bf16.mxu1 %v3921_v23 }
 0x46a   : > { %v1545_v25 = vpop.f32.mrb[22].mxu0  ;;  %v1616_v54 = vpop.f32.mrb[22].mxu1 }
 0x46b   : > { %v1621_v56 = vadd.f32 %v1545_v25, %v1475_v15  ;;  %v1547_v63 = vpop.f32.mrb[23].mxu0  ;;  %v1618_v31 = vpop.f32.mrb[23].mxu1  ;;  %v1623_v39 = vadd.f32 %v1616_v54, %v1477_v8 }
 0x46c   : > { %v1622_v0 = vadd.f32 %v1547_v63, %v1476_v59  ;;  %v1624_v37 = vadd.f32 %v1618_v31, %v1478_v7 }
 0x46d   : > { %v2752_v1 = vmul.f32 -1.442695, %v1621_v56 }
 0x46e   : > { %v2753_v35 = vmul.f32 -1.442695, %v1622_v0  ;;  %v2754_v9 = vmul.f32 -1.442695, %v1624_v37 }
 0x46f   : > { %3532 = vpow2.f32 %v2752_v1 }
 0x470   : > { %3534 = vpow2.f32 %v2753_v35  ;;  %v1683_v35 = vld [vmem:[%s1680_s16 + $0x10] sm:$0xff] }
 0x471   : > { %3536 = vpow2.f32 %v2754_v9  ;;  %v1682_v9 = vld [vmem:[%s1680_s16 + $0x8] sm:$0xff] }
 0x472   : > { %3538 = vtanh.f32 %v1623_v39 }
 0x479   : > { %v3533_v14 = vpop.eup %3532 }
 0x47a   : > { %v3535_v19 = vpop.eup %3534  ;;  %v1628_v21 = vadd.f32 1.0, %v3533_v14  ;;  %v1684_v14 = vld [vmem:[%s1680_s16 + $0x18] sm:$0xff] }
 0x47b   : > { %v1634_v22 = vadd.f32 1.0, %v3535_v19  ;;  %v3537_v24 = vpop.eup %3536 }
 0x47c   : > { %3540 = vrcp.f32 %v1628_v21  ;;  %v3539_v51 = vpop.eup %3538  ;;  %v1641_v40 = vadd.f32 1.0, %v3537_v24 }
 0x47d   : > { %3542 = vrcp.f32 %v1634_v22 }
 0x47e   : > { %3544 = vrcp.f32 %v1641_v40 }
 0x486   : > { %v3541_v57 = vpop.eup %3540 }
 0x487   : > { %v3543_v58 = vpop.eup %3542  ;;  %v1645_v30 = vmul.f32 %v3541_v57, %v3539_v51 }
 0x488   : > { %v1644_v41 = vmul.f32 %v3543_v58, %v4335_v26  ;;  %v3545_v54 = vpop.eup %3544 }
 0x48a   : > { %v1646_v42 = vadd.f32 %v1645_v30, %v1644_v41 }
 0x48c   : > { %3546 = vtanh.f32 %v1646_v42  ;;  %v1653_v43 = vsub.f32 %v1646_v42, %v4335_v26 }
 0x48e   : > { %v1659_v15 = vmul.f32 %v1657_v44, %v1653_v43 }
 0x490   : > { %v4386_v25 = vadd.f32 %v1659_v15, %v4335_v26  ;;  %v1681_v26 = vld [vmem:[%s1680_s16] sm:$0xff]  ;;  %s2295_s16 = scalar_lea.vmem [#allocation4], %s2799_s30 }
 0x496   : > { %v3547_v56 = vpop.eup %3546 }
 0x497   : > { %v1648_v59 = vmul.f32 %v3547_v56, %v3545_v54 }
 0x499   : > { %v1662_v63 = vsub.f32 %v1648_v59, %v4342_v53  ;;  %v1666_v31 = vmul.f32 %v1657_v44, %v1648_v59 }
 0x49b   : > { %v1663_v0 = vmul.f32 %v1662_v63, %v1657_v44  ;;  %1668 = vst [vmem:[%s1667_s25] sm:$0xff] %v1666_v31  ;;  %s2284_s25 = scalar_lea.vmem %s4211_s17, %s2772_s14 [#allocation5] }
 0x49d   : > { %v4393_v1 = vadd.f32 %v1663_v0, %v4342_v53  ;;  %v1863_v0 = vpop.permute.xlu0 %1862 }
 0x49f   : > { %1750 = vmatmul.mubr.f32.vlgmr.msra.gmra.mrb[24].mxu0 %v4393_v1  ;;  %1821 = vmatmul.mubr.f32.vlgmr.msra.gmra.mrb[24].mxu1 %v4393_v1 }
 0x4a0   : > { %3251 = vmatpush1.bf16.msra.mxu0 %v3936_v32  ;;  %3283 = vmatpush1.bf16.msra.mxu1 %v3939_v33 }
 0x4a1   : > { %3253 = vmatprep.subr.bf16.mxu0 %v3941_v34  ;;  %3285 = vmatprep.subr.bf16.mxu1 %v3946_v38 }
 0x4a2   : > { %1955 = vmatprep.mubr.f32.mxu0 %v3654_v11  ;;  %2026 = vmatprep.mubr.f32.mxu1 %v3654_v11 }
 0x4a4   : > { %3255 = vmatpush1.bf16.msra.mxu0 %v3960_v46  ;;  %3287 = vmatpush1.bf16.msra.mxu1 %v3964_v47 }
 0x4a5   : > { %3257 = vmatprep.subr.bf16.mxu0 %v3966_v48  ;;  %3289 = vmatprep.subr.bf16.mxu1 %v3972_v52 }
 0x4a8   : > { %3259 = vmatpush1.bf16.msra.mxu0 %v3986_v60  ;;  %3291 = vmatpush1.bf16.msra.mxu1 %v3990_v61 }
 0x4a9   : > { %3261 = vmatprep.subr.bf16.mxu0 %v3992_v62  ;;  %3293 = vmatprep.subr.bf16.mxu1 %v3998_v2 }
 0x4ac   : > { %3263 = vmatpush1.bf16.msra.mxu0 %v4012_v10  ;;  %3295 = vmatpush1.bf16.msra.mxu1 %v4016_v12 }
 0x4ad   : > { %3265 = vmatprep.subr.bf16.mxu0 %v4018_v13  ;;  %3297 = vmatprep.subr.bf16.mxu1 %v4024_v17 }
 0x4b0   : > { %3267 = vmatpush1.bf16.msra.mxu0 %v4038_v27  ;;  %3299 = vmatpush1.bf16.msra.mxu1 %v4042_v28 }
 0x4b1   : > { %3269 = vmatprep.subr.bf16.mxu0 %v4044_v29  ;;  %3301 = vmatprep.subr.bf16.mxu1 %v4050_v36 }
 0x4b4   : > { %3271 = vmatpush1.bf16.msra.mxu0 %v4064_v45  ;;  %3303 = vmatpush1.bf16.msra.mxu1 %v4068_v49 }
 0x4b5   : > { %3273 = vmatprep.subr.bf16.mxu0 %v4070_v50  ;;  %3305 = vmatprep.subr.bf16.mxu1 %v4076_v55 }
 0x4b8   : > { %3275 = vmatpush1.bf16.msra.mxu0 %v4090_v4  ;;  %3307 = vmatpush1.bf16.msra.mxu1 %v4094_v5 }
 0x4b9   : > { %3277 = vmatprep.subr.bf16.mxu0 %v4096_v6  ;;  %3309 = vmatprep.subr.bf16.mxu1 %v4101_v3 }
 0x4bc   : > { %3279 = vmatpush1.bf16.msra.mxu0 %v4109_v16  ;;  %3311 = vmatpush1.bf16.msra.mxu1 %v4113_v18 }
 0x4bd   : > { %3313 = vmatprep.subr.bf16.mxu0 %v3917_v20  ;;  %3345 = vmatprep.subr.bf16.mxu1 %v3921_v23 }
 0x572   : > { %v1751_v53 = vpop.f32.mrb[24].mxu0  ;;  %v1822_v7 = vpop.f32.mrb[24].mxu1 }
 0x573   : > { %v1827_v37 = vadd.f32 %v1751_v53, %v1681_v26  ;;  %v1829_v8 = vadd.f32 %v1822_v7, %v1683_v35  ;;  %v1753_v39 = vpop.f32.mrb[25].mxu0  ;;  %v1824_v19 = vpop.f32.mrb[25].mxu1 }
 0x574   : > { %v1828_v21 = vadd.f32 %v1753_v39, %v1682_v9  ;;  %v1830_v22 = vadd.f32 %v1824_v19, %v1684_v14 }
 0x575   : > { %v2760_v24 = vmul.f32 -1.442695, %v1827_v37 }
 0x576   : > { %v2761_v51 = vmul.f32 -1.442695, %v1828_v21  ;;  %v2762_v57 = vmul.f32 -1.442695, %v1830_v22  ;;  %v1888_v22 = vld [vmem:[%s1886_s13 + $0x8] sm:$0xff] }
 0x577   : > { %3548 = vpow2.f32 %v2760_v24 }
 0x578   : > { %3550 = vpow2.f32 %v2761_v51 }
 0x579   : > { %3552 = vpow2.f32 %v2762_v57 }
 0x57a   : > { %3554 = vtanh.f32 %v1829_v8 }
 0x581   : > { %v3549_v58 = vpop.eup %3548 }
 0x582   : > { %v3551_v30 = vpop.eup %3550  ;;  %v1834_v40 = vadd.f32 1.0, %v3549_v58 }
 0x583   : > { %v1840_v41 = vadd.f32 1.0, %v3551_v30  ;;  %v3553_v42 = vpop.eup %3552 }
 0x584   : > { %3556 = vrcp.f32 %v1834_v40  ;;  %v3555_v43 = vpop.eup %3554  ;;  %v1847_v56 = vadd.f32 1.0, %v3553_v42 }
 0x585   : > { %3558 = vrcp.f32 %v1840_v41 }
 0x586   : > { %3560 = vrcp.f32 %v1847_v56 }
 0x58e   : > { %v3557_v44 = vpop.eup %3556 }
 0x58f   : > { %v3559_v15 = vpop.eup %3558  ;;  %v1851_v54 = vmul.f32 %v3557_v44, %v3555_v43 }
 0x590   : > { %v1850_v59 = vmul.f32 %v3559_v15, %v4386_v25  ;;  %v3561_v35 = vpop.eup %3560 }
 0x592   : > { %v1852_v63 = vadd.f32 %v1851_v54, %v1850_v59 }
 0x594   : > { %3562 = vtanh.f32 %v1852_v63  ;;  %v1859_v31 = vsub.f32 %v1852_v63, %v4386_v25 }
 0x596   : > { %v1865_v26 = vmul.f32 %v1863_v0, %v1859_v31 }
 0x598   : > { %v4437_v53 = vadd.f32 %v1865_v26, %v4386_v25  ;;  %v1887_v25 = vld [vmem:[%s1886_s13] sm:$0xff] }
 0x59e   : > { %v3563_v7 = vpop.eup %3562 }
 0x59f   : > { %v1854_v37 = vmul.f32 %v3563_v7, %v3561_v35 }
 0x5a1   : > { %v1868_v8 = vsub.f32 %v1854_v37, %v4393_v1  ;;  %v1872_v9 = vmul.f32 %v1863_v0, %v1854_v37 }
 0x5a3   : > { %v1869_v39 = vmul.f32 %v1868_v8, %v1863_v0  ;;  %1874 = vst [vmem:[%s1873_s6] sm:$0xff] %v1872_v9  ;;  %v2069_v8 = vpop.permute.xlu1 %2068  ;;  %s2787_s6 = sshll.u32 (%p3717_p3), %s3643_s20, 3 }
 0x5a4   : > { %s2507_s9 = scalar_lea.vmem (%p3717_p3), %s4582_s5, %s2787_s6 }
 0x5a5   : > { %v4444_v14 = vadd.f32 %v1869_v39, %v4393_v1 }
 0x5a7   : > { %1956 = vmatmul.mubr.f32.vlgmr.msra.gmra.mrb[26].mxu0 %v4444_v14  ;;  %2027 = vmatmul.mubr.f32.vlgmr.msra.gmra.mrb[26].mxu1 %v4444_v14 }
 0x5a8   : > { %3315 = vmatpush1.bf16.msra.mxu0 %v3936_v32  ;;  %3347 = vmatpush1.bf16.msra.mxu1 %v3939_v33 }
 0x5a9   : > { %3317 = vmatprep.subr.bf16.mxu0 %v3941_v34  ;;  %3349 = vmatprep.subr.bf16.mxu1 %v3946_v38 }
 0x5aa   : > { %2160 = vmatprep.mubr.f32.mxu0 %v3654_v11  ;;  %2231 = vmatprep.mubr.f32.mxu1 %v3654_v11 }
 0x5ac   : > { %3319 = vmatpush1.bf16.msra.mxu0 %v3960_v46  ;;  %3351 = vmatpush1.bf16.msra.mxu1 %v3964_v47 }
 0x5ad   : > { %3321 = vmatprep.subr.bf16.mxu0 %v3966_v48  ;;  %3353 = vmatprep.subr.bf16.mxu1 %v3972_v52 }
 0x5b0   : > { %3323 = vmatpush1.bf16.msra.mxu0 %v3986_v60  ;;  %3355 = vmatpush1.bf16.msra.mxu1 %v3990_v61 }
 0x5b1   : > { %3325 = vmatprep.subr.bf16.mxu0 %v3992_v62  ;;  %3357 = vmatprep.subr.bf16.mxu1 %v3998_v2 }
 0x5b4   : > { %3327 = vmatpush1.bf16.msra.mxu0 %v4012_v10  ;;  %3359 = vmatpush1.bf16.msra.mxu1 %v4016_v12 }
 0x5b5   : > { %3329 = vmatprep.subr.bf16.mxu0 %v4018_v13  ;;  %3361 = vmatprep.subr.bf16.mxu1 %v4024_v17 }
 0x5b8   : > { %3331 = vmatpush1.bf16.msra.mxu0 %v4038_v27  ;;  %3363 = vmatpush1.bf16.msra.mxu1 %v4042_v28 }
 0x5b9   : > { %3333 = vmatprep.subr.bf16.mxu0 %v4044_v29  ;;  %3365 = vmatprep.subr.bf16.mxu1 %v4050_v36 }
 0x5bc   : > { %3335 = vmatpush1.bf16.msra.mxu0 %v4064_v45  ;;  %3367 = vmatpush1.bf16.msra.mxu1 %v4068_v49 }
 0x5bd   : > { %3337 = vmatprep.subr.bf16.mxu0 %v4070_v50  ;;  %3369 = vmatprep.subr.bf16.mxu1 %v4076_v55 }
 0x5c0   : > { %3339 = vmatpush1.bf16.msra.mxu0 %v4090_v4  ;;  %3371 = vmatpush1.bf16.msra.mxu1 %v4094_v5 }
 0x5c1   : > { %3341 = vmatprep.subr.bf16.mxu0 %v4096_v6  ;;  %3373 = vmatprep.subr.bf16.mxu1 %v4101_v3 }
 0x5c4   : > { %3343 = vmatpush1.bf16.msra.mxu0 %v4109_v16  ;;  %3375 = vmatpush1.bf16.msra.mxu1 %v4113_v18 }
 0x5c5   : > { %3377 = vmatprep.subr.bf16.mxu0 %v3917_v20  ;;  %3409 = vmatprep.subr.bf16.mxu1 %v3921_v23  ;;  %v1890_v20 = vld [vmem:[%s1886_s13 + $0x18] sm:$0xff]  ;;  %v1889_v23 = vld [vmem:[%s1886_s13 + $0x10] sm:$0xff] }
 0x67a   : > { %v1957_v1 = vpop.f32.mrb[26].mxu0  ;;  %v2028_v19 = vpop.f32.mrb[26].mxu1 }
 0x67b   : > { %v2033_v21 = vadd.f32 %v1957_v1, %v1887_v25  ;;  %v1959_v24 = vpop.f32.mrb[27].mxu0  ;;  %v2030_v51 = vpop.f32.mrb[27].mxu1  ;;  %v2035_v42 = vadd.f32 %v2028_v19, %v1889_v23  ;;  %v2296_v23 = vld [vmem:[%s2295_s16] sm:$0xff] }
 0x67c   : > { %v2034_v57 = vadd.f32 %v1959_v24, %v1888_v22  ;;  %v2036_v40 = vadd.f32 %v2030_v51, %v1890_v20 }
 0x67d   : > { %v2768_v58 = vmul.f32 -1.442695, %v2033_v21 }
 0x67e   : > { %v2769_v30 = vmul.f32 -1.442695, %v2034_v57  ;;  %v2770_v41 = vmul.f32 -1.442695, %v2036_v40 }
 0x67f   : > { %3564 = vpow2.f32 %v2768_v58 }
 0x680   : > { %3566 = vpow2.f32 %v2769_v30 }
 0x681   : > { %3568 = vpow2.f32 %v2770_v41 }
 0x682   : > { %3570 = vtanh.f32 %v2035_v42 }
 0x689   : > { %v3565_v43 = vpop.eup %3564 }
 0x68a   : > { %v3567_v44 = vpop.eup %3566  ;;  %v2040_v15 = vadd.f32 1.0, %v3565_v43 }
 0x68b   : > { %v2046_v54 = vadd.f32 1.0, %v3567_v44  ;;  %v3569_v56 = vpop.eup %3568  ;;  %v2297_v44 = vld [vmem:[%s2295_s16 + $0x8] sm:$0xff] }
 0x68c   : > { %3572 = vrcp.f32 %v2040_v15  ;;  %v3571_v59 = vpop.eup %3570  ;;  %v2053_v26 = vadd.f32 1.0, %v3569_v56 }
 0x68d   : > { %3574 = vrcp.f32 %v2046_v54 }
 0x68e   : > { %3576 = vrcp.f32 %v2053_v26  ;;  %v2298_v26 = vld [vmem:[%s2295_s16 + $0x10] sm:$0xff] }
 0x696   : > { %v3573_v63 = vpop.eup %3572 }
 0x697   : > { %v3575_v31 = vpop.eup %3574  ;;  %v2057_v0 = vmul.f32 %v3573_v63, %v3571_v59 }
 0x698   : > { %v2056_v35 = vmul.f32 %v3575_v31, %v4437_v53  ;;  %v3577_v25 = vpop.eup %3576  ;;  %v2299_v31 = vld [vmem:[%s2295_s16 + $0x18] sm:$0xff] }
 0x69a   : > { %v2058_v7 = vadd.f32 %v2057_v0, %v2056_v35 }
 0x69c   : > { %3578 = vtanh.f32 %v2058_v7  ;;  %v2065_v37 = vsub.f32 %v2058_v7, %v4437_v53 }
 0x69e   : > { %v2071_v9 = vmul.f32 %v2069_v8, %v2065_v37 }
 0x6a0   : > { %v4488_v39 = vadd.f32 %v2071_v9, %v4437_v53 }
 0x6a6   : > { %v3579_v1 = vpop.eup %3578 }
 0x6a7   : > { %v2060_v19 = vmul.f32 %v3579_v1, %v3577_v25 }
 0x6a9   : > { %v2074_v21 = vsub.f32 %v2060_v19, %v4444_v14  ;;  %v2078_v22 = vmul.f32 %v2069_v8, %v2060_v19 }
 0x6ab   : > { %v2075_v24 = vmul.f32 %v2074_v21, %v2069_v8  ;;  %2080 = vst [vmem:[%s2079_s7] sm:$0xff] %v2078_v22 }
 0x6ad   : > { %v4495_v51 = vadd.f32 %v2075_v24, %v4444_v14 }
 0x6af   : > { %2161 = vmatmul.mubr.f32.vlgmr.msra.gmra.mrb[28].mxu0 %v4495_v51  ;;  %2232 = vmatmul.mubr.f32.vlgmr.msra.gmra.mrb[28].mxu1 %v4495_v51 }
 0x6b0   : > { %3379 = vmatpush1.bf16.msra.mxu0 %v3936_v32  ;;  %3411 = vmatpush1.bf16.msra.mxu1 %v3939_v33  ;;  %v2094_v33 = vld [vmem:[%s2091_s18 + $0x10] sm:$0xff] }
 0x6b1   : > { %3381 = vmatprep.subr.bf16.mxu0 %v3941_v34  ;;  %3413 = vmatprep.subr.bf16.mxu1 %v3946_v38 }
 0x6b2   : > { %2364 = vmatprep.mubr.f32.mxu0 %v3654_v11  ;;  %2435 = vmatprep.mubr.f32.mxu1 %v3654_v11  ;;  %v2092_v11 = vld [vmem:[%s2091_s18] sm:$0xff] }
 0x6b4   : > { %3383 = vmatpush1.bf16.msra.mxu0 %v3960_v46  ;;  %3415 = vmatpush1.bf16.msra.mxu1 %v3964_v47  ;;  %v2093_v47 = vld [vmem:[%s2091_s18 + $0x8] sm:$0xff] }
 0x6b5   : > { %3385 = vmatprep.subr.bf16.mxu0 %v3966_v48  ;;  %3417 = vmatprep.subr.bf16.mxu1 %v3972_v52  ;;  %v2095_v52 = vld [vmem:[%s2091_s18 + $0x18] sm:$0xff] }
 0x6b8   : > { %3387 = vmatpush1.bf16.msra.mxu0 %v3986_v60  ;;  %3419 = vmatpush1.bf16.msra.mxu1 %v3990_v61 }
 0x6b9   : > { %3389 = vmatprep.subr.bf16.mxu0 %v3992_v62  ;;  %3421 = vmatprep.subr.bf16.mxu1 %v3998_v2 }
 0x6bc   : > { %3391 = vmatpush1.bf16.msra.mxu0 %v4012_v10  ;;  %3423 = vmatpush1.bf16.msra.mxu1 %v4016_v12 }
 0x6bd   : > { %3393 = vmatprep.subr.bf16.mxu0 %v4018_v13  ;;  %3425 = vmatprep.subr.bf16.mxu1 %v4024_v17 }
 0x6c0   : > { %3395 = vmatpush1.bf16.msra.mxu0 %v4038_v27  ;;  %3427 = vmatpush1.bf16.msra.mxu1 %v4042_v28 }
 0x6c1   : > { %3397 = vmatprep.subr.bf16.mxu0 %v4044_v29  ;;  %3429 = vmatprep.subr.bf16.mxu1 %v4050_v36 }
 0x6c4   : > { %3399 = vmatpush1.bf16.msra.mxu0 %v4064_v45  ;;  %3431 = vmatpush1.bf16.msra.mxu1 %v4068_v49 }
 0x6c5   : > { %3401 = vmatprep.subr.bf16.mxu0 %v4070_v50  ;;  %3433 = vmatprep.subr.bf16.mxu1 %v4076_v55 }
 0x6c8   : > { %3403 = vmatpush1.bf16.msra.mxu0 %v4090_v4  ;;  %3435 = vmatpush1.bf16.msra.mxu1 %v4094_v5 }
 0x6c9   : > { %3405 = vmatprep.subr.bf16.mxu0 %v4096_v6  ;;  %3437 = vmatprep.subr.bf16.mxu1 %v4101_v3  ;;  %v2274_v3 = vpop.permute.xlu0 %2273 }
 0x6cc   : > { %3407 = vmatpush1.bf16.msra.mxu0 %v4109_v16  ;;  %3439 = vmatpush1.bf16.msra.mxu1 %v4113_v18 }
 0x782   : > { %v2162_v32 = vpop.f32.mrb[28].mxu0  ;;  %v2233_v34 = vpop.f32.mrb[28].mxu1 }
 0x783   : > { %v2238_v38 = vadd.f32 %v2162_v32, %v2092_v11  ;;  %v2240_v46 = vadd.f32 %v2233_v34, %v2094_v33  ;;  %v2164_v48 = vpop.f32.mrb[29].mxu0  ;;  %v2235_v60 = vpop.f32.mrb[29].mxu1 }
 0x784   : > { %v2239_v61 = vadd.f32 %v2164_v48, %v2093_v47  ;;  %v2241_v62 = vadd.f32 %v2235_v60, %v2095_v52 }
 0x785   : > { %v2775_v2 = vmul.f32 -1.442695, %v2238_v38  ;;  %v2478_v38 = vpop.permute.xlu1 %2477 }
 0x786   : > { %v2776_v10 = vmul.f32 -1.442695, %v2239_v61  ;;  %v2777_v12 = vmul.f32 -1.442695, %v2241_v62 }
 0x787   : > { %3580 = vpow2.f32 %v2775_v2 }
 0x788   : > { %3582 = vpow2.f32 %v2776_v10 }
 0x789   : > { %3584 = vpow2.f32 %v2777_v12 }
 0x78a   : > { %3586 = vtanh.f32 %v2240_v46 }
 0x791   : > { %v3581_v13 = vpop.eup %3580 }
 0x792   : > { %v3583_v17 = vpop.eup %3582  ;;  %v2245_v27 = vadd.f32 1.0, %v3581_v13 }
 0x793   : > { %v2251_v28 = vadd.f32 1.0, %v3583_v17  ;;  %v3585_v29 = vpop.eup %3584 }
 0x794   : > { %3588 = vrcp.f32 %v2245_v27  ;;  %v3587_v36 = vpop.eup %3586  ;;  %v2258_v55 = vadd.f32 1.0, %v3585_v29 }
 0x795   : > { %3590 = vrcp.f32 %v2251_v28 }
 0x796   : > { %3592 = vrcp.f32 %v2258_v55 }
 0x79e   : > { %v3589_v45 = vpop.eup %3588 }
 0x79f   : > { %v3591_v49 = vpop.eup %3590  ;;  %v2262_v50 = vmul.f32 %v3589_v45, %v3587_v36 }
 0x7a0   : > { %v2261_v4 = vmul.f32 %v3591_v49, %v4488_v39  ;;  %v3593_v53 = vpop.eup %3592 }
 0x7a2   : > { %v2263_v5 = vadd.f32 %v2262_v50, %v2261_v4 }
 0x7a4   : > { %3594 = vtanh.f32 %v2263_v5  ;;  %v2270_v6 = vsub.f32 %v2263_v5, %v4488_v39 }
 0x7a6   : > { %v2276_v16 = vmul.f32 %v2274_v3, %v2270_v6 }
 0x7a8   : > { %v2277_v18 = vadd.f32 %v2276_v16, %v4488_v39 }
 0x7ae   : > { %v3595_v14 = vpop.eup %3594 }
 0x7af   : > { %v2265_v57 = vmul.f32 %v3595_v14, %v3593_v53 }
 0x7b1   : > { %v2279_v58 = vsub.f32 %v2265_v57, %v4495_v51  ;;  %v2283_v30 = vmul.f32 %v2274_v3, %v2265_v57 }
 0x7b3   : > { %v2280_v20 = vmul.f32 %v2279_v58, %v2274_v3  ;;  %2285 = vst [vmem:[%s2284_s25] sm:$0xff] %v2283_v30 }
 0x7b5   : > { %v2281_v40 = vadd.f32 %v2280_v20, %v4495_v51 }
 0x7b7   : > { %2365 = vmatmul.mubr.f32.vlgmr.msra.gmra.mrb[30].mxu0 %v2281_v40  ;;  %2436 = vmatmul.mubr.f32.vlgmr.msra.gmra.mrb[30].mxu1 %v2281_v40 }
 0x88a   : > { %v2366_v41 = vpop.f32.mrb[30].mxu0  ;;  %v2437_v42 = vpop.f32.mrb[30].mxu1 }
 0x88b   : > { %v2442_v43 = vadd.f32 %v2366_v41, %v2296_v23  ;;  %v2368_v15 = vpop.f32.mrb[31].mxu0  ;;  %v2439_v54 = vpop.f32.mrb[31].mxu1  ;;  %v2444_v7 = vadd.f32 %v2437_v42, %v2298_v26 }
 0x88c   : > { %v2443_v56 = vadd.f32 %v2368_v15, %v2297_v44  ;;  %v2445_v0 = vadd.f32 %v2439_v54, %v2299_v31 }
 0x88d   : > { %v2781_v59 = vmul.f32 -1.442695, %v2442_v43 }
 0x88e   : > { %v2782_v63 = vmul.f32 -1.442695, %v2443_v56  ;;  %v2783_v35 = vmul.f32 -1.442695, %v2445_v0 }
 0x88f   : > { %3596 = vpow2.f32 %v2781_v59 }
 0x890   : > { %3598 = vpow2.f32 %v2782_v63 }
 0x891   : > { %3600 = vpow2.f32 %v2783_v35 }
 0x892   : > { %3602 = vtanh.f32 %v2444_v7 }
 0x899   : > { %v3597_v37 = vpop.eup %3596 }
 0x89a   : > { %v3599_v8 = vpop.eup %3598  ;;  %v2449_v9 = vadd.f32 1.0, %v3597_v37 }
 0x89b   : > { %v2455_v39 = vadd.f32 1.0, %v3599_v8  ;;  %v3601_v25 = vpop.eup %3600 }
 0x89c   : > { %3604 = vrcp.f32 %v2449_v9  ;;  %v3603_v1 = vpop.eup %3602  ;;  %v2462_v24 = vadd.f32 1.0, %v3601_v25 }
 0x89d   : > { %3606 = vrcp.f32 %v2455_v39 }
 0x89e   : > { %3608 = vrcp.f32 %v2462_v24 }
 0x8a6   : > { %v3605_v19 = vpop.eup %3604 }
 0x8a7   : > { %v3607_v21 = vpop.eup %3606  ;;  %v2466_v22 = vmul.f32 %v3605_v19, %v3603_v1 }
 0x8a8   : > { %v2465_v51 = vmul.f32 %v3607_v21, %v2277_v18  ;;  %v3609_v32 = vpop.eup %3608 }
 0x8aa   : > { %v2467_v11 = vadd.f32 %v2466_v22, %v2465_v51 }
 0x8ac   : > { %3610 = vtanh.f32 %v2467_v11 }
 0x8b5   : > { %2497 = sbr.rel (!%p3717_p3) target bundleno = 2248 (0x8c8), region = 48 }
 0x8b6   : > { %v3611_v33 = vpop.eup %3610 }
 0x8b7   : > { %v2469_v34 = vmul.f32 %v3611_v33, %v3609_v32 }
 0x8b9   : > { %v2487_v46 = vmul.f32 %v2478_v38, %v2469_v34 }
 0x8bb   : > { %2490 = vst [vmem:[%s2489_s29] sm:$0xff] %v2487_v46 }
 0x8c2   : > { %v2549_v47 = vld [vmem:[%s4211_s17] sm:$0xff]  ;;  %v2551_v48 = vld [vmem:[%s4211_s17 + $0x8] sm:$0xff]  ;;  %v2553_v52 = vld [vmem:[%s4211_s17 + $0x10] sm:$0xff] }
 0x8c3   : > { %v2555_v60 = vld [vmem:[%s4211_s17 + $0x18] sm:$0xff]  ;;  %v2557_v61 = vld [vmem:[%s4211_s17 + $0x20] sm:$0xff]  ;;  %v2559_v62 = vld [vmem:[%s4211_s17 + $0x28] sm:$0xff]  ;;  %2550 = vst [vmem:[%s2507_s9] sm:$0xff] %v2549_v47 }
 0x8c4   : > { %2552 = vst [vmem:[%s2507_s9 + $0x10] sm:$0xff] %v2551_v48  ;;  %2554 = vst [vmem:[%s2507_s9 + $0x20] sm:$0xff] %v2553_v52  ;;  %v2561_v2 = vld [vmem:[%s4211_s17 + $0x30] sm:$0xff]  ;;  %v2563_v10 = vld [vmem:[%s4211_s17 + $0x38] sm:$0xff] }
 0x8c5   : > { %2556 = vst [vmem:[%s2507_s9 + $0x30] sm:$0xff] %v2555_v60  ;;  %2558 = vst [vmem:[%s2507_s9 + $0x40] sm:$0xff] %v2557_v61 }
 0x8c6   : > { %2560 = vst [vmem:[%s2507_s9 + $0x50] sm:$0xff] %v2559_v62  ;;  %2562 = vst [vmem:[%s2507_s9 + $0x60] sm:$0xff] %v2561_v2 }
 0x8c7   : > { %2564 = vst [vmem:[%s2507_s9 + $0x70] sm:$0xff] %v2563_v10 }
 0x8c8 PF: > { %s15_s22 = sadd.s32 1, %s3651_s22   ;;  %s4586_s18 = smov %s3639_s19 }
 0x8c9   : > { %p12_p9 = scmp.ge.s32.totalorder %s15_s22, 4   ;;  %s4587_s19 = smov %s3726_s28 }
 0x8ca   : > { %s4588_s20 = smov %s3647_s21  ;;  %s4589_s21 = smov %s4591_s24 }
 0x8cb   :  { %14 = sbr.rel (!%p12_p9) target bundleno = 3 (0x3), region = 137 }

</bundles_post_ra>
